<compile_context>
chip_gen: v6e
topology: v6e:2x2x1
jax: 0.10.0
libtpu: 0.0.40
codegen_flags: <defaults>
</compile_context>

<pallas_src>
import numpy as np

import jax
import jax.numpy as jnp
from jax.experimental import pallas as pl
from jax.experimental.pallas import tpu as pltpu

BT = 8  # images per grid step (== f32 sublane tile)


# --------------------------------------------------------------------------
# Fused Pallas kernel (one batch tile of BT images per grid step)
# --------------------------------------------------------------------------
def _cnn_mnist_kernel(x_ref, band1_ref, cb1_ref, s1e_ref, s1o_ref,
                      band2_ref, cb2_ref, s2e_ref, s2o_ref,
                      gfc1_ref, fb1_ref, wfc2_ref, fb2_ref, out_ref):
    f32 = jnp.float32
    bf16 = jnp.bfloat16

    x = x_ref[...]                                   # (28, BT, 28)  [H, B, W]

    # ---- conv1 (+bias): banded MXU matmuls, accumulated over kh ----
    acc1 = jnp.zeros((24 * BT, 240), dtype=f32)
    for kh in range(5):
        xs = x[kh:kh + 24].reshape(24 * BT, 28)      # rows=(i,b), lanes=w'
        acc1 = acc1 + jnp.dot(xs.astype(bf16), band1_ref[kh],
                              preferred_element_type=f32)
    c1 = acc1 + cb1_ref[...]                         # (192, 240) lanes=(w, co)

    # ---- 2x2 max-pool + relu ----
    a1 = c1.reshape(12, 2, BT, 240)                  # rows split: (i2, di, b)
    hmax1 = jnp.maximum(a1[:, 0], a1[:, 1]).reshape(12 * BT, 240)
    p1 = jnp.maximum(
        jnp.maximum(jnp.dot(hmax1, s1e_ref[...], preferred_element_type=f32),
                    jnp.dot(hmax1, s1o_ref[...], preferred_element_type=f32)),
        0.0)                                         # (96, 120) lanes=(w, ci)

    # ---- conv2 (+bias); Dropout2d is identity at eval ----
    p1r = p1.reshape(12, BT, 120)
    acc2 = jnp.zeros((8 * BT, 160), dtype=f32)
    for kh in range(5):
        ps = p1r[kh:kh + 8].reshape(8 * BT, 120)
        acc2 = acc2 + jnp.dot(ps.astype(bf16), band2_ref[kh],
                              preferred_element_type=f32)
    c2 = acc2 + cb2_ref[...]                         # (64, 160) lanes=(j, co2)

    # ---- 2x2 max-pool + relu ----
    a2 = c2.reshape(4, 2, BT, 160)
    hmax2 = jnp.maximum(a2[:, 0], a2[:, 1]).reshape(4 * BT, 160)
    p2 = jnp.maximum(
        jnp.maximum(jnp.dot(hmax2, s2e_ref[...], preferred_element_type=f32),
                    jnp.dot(hmax2, s2o_ref[...], preferred_element_type=f32)),
        0.0)                                         # (32, 80) lanes=(j2, co2)

    # ---- fc1 + relu (NCHW flatten folded into gfc1); dropout == identity ----
    p2r = p2.reshape(4, BT, 80)
    hacc = jnp.zeros((BT, 50), dtype=f32)
    for i2 in range(4):
        hacc = hacc + jnp.dot(p2r[i2].astype(bf16), gfc1_ref[i2],
                              preferred_element_type=f32)
    h1 = jnp.maximum(hacc + fb1_ref[...], 0.0)       # (BT, 50)

    # ---- fc2 + log_softmax (lane-padded to 128; pad bias = -1e30) ----
    logits = jnp.dot(h1.astype(bf16), wfc2_ref[...],
                     preferred_element_type=f32) + fb2_ref[...]   # (BT, 128)
    m = jnp.max(logits, axis=-1, keepdims=True)
    ls = logits - m
    lse = jnp.log(jnp.sum(jnp.exp(ls), axis=-1, keepdims=True))
    out_ref[...] = (ls - lse).astype(out_ref.dtype)


# --------------------------------------------------------------------------
# One-time weight packing (host-side numpy; done once at init)
# --------------------------------------------------------------------------
def pack_params(params):
    w1 = np.asarray(params["conv1_w"], np.float32)   # (10, 1, 5, 5)
    b1 = np.asarray(params["conv1_b"], np.float32)
    w2 = np.asarray(params["conv2_w"], np.float32)   # (20, 10, 5, 5)
    b2 = np.asarray(params["conv2_b"], np.float32)
    wf1 = np.asarray(params["fc1_w"], np.float32)    # (50, 320)
    bf1 = np.asarray(params["fc1_b"], np.float32)
    wf2 = np.asarray(params["fc2_w"], np.float32)    # (num_classes, 50)
    bf2 = np.asarray(params["fc2_b"], np.float32)
    nc = wf2.shape[0]
    assert nc <= 128

    # conv1 banded weights: band1[kh, w', w*10+co] = w1[co, 0, kh, w'-w]
    band1 = np.zeros((5, 28, 240), np.float32)
    for kh in range(5):
        for w in range(24):
            for kw in range(5):
                band1[kh, w + kw, w * 10:(w + 1) * 10] = w1[:, 0, kh, kw]
    cb1 = np.tile(b1, 24).reshape(1, 240)

    # pool1 exact 0/1 lane-selection: even/odd W groups (group width = 10)
    s1e = np.zeros((240, 120), np.float32)
    s1o = np.zeros((240, 120), np.float32)
    for m in range(12):
        for c in range(10):
            s1e[(2 * m) * 10 + c, m * 10 + c] = 1.0
            s1o[(2 * m + 1) * 10 + c, m * 10 + c] = 1.0

    # conv2 banded weights: band2[kh, j'*10+ci, j*20+co] = w2[co, ci, kh, j'-j]
    band2 = np.zeros((5, 120, 160), np.float32)
    for kh in range(5):
        for j in range(8):
            for kw in range(5):
                band2[kh, (j + kw) * 10:(j + kw) * 10 + 10,
                      j * 20:(j + 1) * 20] = w2[:, :, kh, kw].T   # (ci, co)
    cb2 = np.tile(b2, 8).reshape(1, 160)

    # pool2 selection (group width = 20)
    s2e = np.zeros((160, 80), np.float32)
    s2o = np.zeros((160, 80), np.float32)
    for m in range(4):
        for c in range(20):
            s2e[(2 * m) * 20 + c, m * 20 + c] = 1.0
            s2o[(2 * m + 1) * 20 + c, m * 20 + c] = 1.0

    # fc1 with the PyTorch NCHW flatten (k = co*16 + i2*4 + j2) folded in:
    # gfc1[i2, j2*20+co, n] = wf1[n, co*16 + i2*4 + j2]
    gfc1 = np.zeros((4, 80, 50), np.float32)
    for i2 in range(4):
        for j2 in range(4):
            for co in range(20):
                gfc1[i2, j2 * 20 + co, :] = wf1[:, co * 16 + i2 * 4 + j2]
    fb1 = bf1.reshape(1, 50)

    # fc2 padded to 128 lanes; padded bias = -1e30 so log_softmax is exact
    wfc2 = np.zeros((50, 128), np.float32)
    wfc2[:, :nc] = wf2.T
    fb2 = np.full((1, 128), -1e30, np.float32)
    fb2[0, :nc] = bf2

    bf = jnp.bfloat16
    return {
        "band1": jnp.asarray(band1, bf), "cb1": jnp.asarray(cb1),
        "s1e": jnp.asarray(s1e), "s1o": jnp.asarray(s1o),
        "band2": jnp.asarray(band2, bf), "cb2": jnp.asarray(cb2),
        "s2e": jnp.asarray(s2e), "s2o": jnp.asarray(s2o),
        "gfc1": jnp.asarray(gfc1, bf), "fb1": jnp.asarray(fb1),
        "wfc2": jnp.asarray(wfc2, bf), "fb2": jnp.asarray(fb2),
    }


# --------------------------------------------------------------------------
# Forward wrapper
# --------------------------------------------------------------------------
def cnn_mnist_forward(packed, x_nchw, *, num_classes=10):
    """x_nchw: (B, 1, 28, 28) float32 — same input as the PyTorch module."""
    B = x_nchw.shape[0]
    x = x_nchw.reshape(B, 28, 28).astype(jnp.float32)
    Bpad = ((B + BT - 1) // BT) * BT
    if Bpad != B:
        x = jnp.pad(x, ((0, Bpad - B), (0, 0), (0, 0)))
    x_hwb = jnp.transpose(x, (1, 0, 2))              # (28, Bpad, 28) [H, B, W]
    nb = Bpad // BT

    out = pl.pallas_call(
        _cnn_mnist_kernel,
        out_shape=jax.ShapeDtypeStruct((Bpad, 128), jnp.float32),
        grid=(nb,),
        in_specs=[
            pl.BlockSpec((28, BT, 28), lambda i: (0, i, 0)),   # x tile
            pl.BlockSpec((5, 28, 240), lambda i: (0, 0, 0)),   # band1
            pl.BlockSpec((1, 240), lambda i: (0, 0)),          # conv1 bias
            pl.BlockSpec((240, 120), lambda i: (0, 0)),        # pool1 even
            pl.BlockSpec((240, 120), lambda i: (0, 0)),        # pool1 odd
            pl.BlockSpec((5, 120, 160), lambda i: (0, 0, 0)),  # band2
            pl.BlockSpec((1, 160), lambda i: (0, 0)),          # conv2 bias
            pl.BlockSpec((160, 80), lambda i: (0, 0)),         # pool2 even
            pl.BlockSpec((160, 80), lambda i: (0, 0)),         # pool2 odd
            pl.BlockSpec((4, 80, 50), lambda i: (0, 0, 0)),    # fc1 (folded)
            pl.BlockSpec((1, 50), lambda i: (0, 0)),           # fc1 bias
            pl.BlockSpec((50, 128), lambda i: (0, 0)),         # fc2 (padded)
            pl.BlockSpec((1, 128), lambda i: (0, 0)),          # fc2 bias
        ],
        out_specs=pl.BlockSpec((BT, 128), lambda i: (i, 0)),
        compiler_params=pltpu.CompilerParams(
            dimension_semantics=("parallel",)),
    )(x_hwb, packed["band1"], packed["cb1"], packed["s1e"], packed["s1o"],
      packed["band2"], packed["cb2"], packed["s2e"], packed["s2o"],
      packed["gfc1"], packed["fb1"], packed["wfc2"], packed["fb2"])

    return out[:B, :num_classes]


# --------------------------------------------------------------------------
# Parameter init (mirrors PyTorch defaults) + pure-JAX reference
# --------------------------------------------------------------------------
def init_params(key, num_classes=10):
    ks = jax.random.split(key, 8)

    def u(k, shape, fan_in):
        bound = 1.0 / jnp.sqrt(jnp.float32(fan_in))
        return jax.random.uniform(k, shape, jnp.float32, -bound, bound)

    return {
        "conv1_w": u(ks[0], (10, 1, 5, 5), 1 * 25),
        "conv1_b": u(ks[1], (10,), 1 * 25),
        "conv2_w": u(ks[2], (20, 10, 5, 5), 10 * 25),
        "conv2_b": u(ks[3], (20,), 10 * 25),
        "fc1_w":   u(ks[4], (50, 320), 320),
        "fc1_b":   u(ks[5], (50,), 320),
        "fc2_w":   u(ks[6], (num_classes, 50), 50),
        "fc2_b":   u(ks[7], (num_classes,), 50),
    }


def cnn_mnist_reference(params, x_nchw):
    """Plain-JAX/XLA reference of the PyTorch module (eval mode)."""
    x = x_nchw.astype(jnp.float32)
    dn = ("NCHW", "OIHW", "NCHW")
    c1 = jax.lax.conv_general_dilated(x, params["conv1_w"], (1, 1), "VALID",
                                      dimension_numbers=dn)
    c1 = c1 + params["conv1_b"][None, :, None, None]
    p1 = jax.nn.relu(jax.lax.reduce_window(c1, -jnp.inf, jax.lax.max,
                                           (1, 1, 2, 2), (1, 1, 2, 2), "VALID"))
    c2 = jax.lax.conv_general_dilated(p1, params["conv2_w"], (1, 1), "VALID",
                                      dimension_numbers=dn)
    c2 = c2 + params["conv2_b"][None, :, None, None]
    p2 = jax.nn.relu(jax.lax.reduce_window(c2, -jnp.inf, jax.lax.max,
                                           (1, 1, 2, 2), (1, 1, 2, 2), "VALID"))
    f = p2.reshape(x.shape[0], 320)
    h = jax.nn.relu(f @ params["fc1_w"].T + params["fc1_b"])
    logits = h @ params["fc2_w"].T + params["fc2_b"]
    return jax.nn.log_softmax(logits, axis=-1)


if __name__ == "__main__":
    key = jax.random.PRNGKey(0)
    kp, kx = jax.random.split(key)

    num_classes = 10
    params = init_params(kp, num_classes=num_classes)
    packed = pack_params(params)

    # MNIST-shaped input (fc1's 320 = 20*4*4 forces 28x28): batch=2, 1x28x28.
    x = jax.random.normal(kx, (2, 1, 28, 28), dtype=jnp.float32)

    fwd = jax.jit(cnn_mnist_forward, static_argnames=("num_classes",))
    log_probs = fwd(packed, x, num_classes=num_classes)
    jax.block_until_ready(log_probs)

    assert log_probs.shape == (2, num_classes)
    # log_softmax rows must sum to ~1 in probability space.
    assert bool(jnp.all(jnp.abs(jnp.sum(jnp.exp(log_probs), axis=1) - 1.0) < 2e-3))
    # Match the f32 XLA reference (loose tol: conv/fc matmuls use bf16 MXU inputs).
    ref = cnn_mnist_reference(params, x)
    assert bool(jnp.all(jnp.abs(log_probs - ref) < 7e-2))

    print("KERNEL_OK")
</pallas_src>

<mosaic_0001>
module attributes {stable_mosaic.version = 11 : i64} {
  func.func @_cnn_mnist_kernel(%arg0: i32, %arg1: memref<28x8x28xf32, #tpu.memory_space<vmem>>, %arg2: memref<5x28x240xbf16, #tpu.memory_space<vmem>>, %arg3: memref<1x240xf32, #tpu.memory_space<vmem>>, %arg4: memref<240x120xf32, #tpu.memory_space<vmem>>, %arg5: memref<240x120xf32, #tpu.memory_space<vmem>>, %arg6: memref<5x120x160xbf16, #tpu.memory_space<vmem>>, %arg7: memref<1x160xf32, #tpu.memory_space<vmem>>, %arg8: memref<160x80xf32, #tpu.memory_space<vmem>>, %arg9: memref<160x80xf32, #tpu.memory_space<vmem>>, %arg10: memref<4x80x50xbf16, #tpu.memory_space<vmem>>, %arg11: memref<1x50xf32, #tpu.memory_space<vmem>>, %arg12: memref<50x128xbf16, #tpu.memory_space<vmem>>, %arg13: memref<1x128xf32, #tpu.memory_space<vmem>>, %arg14: memref<8x128xf32, #tpu.memory_space<vmem>>) attributes {dimension_semantics = [#tpu.dimension_semantics<parallel>], iteration_bounds = array<i64: 1>, scalar_prefetch = 0 : i64, scratch_operands = 0 : i64, tpu.core_type = #tpu.core_type<tc>, window_params = [{transform_indices = @transform_0, window_bounds = array<i64: 28, 8, 28>}, {pipeline_mode = #tpu.pipeline_mode<synchronous>, transform_indices = @transform_1, window_bounds = array<i64: 5, 28, 240>}, {pipeline_mode = #tpu.pipeline_mode<synchronous>, transform_indices = @transform_2, window_bounds = array<i64: 1, 240>}, {pipeline_mode = #tpu.pipeline_mode<synchronous>, transform_indices = @transform_3, window_bounds = array<i64: 240, 120>}, {pipeline_mode = #tpu.pipeline_mode<synchronous>, transform_indices = @transform_4, window_bounds = array<i64: 240, 120>}, {pipeline_mode = #tpu.pipeline_mode<synchronous>, transform_indices = @transform_5, window_bounds = array<i64: 5, 120, 160>}, {pipeline_mode = #tpu.pipeline_mode<synchronous>, transform_indices = @transform_6, window_bounds = array<i64: 1, 160>}, {pipeline_mode = #tpu.pipeline_mode<synchronous>, transform_indices = @transform_7, window_bounds = array<i64: 160, 80>}, {pipeline_mode = #tpu.pipeline_mode<synchronous>, transform_indices = @transform_8, window_bounds = array<i64: 160, 80>}, {pipeline_mode = #tpu.pipeline_mode<synchronous>, transform_indices = @transform_9, window_bounds = array<i64: 4, 80, 50>}, {pipeline_mode = #tpu.pipeline_mode<synchronous>, transform_indices = @transform_10, window_bounds = array<i64: 1, 50>}, {pipeline_mode = #tpu.pipeline_mode<synchronous>, transform_indices = @transform_11, window_bounds = array<i64: 50, 128>}, {pipeline_mode = #tpu.pipeline_mode<synchronous>, transform_indices = @transform_12, window_bounds = array<i64: 1, 128>}, {transform_indices = @transform_13, window_bounds = array<i64: 8, 128>}]} {
    %c0 = arith.constant 0 : index
    %c0_0 = arith.constant 0 : index
    %c0_1 = arith.constant 0 : index
    %0 = vector.load %arg1[%c0, %c0_0, %c0_1] : memref<28x8x28xf32, #tpu.memory_space<vmem>>, vector<28x8x28xf32>
    %cst = arith.constant 0.000000e+00 : f32
    %1 = vector.broadcast %cst : f32 to vector<192x240xf32>
    %2 = vector.extract_strided_slice %0 {offsets = [0, 0, 0], sizes = [24, 8, 28], strides = [1, 1, 1]} : vector<28x8x28xf32> to vector<24x8x28xf32>
    %3 = vector.shape_cast %2 : vector<24x8x28xf32> to vector<192x28xf32>
    %4 = arith.truncf %3 : vector<192x28xf32> to vector<192x28xbf16>
    %c0_2 = arith.constant 0 : index
    %c0_3 = arith.constant 0 : index
    %c0_4 = arith.constant 0 : index
    %5 = vector.load %arg2[%c0_2, %c0_3, %c0_4] : memref<5x28x240xbf16, #tpu.memory_space<vmem>>, vector<1x28x240xbf16>
    %6 = vector.shape_cast %5 : vector<1x28x240xbf16> to vector<28x240xbf16>
    %cst_5 = arith.constant dense<0.000000e+00> : vector<192x240xf32>
    %7 = tpu.matmul %4, %6, %cst_5 {dimension_numbers = #tpu.dot_dimension_numbers<[1], [0], [0], [1], [0, 0, 1, 1], [], []>} : vector<192x28xbf16>, vector<28x240xbf16>, vector<192x240xf32> -> vector<192x240xf32>
    %8 = arith.addf %1, %7 : vector<192x240xf32>
    %9 = vector.extract_strided_slice %0 {offsets = [1, 0, 0], sizes = [24, 8, 28], strides = [1, 1, 1]} : vector<28x8x28xf32> to vector<24x8x28xf32>
    %10 = vector.shape_cast %9 : vector<24x8x28xf32> to vector<192x28xf32>
    %11 = arith.truncf %10 : vector<192x28xf32> to vector<192x28xbf16>
    %c1 = arith.constant 1 : index
    %c0_6 = arith.constant 0 : index
    %c0_7 = arith.constant 0 : index
    %12 = vector.load %arg2[%c1, %c0_6, %c0_7] : memref<5x28x240xbf16, #tpu.memory_space<vmem>>, vector<1x28x240xbf16>
    %13 = vector.shape_cast %12 : vector<1x28x240xbf16> to vector<28x240xbf16>
    %cst_8 = arith.constant dense<0.000000e+00> : vector<192x240xf32>
    %14 = tpu.matmul %11, %13, %cst_8 {dimension_numbers = #tpu.dot_dimension_numbers<[1], [0], [0], [1], [0, 0, 1, 1], [], []>} : vector<192x28xbf16>, vector<28x240xbf16>, vector<192x240xf32> -> vector<192x240xf32>
    %15 = arith.addf %8, %14 : vector<192x240xf32>
    %16 = vector.extract_strided_slice %0 {offsets = [2, 0, 0], sizes = [24, 8, 28], strides = [1, 1, 1]} : vector<28x8x28xf32> to vector<24x8x28xf32>
    %17 = vector.shape_cast %16 : vector<24x8x28xf32> to vector<192x28xf32>
    %18 = arith.truncf %17 : vector<192x28xf32> to vector<192x28xbf16>
    %c2 = arith.constant 2 : index
    %c0_9 = arith.constant 0 : index
    %c0_10 = arith.constant 0 : index
    %19 = vector.load %arg2[%c2, %c0_9, %c0_10] : memref<5x28x240xbf16, #tpu.memory_space<vmem>>, vector<1x28x240xbf16>
    %20 = vector.shape_cast %19 : vector<1x28x240xbf16> to vector<28x240xbf16>
    %cst_11 = arith.constant dense<0.000000e+00> : vector<192x240xf32>
    %21 = tpu.matmul %18, %20, %cst_11 {dimension_numbers = #tpu.dot_dimension_numbers<[1], [0], [0], [1], [0, 0, 1, 1], [], []>} : vector<192x28xbf16>, vector<28x240xbf16>, vector<192x240xf32> -> vector<192x240xf32>
    %22 = arith.addf %15, %21 : vector<192x240xf32>
    %23 = vector.extract_strided_slice %0 {offsets = [3, 0, 0], sizes = [24, 8, 28], strides = [1, 1, 1]} : vector<28x8x28xf32> to vector<24x8x28xf32>
    %24 = vector.shape_cast %23 : vector<24x8x28xf32> to vector<192x28xf32>
    %25 = arith.truncf %24 : vector<192x28xf32> to vector<192x28xbf16>
    %c3 = arith.constant 3 : index
    %c0_12 = arith.constant 0 : index
    %c0_13 = arith.constant 0 : index
    %26 = vector.load %arg2[%c3, %c0_12, %c0_13] : memref<5x28x240xbf16, #tpu.memory_space<vmem>>, vector<1x28x240xbf16>
    %27 = vector.shape_cast %26 : vector<1x28x240xbf16> to vector<28x240xbf16>
    %cst_14 = arith.constant dense<0.000000e+00> : vector<192x240xf32>
    %28 = tpu.matmul %25, %27, %cst_14 {dimension_numbers = #tpu.dot_dimension_numbers<[1], [0], [0], [1], [0, 0, 1, 1], [], []>} : vector<192x28xbf16>, vector<28x240xbf16>, vector<192x240xf32> -> vector<192x240xf32>
    %29 = arith.addf %22, %28 : vector<192x240xf32>
    %30 = vector.extract_strided_slice %0 {offsets = [4, 0, 0], sizes = [24, 8, 28], strides = [1, 1, 1]} : vector<28x8x28xf32> to vector<24x8x28xf32>
    %31 = vector.shape_cast %30 : vector<24x8x28xf32> to vector<192x28xf32>
    %32 = arith.truncf %31 : vector<192x28xf32> to vector<192x28xbf16>
    %c4 = arith.constant 4 : index
    %c0_15 = arith.constant 0 : index
    %c0_16 = arith.constant 0 : index
    %33 = vector.load %arg2[%c4, %c0_15, %c0_16] : memref<5x28x240xbf16, #tpu.memory_space<vmem>>, vector<1x28x240xbf16>
    %34 = vector.shape_cast %33 : vector<1x28x240xbf16> to vector<28x240xbf16>
    %cst_17 = arith.constant dense<0.000000e+00> : vector<192x240xf32>
    %35 = tpu.matmul %32, %34, %cst_17 {dimension_numbers = #tpu.dot_dimension_numbers<[1], [0], [0], [1], [0, 0, 1, 1], [], []>} : vector<192x28xbf16>, vector<28x240xbf16>, vector<192x240xf32> -> vector<192x240xf32>
    %36 = arith.addf %29, %35 : vector<192x240xf32>
    %c0_18 = arith.constant 0 : index
    %c0_19 = arith.constant 0 : index
    %37 = vector.load %arg3[%c0_18, %c0_19] : memref<1x240xf32, #tpu.memory_space<vmem>>, vector<1x240xf32>
    %38 = vector.broadcast %37 : vector<1x240xf32> to vector<192x240xf32>
    %39 = arith.addf %36, %38 : vector<192x240xf32>
    %40 = vector.shape_cast %39 : vector<192x240xf32> to vector<12x2x8x240xf32>
    %41 = vector.extract_strided_slice %40 {offsets = [0, 0, 0, 0], sizes = [12, 1, 8, 240], strides = [1, 1, 1, 1]} : vector<12x2x8x240xf32> to vector<12x1x8x240xf32>
    %42 = vector.shape_cast %41 : vector<12x1x8x240xf32> to vector<12x8x240xf32>
    %43 = vector.extract_strided_slice %40 {offsets = [0, 1, 0, 0], sizes = [12, 1, 8, 240], strides = [1, 1, 1, 1]} : vector<12x2x8x240xf32> to vector<12x1x8x240xf32>
    %44 = vector.shape_cast %43 : vector<12x1x8x240xf32> to vector<12x8x240xf32>
    %45 = arith.maximumf %42, %44 : vector<12x8x240xf32>
    %46 = vector.shape_cast %45 : vector<12x8x240xf32> to vector<96x240xf32>
    %c0_20 = arith.constant 0 : index
    %c0_21 = arith.constant 0 : index
    %47 = vector.load %arg4[%c0_20, %c0_21] : memref<240x120xf32, #tpu.memory_space<vmem>>, vector<240x120xf32>
    %cst_22 = arith.constant dense<0.000000e+00> : vector<96x120xf32>
    %48 = tpu.matmul %46, %47, %cst_22 {dimension_numbers = #tpu.dot_dimension_numbers<[1], [0], [0], [1], [0, 0, 1, 1], [], []>} : vector<96x240xf32>, vector<240x120xf32>, vector<96x120xf32> -> vector<96x120xf32>
    %c0_23 = arith.constant 0 : index
    %c0_24 = arith.constant 0 : index
    %49 = vector.load %arg5[%c0_23, %c0_24] : memref<240x120xf32, #tpu.memory_space<vmem>>, vector<240x120xf32>
    %cst_25 = arith.constant dense<0.000000e+00> : vector<96x120xf32>
    %50 = tpu.matmul %46, %49, %cst_25 {dimension_numbers = #tpu.dot_dimension_numbers<[1], [0], [0], [1], [0, 0, 1, 1], [], []>} : vector<96x240xf32>, vector<240x120xf32>, vector<96x120xf32> -> vector<96x120xf32>
    %51 = arith.maximumf %48, %50 : vector<96x120xf32>
    %cst_26 = arith.constant 0.000000e+00 : f32
    %52 = vector.broadcast %cst_26 : f32 to vector<96x120xf32>
    %53 = arith.maximumf %51, %52 : vector<96x120xf32>
    %54 = vector.shape_cast %53 : vector<96x120xf32> to vector<12x8x120xf32>
    %cst_27 = arith.constant 0.000000e+00 : f32
    %55 = vector.broadcast %cst_27 : f32 to vector<64x160xf32>
    %56 = vector.extract_strided_slice %54 {offsets = [0, 0, 0], sizes = [8, 8, 120], strides = [1, 1, 1]} : vector<12x8x120xf32> to vector<8x8x120xf32>
    %57 = vector.shape_cast %56 : vector<8x8x120xf32> to vector<64x120xf32>
    %58 = arith.truncf %57 : vector<64x120xf32> to vector<64x120xbf16>
    %c0_28 = arith.constant 0 : index
    %c0_29 = arith.constant 0 : index
    %c0_30 = arith.constant 0 : index
    %59 = vector.load %arg6[%c0_28, %c0_29, %c0_30] : memref<5x120x160xbf16, #tpu.memory_space<vmem>>, vector<1x120x160xbf16>
    %60 = vector.shape_cast %59 : vector<1x120x160xbf16> to vector<120x160xbf16>
    %cst_31 = arith.constant dense<0.000000e+00> : vector<64x160xf32>
    %61 = tpu.matmul %58, %60, %cst_31 {dimension_numbers = #tpu.dot_dimension_numbers<[1], [0], [0], [1], [0, 0, 1, 1], [], []>} : vector<64x120xbf16>, vector<120x160xbf16>, vector<64x160xf32> -> vector<64x160xf32>
    %62 = arith.addf %55, %61 : vector<64x160xf32>
    %63 = vector.extract_strided_slice %54 {offsets = [1, 0, 0], sizes = [8, 8, 120], strides = [1, 1, 1]} : vector<12x8x120xf32> to vector<8x8x120xf32>
    %64 = vector.shape_cast %63 : vector<8x8x120xf32> to vector<64x120xf32>
    %65 = arith.truncf %64 : vector<64x120xf32> to vector<64x120xbf16>
    %c1_32 = arith.constant 1 : index
    %c0_33 = arith.constant 0 : index
    %c0_34 = arith.constant 0 : index
    %66 = vector.load %arg6[%c1_32, %c0_33, %c0_34] : memref<5x120x160xbf16, #tpu.memory_space<vmem>>, vector<1x120x160xbf16>
    %67 = vector.shape_cast %66 : vector<1x120x160xbf16> to vector<120x160xbf16>
    %cst_35 = arith.constant dense<0.000000e+00> : vector<64x160xf32>
    %68 = tpu.matmul %65, %67, %cst_35 {dimension_numbers = #tpu.dot_dimension_numbers<[1], [0], [0], [1], [0, 0, 1, 1], [], []>} : vector<64x120xbf16>, vector<120x160xbf16>, vector<64x160xf32> -> vector<64x160xf32>
    %69 = arith.addf %62, %68 : vector<64x160xf32>
    %70 = vector.extract_strided_slice %54 {offsets = [2, 0, 0], sizes = [8, 8, 120], strides = [1, 1, 1]} : vector<12x8x120xf32> to vector<8x8x120xf32>
    %71 = vector.shape_cast %70 : vector<8x8x120xf32> to vector<64x120xf32>
    %72 = arith.truncf %71 : vector<64x120xf32> to vector<64x120xbf16>
    %c2_36 = arith.constant 2 : index
    %c0_37 = arith.constant 0 : index
    %c0_38 = arith.constant 0 : index
    %73 = vector.load %arg6[%c2_36, %c0_37, %c0_38] : memref<5x120x160xbf16, #tpu.memory_space<vmem>>, vector<1x120x160xbf16>
    %74 = vector.shape_cast %73 : vector<1x120x160xbf16> to vector<120x160xbf16>
    %cst_39 = arith.constant dense<0.000000e+00> : vector<64x160xf32>
    %75 = tpu.matmul %72, %74, %cst_39 {dimension_numbers = #tpu.dot_dimension_numbers<[1], [0], [0], [1], [0, 0, 1, 1], [], []>} : vector<64x120xbf16>, vector<120x160xbf16>, vector<64x160xf32> -> vector<64x160xf32>
    %76 = arith.addf %69, %75 : vector<64x160xf32>
    %77 = vector.extract_strided_slice %54 {offsets = [3, 0, 0], sizes = [8, 8, 120], strides = [1, 1, 1]} : vector<12x8x120xf32> to vector<8x8x120xf32>
    %78 = vector.shape_cast %77 : vector<8x8x120xf32> to vector<64x120xf32>
    %79 = arith.truncf %78 : vector<64x120xf32> to vector<64x120xbf16>
    %c3_40 = arith.constant 3 : index
    %c0_41 = arith.constant 0 : index
    %c0_42 = arith.constant 0 : index
    %80 = vector.load %arg6[%c3_40, %c0_41, %c0_42] : memref<5x120x160xbf16, #tpu.memory_space<vmem>>, vector<1x120x160xbf16>
    %81 = vector.shape_cast %80 : vector<1x120x160xbf16> to vector<120x160xbf16>
    %cst_43 = arith.constant dense<0.000000e+00> : vector<64x160xf32>
    %82 = tpu.matmul %79, %81, %cst_43 {dimension_numbers = #tpu.dot_dimension_numbers<[1], [0], [0], [1], [0, 0, 1, 1], [], []>} : vector<64x120xbf16>, vector<120x160xbf16>, vector<64x160xf32> -> vector<64x160xf32>
    %83 = arith.addf %76, %82 : vector<64x160xf32>
    %84 = vector.extract_strided_slice %54 {offsets = [4, 0, 0], sizes = [8, 8, 120], strides = [1, 1, 1]} : vector<12x8x120xf32> to vector<8x8x120xf32>
    %85 = vector.shape_cast %84 : vector<8x8x120xf32> to vector<64x120xf32>
    %86 = arith.truncf %85 : vector<64x120xf32> to vector<64x120xbf16>
    %c4_44 = arith.constant 4 : index
    %c0_45 = arith.constant 0 : index
    %c0_46 = arith.constant 0 : index
    %87 = vector.load %arg6[%c4_44, %c0_45, %c0_46] : memref<5x120x160xbf16, #tpu.memory_space<vmem>>, vector<1x120x160xbf16>
    %88 = vector.shape_cast %87 : vector<1x120x160xbf16> to vector<120x160xbf16>
    %cst_47 = arith.constant dense<0.000000e+00> : vector<64x160xf32>
    %89 = tpu.matmul %86, %88, %cst_47 {dimension_numbers = #tpu.dot_dimension_numbers<[1], [0], [0], [1], [0, 0, 1, 1], [], []>} : vector<64x120xbf16>, vector<120x160xbf16>, vector<64x160xf32> -> vector<64x160xf32>
    %90 = arith.addf %83, %89 : vector<64x160xf32>
    %c0_48 = arith.constant 0 : index
    %c0_49 = arith.constant 0 : index
    %91 = vector.load %arg7[%c0_48, %c0_49] : memref<1x160xf32, #tpu.memory_space<vmem>>, vector<1x160xf32>
    %92 = vector.broadcast %91 : vector<1x160xf32> to vector<64x160xf32>
    %93 = arith.addf %90, %92 : vector<64x160xf32>
    %94 = vector.shape_cast %93 : vector<64x160xf32> to vector<4x2x8x160xf32>
    %95 = vector.extract_strided_slice %94 {offsets = [0, 0, 0, 0], sizes = [4, 1, 8, 160], strides = [1, 1, 1, 1]} : vector<4x2x8x160xf32> to vector<4x1x8x160xf32>
    %96 = vector.shape_cast %95 : vector<4x1x8x160xf32> to vector<4x8x160xf32>
    %97 = vector.extract_strided_slice %94 {offsets = [0, 1, 0, 0], sizes = [4, 1, 8, 160], strides = [1, 1, 1, 1]} : vector<4x2x8x160xf32> to vector<4x1x8x160xf32>
    %98 = vector.shape_cast %97 : vector<4x1x8x160xf32> to vector<4x8x160xf32>
    %99 = arith.maximumf %96, %98 : vector<4x8x160xf32>
    %100 = vector.shape_cast %99 : vector<4x8x160xf32> to vector<32x160xf32>
    %c0_50 = arith.constant 0 : index
    %c0_51 = arith.constant 0 : index
    %101 = vector.load %arg8[%c0_50, %c0_51] : memref<160x80xf32, #tpu.memory_space<vmem>>, vector<160x80xf32>
    %cst_52 = arith.constant dense<0.000000e+00> : vector<32x80xf32>
    %102 = tpu.matmul %100, %101, %cst_52 {dimension_numbers = #tpu.dot_dimension_numbers<[1], [0], [0], [1], [0, 0, 1, 1], [], []>} : vector<32x160xf32>, vector<160x80xf32>, vector<32x80xf32> -> vector<32x80xf32>
    %c0_53 = arith.constant 0 : index
    %c0_54 = arith.constant 0 : index
    %103 = vector.load %arg9[%c0_53, %c0_54] : memref<160x80xf32, #tpu.memory_space<vmem>>, vector<160x80xf32>
    %cst_55 = arith.constant dense<0.000000e+00> : vector<32x80xf32>
    %104 = tpu.matmul %100, %103, %cst_55 {dimension_numbers = #tpu.dot_dimension_numbers<[1], [0], [0], [1], [0, 0, 1, 1], [], []>} : vector<32x160xf32>, vector<160x80xf32>, vector<32x80xf32> -> vector<32x80xf32>
    %105 = arith.maximumf %102, %104 : vector<32x80xf32>
    %cst_56 = arith.constant 0.000000e+00 : f32
    %106 = vector.broadcast %cst_56 : f32 to vector<32x80xf32>
    %107 = arith.maximumf %105, %106 : vector<32x80xf32>
    %108 = vector.shape_cast %107 : vector<32x80xf32> to vector<4x8x80xf32>
    %cst_57 = arith.constant 0.000000e+00 : f32
    %109 = vector.broadcast %cst_57 : f32 to vector<8x50xf32>
    %110 = vector.extract_strided_slice %108 {offsets = [0, 0, 0], sizes = [1, 8, 80], strides = [1, 1, 1]} : vector<4x8x80xf32> to vector<1x8x80xf32>
    %111 = vector.shape_cast %110 : vector<1x8x80xf32> to vector<8x80xf32>
    %112 = arith.truncf %111 : vector<8x80xf32> to vector<8x80xbf16>
    %c0_58 = arith.constant 0 : index
    %c0_59 = arith.constant 0 : index
    %c0_60 = arith.constant 0 : index
    %113 = vector.load %arg10[%c0_58, %c0_59, %c0_60] : memref<4x80x50xbf16, #tpu.memory_space<vmem>>, vector<1x80x50xbf16>
    %114 = vector.shape_cast %113 : vector<1x80x50xbf16> to vector<80x50xbf16>
    %cst_61 = arith.constant dense<0.000000e+00> : vector<8x50xf32>
    %115 = tpu.matmul %112, %114, %cst_61 {dimension_numbers = #tpu.dot_dimension_numbers<[1], [0], [0], [1], [0, 0, 1, 1], [], []>} : vector<8x80xbf16>, vector<80x50xbf16>, vector<8x50xf32> -> vector<8x50xf32>
    %116 = arith.addf %109, %115 : vector<8x50xf32>
    %117 = vector.extract_strided_slice %108 {offsets = [1, 0, 0], sizes = [1, 8, 80], strides = [1, 1, 1]} : vector<4x8x80xf32> to vector<1x8x80xf32>
    %118 = vector.shape_cast %117 : vector<1x8x80xf32> to vector<8x80xf32>
    %119 = arith.truncf %118 : vector<8x80xf32> to vector<8x80xbf16>
    %c1_62 = arith.constant 1 : index
    %c0_63 = arith.constant 0 : index
    %c0_64 = arith.constant 0 : index
    %120 = vector.load %arg10[%c1_62, %c0_63, %c0_64] : memref<4x80x50xbf16, #tpu.memory_space<vmem>>, vector<1x80x50xbf16>
    %121 = vector.shape_cast %120 : vector<1x80x50xbf16> to vector<80x50xbf16>
    %cst_65 = arith.constant dense<0.000000e+00> : vector<8x50xf32>
    %122 = tpu.matmul %119, %121, %cst_65 {dimension_numbers = #tpu.dot_dimension_numbers<[1], [0], [0], [1], [0, 0, 1, 1], [], []>} : vector<8x80xbf16>, vector<80x50xbf16>, vector<8x50xf32> -> vector<8x50xf32>
    %123 = arith.addf %116, %122 : vector<8x50xf32>
    %124 = vector.extract_strided_slice %108 {offsets = [2, 0, 0], sizes = [1, 8, 80], strides = [1, 1, 1]} : vector<4x8x80xf32> to vector<1x8x80xf32>
    %125 = vector.shape_cast %124 : vector<1x8x80xf32> to vector<8x80xf32>
    %126 = arith.truncf %125 : vector<8x80xf32> to vector<8x80xbf16>
    %c2_66 = arith.constant 2 : index
    %c0_67 = arith.constant 0 : index
    %c0_68 = arith.constant 0 : index
    %127 = vector.load %arg10[%c2_66, %c0_67, %c0_68] : memref<4x80x50xbf16, #tpu.memory_space<vmem>>, vector<1x80x50xbf16>
    %128 = vector.shape_cast %127 : vector<1x80x50xbf16> to vector<80x50xbf16>
    %cst_69 = arith.constant dense<0.000000e+00> : vector<8x50xf32>
    %129 = tpu.matmul %126, %128, %cst_69 {dimension_numbers = #tpu.dot_dimension_numbers<[1], [0], [0], [1], [0, 0, 1, 1], [], []>} : vector<8x80xbf16>, vector<80x50xbf16>, vector<8x50xf32> -> vector<8x50xf32>
    %130 = arith.addf %123, %129 : vector<8x50xf32>
    %131 = vector.extract_strided_slice %108 {offsets = [3, 0, 0], sizes = [1, 8, 80], strides = [1, 1, 1]} : vector<4x8x80xf32> to vector<1x8x80xf32>
    %132 = vector.shape_cast %131 : vector<1x8x80xf32> to vector<8x80xf32>
    %133 = arith.truncf %132 : vector<8x80xf32> to vector<8x80xbf16>
    %c3_70 = arith.constant 3 : index
    %c0_71 = arith.constant 0 : index
    %c0_72 = arith.constant 0 : index
    %134 = vector.load %arg10[%c3_70, %c0_71, %c0_72] : memref<4x80x50xbf16, #tpu.memory_space<vmem>>, vector<1x80x50xbf16>
    %135 = vector.shape_cast %134 : vector<1x80x50xbf16> to vector<80x50xbf16>
    %cst_73 = arith.constant dense<0.000000e+00> : vector<8x50xf32>
    %136 = tpu.matmul %133, %135, %cst_73 {dimension_numbers = #tpu.dot_dimension_numbers<[1], [0], [0], [1], [0, 0, 1, 1], [], []>} : vector<8x80xbf16>, vector<80x50xbf16>, vector<8x50xf32> -> vector<8x50xf32>
    %137 = arith.addf %130, %136 : vector<8x50xf32>
    %c0_74 = arith.constant 0 : index
    %c0_75 = arith.constant 0 : index
    %138 = vector.load %arg11[%c0_74, %c0_75] : memref<1x50xf32, #tpu.memory_space<vmem>>, vector<1x50xf32>
    %139 = vector.broadcast %138 : vector<1x50xf32> to vector<8x50xf32>
    %140 = arith.addf %137, %139 : vector<8x50xf32>
    %cst_76 = arith.constant 0.000000e+00 : f32
    %141 = vector.broadcast %cst_76 : f32 to vector<8x50xf32>
    %142 = arith.maximumf %140, %141 : vector<8x50xf32>
    %143 = arith.truncf %142 : vector<8x50xf32> to vector<8x50xbf16>
    %c0_77 = arith.constant 0 : index
    %c0_78 = arith.constant 0 : index
    %144 = vector.load %arg12[%c0_77, %c0_78] : memref<50x128xbf16, #tpu.memory_space<vmem>>, vector<50x128xbf16>
    %cst_79 = arith.constant dense<0.000000e+00> : vector<8x128xf32>
    %145 = tpu.matmul %143, %144, %cst_79 {dimension_numbers = #tpu.dot_dimension_numbers<[1], [0], [0], [1], [0, 0, 1, 1], [], []>} : vector<8x50xbf16>, vector<50x128xbf16>, vector<8x128xf32> -> vector<8x128xf32>
    %c0_80 = arith.constant 0 : index
    %c0_81 = arith.constant 0 : index
    %146 = vector.load %arg13[%c0_80, %c0_81] : memref<1x128xf32, #tpu.memory_space<vmem>>, vector<1x128xf32>
    %147 = vector.broadcast %146 : vector<1x128xf32> to vector<8x128xf32>
    %148 = arith.addf %145, %147 : vector<8x128xf32>
    %cst_82 = arith.constant dense<0xFF800000> : vector<8xf32>
    %149 = vector.multi_reduction <maximumf>, %148, %cst_82 [1] : vector<8x128xf32> to vector<8xf32>
    %150 = vector.shape_cast %149 : vector<8xf32> to vector<8x1xf32>
    %151 = vector.broadcast %150 : vector<8x1xf32> to vector<8x128xf32>
    %152 = arith.subf %148, %151 : vector<8x128xf32>
    %153 = math.exp %152 : vector<8x128xf32>
    %cst_83 = arith.constant dense<0.000000e+00> : vector<8xf32>
    %154 = vector.multi_reduction <add>, %153, %cst_83 [1] : vector<8x128xf32> to vector<8xf32>
    %155 = vector.shape_cast %154 : vector<8xf32> to vector<8x1xf32>
    %156 = math.log %155 : vector<8x1xf32>
    %157 = vector.broadcast %156 : vector<8x1xf32> to vector<8x128xf32>
    %158 = arith.subf %152, %157 : vector<8x128xf32>
    %c0_84 = arith.constant 0 : index
    %c0_85 = arith.constant 0 : index
    %159 = vector.load %arg14[%c0_84, %c0_85] : memref<8x128xf32, #tpu.memory_space<vmem>>, vector<8x128xf32>
    tpu.vector_store %arg14[%c0_84, %c0_85], %158 {strides = array<i32>} : memref<8x128xf32, #tpu.memory_space<vmem>>, vector<8x128xf32>,
    return
  }
  func.func @transform_0(%arg0: i32) -> (i32, i32, i32) {
    %c0_i32 = arith.constant 0 : i32
    %c0_i32_0 = arith.constant 0 : i32
    %c0_i32_1 = arith.constant 0 : i32
    return %c0_i32, %arg0, %c0_i32_0 : i32, i32, i32
  }
  func.func @transform_1(%arg0: i32) -> (i32, i32, i32) {
    %c0_i32 = arith.constant 0 : i32
    %c0_i32_0 = arith.constant 0 : i32
    %c0_i32_1 = arith.constant 0 : i32
    %c0_i32_2 = arith.constant 0 : i32
    return %c0_i32, %c0_i32_0, %c0_i32_1 : i32, i32, i32
  }
  func.func @transform_2(%arg0: i32) -> (i32, i32) {
    %c0_i32 = arith.constant 0 : i32
    %c0_i32_0 = arith.constant 0 : i32
    %c0_i32_1 = arith.constant 0 : i32
    return %c0_i32, %c0_i32_0 : i32, i32
  }
  func.func @transform_3(%arg0: i32) -> (i32, i32) {
    %c0_i32 = arith.constant 0 : i32
    %c0_i32_0 = arith.constant 0 : i32
    %c0_i32_1 = arith.constant 0 : i32
    return %c0_i32, %c0_i32_0 : i32, i32
  }
  func.func @transform_4(%arg0: i32) -> (i32, i32) {
    %c0_i32 = arith.constant 0 : i32
    %c0_i32_0 = arith.constant 0 : i32
    %c0_i32_1 = arith.constant 0 : i32
    return %c0_i32, %c0_i32_0 : i32, i32
  }
  func.func @transform_5(%arg0: i32) -> (i32, i32, i32) {
    %c0_i32 = arith.constant 0 : i32
    %c0_i32_0 = arith.constant 0 : i32
    %c0_i32_1 = arith.constant 0 : i32
    %c0_i32_2 = arith.constant 0 : i32
    return %c0_i32, %c0_i32_0, %c0_i32_1 : i32, i32, i32
  }
  func.func @transform_6(%arg0: i32) -> (i32, i32) {
    %c0_i32 = arith.constant 0 : i32
    %c0_i32_0 = arith.constant 0 : i32
    %c0_i32_1 = arith.constant 0 : i32
    return %c0_i32, %c0_i32_0 : i32, i32
  }
  func.func @transform_7(%arg0: i32) -> (i32, i32) {
    %c0_i32 = arith.constant 0 : i32
    %c0_i32_0 = arith.constant 0 : i32
    %c0_i32_1 = arith.constant 0 : i32
    return %c0_i32, %c0_i32_0 : i32, i32
  }
  func.func @transform_8(%arg0: i32) -> (i32, i32) {
    %c0_i32 = arith.constant 0 : i32
    %c0_i32_0 = arith.constant 0 : i32
    %c0_i32_1 = arith.constant 0 : i32
    return %c0_i32, %c0_i32_0 : i32, i32
  }
  func.func @transform_9(%arg0: i32) -> (i32, i32, i32) {
    %c0_i32 = arith.constant 0 : i32
    %c0_i32_0 = arith.constant 0 : i32
    %c0_i32_1 = arith.constant 0 : i32
    %c0_i32_2 = arith.constant 0 : i32
    return %c0_i32, %c0_i32_0, %c0_i32_1 : i32, i32, i32
  }
  func.func @transform_10(%arg0: i32) -> (i32, i32) {
    %c0_i32 = arith.constant 0 : i32
    %c0_i32_0 = arith.constant 0 : i32
    %c0_i32_1 = arith.constant 0 : i32
    return %c0_i32, %c0_i32_0 : i32, i32
  }
  func.func @transform_11(%arg0: i32) -> (i32, i32) {
    %c0_i32 = arith.constant 0 : i32
    %c0_i32_0 = arith.constant 0 : i32
    %c0_i32_1 = arith.constant 0 : i32
    return %c0_i32, %c0_i32_0 : i32, i32
  }
  func.func @transform_12(%arg0: i32) -> (i32, i32) {
    %c0_i32 = arith.constant 0 : i32
    %c0_i32_0 = arith.constant 0 : i32
    %c0_i32_1 = arith.constant 0 : i32
    return %c0_i32, %c0_i32_0 : i32, i32
  }
  func.func @transform_13(%arg0: i32) -> (i32, i32) {
    %c0_i32 = arith.constant 0 : i32
    %c0_i32_0 = arith.constant 0 : i32
    return %arg0, %c0_i32 : i32, i32
  }
}

</mosaic_0001>

<bundles_post_ra>
// kernel: cnn_mnist_forward.1
= control target key start
LH: loop header
LB: loop body
LE: loop exit
PB: predicated region body
PF: predicated region fallthrough
CT: control target
= control target key end

     0   :  { %vm161_vm0 = vcmask 1045504   ;;  %v6069_v1 = vmov 0   ;;  %vm124_vm1 = vcmask 228352   ;;  %vm1350_vm2 = vcmask 916480   ;;  %s6055_s1 = inlined_call_operand.vmem [shape: bf16[5,28,240], index: 1, kind: input, shape index: {}]   ;;  %s6056_s0 = inlined_call_operand.vmem [shape: f32[28,8,28], index: 0, kind: input, shape index: {}]   ;;  %s6057_s3 = inlined_call_operand.vmem [shape: f32[240,120], index: 3, kind: input, shape index: {}]   ;;  %s6058_s2 = inlined_call_operand.vmem [shape: f32[1,240], index: 2, kind: input, shape index: {}]   ;;  %s6059_s4 = inlined_call_operand.vmem [shape: f32[240,120], index: 4, kind: input, shape index: {}]   ;;  %s6060_s5 = inlined_call_operand.vmem [shape: bf16[5,120,160], index: 5, kind: input, shape index: {}]   ;;  %s6061_s7 = inlined_call_operand.vmem [shape: f32[160,80], index: 7, kind: input, shape index: {}]   ;;  %s6062_s8 = inlined_call_operand.vmem [shape: f32[160,80], index: 8, kind: input, shape index: {}]   ;;  %s6063_s9 = inlined_call_operand.vmem [shape: bf16[4,80,50], index: 9, kind: input, shape index: {}]   ;;  %s6064_s6 = inlined_call_operand.vmem [shape: f32[1,160], index: 6, kind: input, shape index: {}]   ;;  %s6065_s11 = inlined_call_operand.vmem [shape: bf16[50,128], index: 11, kind: input, shape index: {}]   ;;  %s6066_s10 = inlined_call_operand.vmem [shape: f32[1,50], index: 10, kind: input, shape index: {}]   ;;  %s6067_s12 = inlined_call_operand.vmem [shape: f32[1,128], index: 12, kind: input, shape index: {}]   ;;  %s6068_s13 = inlined_call_operand.vmem [shape: f32[8,128], index: 13, kind: output, shape index: {}]  }
   0x1   :  { %v3810_v0 = vld [vmem:[%s6055_s1 + $0x34] ss:$8 sps:$4 sm:$0x3f]   ;;  %200 = vmatprep.mubr.bf16.mxu0 %v6069_v1  ;;  %413 = vmatprep.mubr.bf16.mxu1 %v6069_v1  ;;  %v3814_v3 = vld [vmem:[%s6055_s1 + $0x30] ss:$8 sps:$4 sm:$0x3f]  }
   0x2   :  { %v3812_v2 = vld [vmem:[%s6055_s1 + $0x14] ss:$8 sps:$4 sm:$0x3f]   ;;  %3359 = vmatprep.subr.msk.bf16.mxu0 %vm161_vm0, %v3810_v0  ;;  %v3815_v4 = vld [vmem:[%s6055_s1 + $0x10] ss:$8 sps:$4 sm:$0x3f]  }
   0x3   :  { %3376 = vmatprep.subr.msk.bf16.mxu1 %vm161_vm0, %v3812_v2  ;;  %v3816_v5 = vld [vmem:[%s6055_s1 + $0x24] ss:$8 sps:$4 sm:$0xff]   ;;  %v163_v6 = vsel %vm161_vm0, %v3814_v3, 0  ;;  %v376_v7 = vsel %vm161_vm0, %v3815_v4, 0  ;;  %v3820_v9 = vld [vmem:[%s6055_s1 + $0x20] ss:$8 sps:$4 sm:$0xff]  }
   0x4   :  { %v3818_v8 = vld [vmem:[%s6055_s1 + $0x4] ss:$8 sps:$4 sm:$0xff]   ;;  %181 = vmatpush1.bf16.msra.mxu0 %v163_v6  ;;  %394 = vmatpush1.bf16.msra.mxu1 %v376_v7  ;;  %v3821_v10 = vld [vmem:[%s6055_s1] ss:$8 sps:$4 sm:$0xff]   ;;  %v47_v12 = vld [vmem:[%s6056_s0 + $0x10] sm:$0xff]  ;;  %vm1818_vm3 = vcmask 1043456  }
   0x5   :  { %v46_v11 = vld [vmem:[%s6056_s0 + $0x8] sm:$0xff]  ;;  %182 = vmatprep.subr.bf16.mxu0 %v3816_v5  ;;  %395 = vmatprep.subr.bf16.mxu1 %v3818_v8  ;;  %v45_v13 = vld [vmem:[%s6056_s0] sm:$0xff]  ;;  %v3822_v14 = vld [vmem:[%s6055_s1 + $0x54] ss:$8 sps:$4 sm:$0x3f]   ;;  %vm1805_vm4 = vcmask 982016  }
   0x6   :  { %v89_v15 = vpack.c.bf16 %v47_v12, %v46_v11  ;;  %v73_v16 = vpack.c.bf16 %v46_v11, %v45_v13  ;;  %v3824_v17 = vld [vmem:[%s6055_s1 + $0x50] ss:$8 sps:$4 sm:$0x3f]   ;;  %v49_v20 = vld [vmem:[%s6056_s0 + $0x20] sm:$0xff]  ;;  %v50_v30 = vld [vmem:[%s6056_s0 + $0x28] sm:$0xff]  ;;  %vm2690_vm5 = vcmask 261120  }
   0x7   :  { %v562_v18 = vsel %vm161_vm0, %v3824_v17, 0  ;;  %v48_v19 = vld [vmem:[%s6056_s0 + $0x18] sm:$0xff]  ;;  %v3825_v21 = vld [vmem:[%s6055_s1 + $0x40] ss:$8 sps:$4 sm:$0xff]   ;;  %v3827_v22 = vld [vmem:[%s6055_s1 + $0x44] ss:$8 sps:$4 sm:$0xff]   ;;  %v4161_v36 = vpack.c.bf16 %v50_v30, %v49_v20 }
   0x8   :  { %183 = vmatpush1.bf16.msra.mxu0 %v3820_v9  ;;  %396 = vmatpush1.bf16.msra.mxu1 %v3821_v10  ;;  %v4119_v23 = vpack.c.bf16 %v49_v20, %v48_v19  ;;  %v4121_v24 = vpack.c.bf16 %v48_v19, %v47_v12  ;;  %v3828_v25 = vld [vmem:[%s6055_s1 + $0x74] ss:$8 sps:$4 sm:$0x3f]   ;;  %v3830_v26 = vld [vmem:[%s6055_s1 + $0x70] ss:$8 sps:$4 sm:$0x3f]  }
   0x9   :  { %3397 = vmatprep.subr.msk.bf16.mxu0 %vm161_vm0, %v3822_v14  ;;  %3418 = vmatprep.subr.msk.bf16.mxu1 %vm161_vm0, %v3828_v25  ;;  %v3833_v27 = vld [vmem:[%s6055_s1 + $0x64] ss:$8 sps:$4 sm:$0xff]   ;;  %v796_v28 = vsel %vm161_vm0, %v3830_v26, 0  ;;  %v3834_v29 = vld [vmem:[%s6055_s1 + $0x94] ss:$8 sps:$4 sm:$0x3f]  }
   0xa   :  { %v51_v31 = vld [vmem:[%s6056_s0 + $0x30] sm:$0xff]  ;;  %v3831_v33 = vld [vmem:[%s6055_s1 + $0x60] ss:$8 sps:$4 sm:$0xff]   ;;  %v52_v37 = vld [vmem:[%s6056_s0 + $0x38] sm:$0xff]  ;;  %vm3985_vm6 = vmmov 0   ;;  %vm2954_vm7 = vcmask 654336  }
   0xb   :  { %3360 = vmatmul.mubr.msk.bf16.vlgmr.msra.gmra.mxu0 %vm124_vm1, %v89_v15  ;;  %3377 = vmatmul.mubr.msk.bf16.vlgmr.msra.gmra.mxu1 %vm124_vm1, %v73_v16  ;;  %v3836_v32 = vld [vmem:[%s6055_s1 + $0x90] ss:$8 sps:$4 sm:$0x3f]   ;;  %v4159_v35 = vpack.c.bf16 %v51_v31, %v50_v30  ;;  %v53_v38 = vld [vmem:[%s6056_s0 + $0x40] sm:$0xff]  ;;  %v4177_v40 = vpack.c.bf16 %v52_v37, %v51_v31  ;;  %v54_v41 = vld [vmem:[%s6056_s0 + $0x48] sm:$0xff]  ;;  %vm3292_vm8 = vcmask 1040384  }
   0xc   :  { %580 = vmatpush1.bf16.msra.mxu0 %v562_v18  ;;  %210 = vmatprep.mubr.bf16.mxu0 %v6069_v1  ;;  %v4157_v34 = vsel %vm161_vm0, %v3836_v32, 0  ;;  %v4175_v39 = vpack.c.bf16 %v53_v38, %v52_v37  ;;  %v55_v42 = vld [vmem:[%s6056_s0 + $0x50] sm:$0xff]  ;;  %v4193_v44 = vpack.c.bf16 %v54_v41, %v53_v38  ;;  %v56_v45 = vld [vmem:[%s6056_s0 + $0x58] sm:$0xff]  ;;  %v57_v46 = vld [vmem:[%s6056_s0 + $0x60] sm:$0xff]  ;;  %vm3288_vm9 = vcmask 408576  }
   0xd   :  { %423 = vmatprep.mubr.bf16.mxu1 %v6069_v1  ;;  %581 = vmatprep.subr.bf16.mxu0 %v3827_v22  ;;  %v4191_v43 = vpack.c.bf16 %v55_v42, %v54_v41  ;;  %v4207_v47 = vpack.c.bf16 %v57_v46, %v56_v45  ;;  %v4209_v48 = vpack.c.bf16 %v56_v45, %v55_v42  ;;  %v58_v49 = vld [vmem:[%s6056_s0 + $0x68] sm:$0xff]  ;;  %v59_v50 = vld [vmem:[%s6056_s0 + $0x70] sm:$0xff]  ;;  %v60_v53 = vld [vmem:[%s6056_s0 + $0x78] sm:$0xff] }
   0xe   :  { %814 = vmatpush1.bf16.msra.mxu1 %v796_v28  ;;  %v4223_v51 = vpack.c.bf16 %v59_v50, %v58_v49  ;;  %v4225_v52 = vpack.c.bf16 %v58_v49, %v57_v46  ;;  %v61_v54 = vld [vmem:[%s6056_s0 + $0x80] sm:$0xff]  ;;  %v4245_v56 = vld [vmem:[%s6056_s0 + $0xc8] sm:$0xff]  ;;  %v4252_v59 = vpack.c.bf16 %v60_v53, %v59_v50  ;;  %v4261_v60 = vld [vmem:[%s6056_s0 + $0xd0] sm:$0xff] }
   0xf   :  { %815 = vmatprep.subr.bf16.mxu1 %v3833_v27  ;;  %v69_v55 = vld [vmem:[%s6056_s0 + $0xc0] sm:$0xff]  ;;  %v4250_v58 = vpack.c.bf16 %v61_v54, %v60_v53  ;;  %v4266_v61 = vld [vmem:[%s6056_s0 + $0xd8] sm:$0xff]  ;;  %v62_v62 = vld [vmem:[%s6056_s0 + $0x88] sm:$0xff]  ;;  %v768_v17 = vpack.c.bf16 %v4261_v60, %v4245_v56 }
  0x10   :  { %582 = vmatpush1.bf16.msra.mxu0 %v3825_v21  ;;  %v4248_v57 = vpack.c.bf16 %v4245_v56, %v69_v55  ;;  %v63_v63 = vld [vmem:[%s6056_s0 + $0x90] sm:$0xff]  ;;  %v4280_v3 = vpack.c.bf16 %v62_v62, %v61_v54  ;;  %v64_v4 = vld [vmem:[%s6056_s0 + $0x98] sm:$0xff]  ;;  %v65_v5 = vld [vmem:[%s6056_s0 + $0xa0] sm:$0xff] }
  0x11   :  { %3439 = vmatprep.subr.msk.bf16.mxu0 %vm161_vm0, %v3834_v29  ;;  %v4278_v2 = vpack.c.bf16 %v63_v63, %v62_v62  ;;  %v98_v6 = vpack.c.bf16 %v65_v5, %v64_v4  ;;  %v4294_v7 = vpack.c.bf16 %v64_v4, %v63_v63  ;;  %v66_v8 = vld [vmem:[%s6056_s0 + $0xa8] sm:$0xff]  ;;  %v67_v9 = vld [vmem:[%s6056_s0 + $0xb0] sm:$0xff]  ;;  %v68_v12 = vld [vmem:[%s6056_s0 + $0xb8] sm:$0xff] }
  0x12   :  { %816 = vmatpush1.bf16.msra.mxu1 %v3831_v33  ;;  %v99_v10 = vpack.c.bf16 %v67_v9, %v66_v8  ;;  %v4307_v11 = vpack.c.bf16 %v66_v8, %v65_v5  ;;  %v100_v13 = vpack.c.bf16 %v69_v55, %v68_v12  ;;  %v4317_v14 = vpack.c.bf16 %v68_v12, %v67_v9  ;;  %v3839_v15 = vld [vmem:[%s6055_s1 + $0x84] ss:$8 sps:$4 sm:$0xff]   ;;  %v3837_v16 = vld [vmem:[%s6055_s1 + $0x80] ss:$8 sps:$4 sm:$0xff]   ;;  %v1335_v45 = vld [vmem:[%s6057_s3 + $0x78] sm:$0xff] }
  0x13   :  { %3361 = vmatmul.mubr.msk.bf16.gmra.mxu0 %vm124_vm1, %v4119_v23  ;;  %3378 = vmatmul.mubr.msk.bf16.gmra.mxu1 %vm124_vm1, %v4121_v24  ;;  %v1333_v53 = vld [vmem:[%s6057_s3 + $0x68] sm:$0xff]  ;;  %v1332_v56 = vld [vmem:[%s6057_s3 + $0x60] sm:$0xff]  ;;  %v1330_v5 = vld [vmem:[%s6057_s3 + $0x50] sm:$0xff] }
  0x14   :  { %220 = vmatprep.mubr.bf16.mxu0 %v6069_v1  ;;  %433 = vmatprep.mubr.bf16.mxu1 %v6069_v1 }
  0x1b   :  { %3362 = vmatmul.mubr.msk.bf16.gmra.mxu0 %vm124_vm1, %v4159_v35  ;;  %3379 = vmatmul.mubr.msk.bf16.gmra.mxu1 %vm124_vm1, %v4161_v36 }
  0x1c   :  { %230 = vmatprep.mubr.bf16.mxu0 %v6069_v1  ;;  %443 = vmatprep.mubr.bf16.mxu1 %v6069_v1 }
  0x23   :  { %3363 = vmatmul.mubr.msk.bf16.gmra.mxu0 %vm124_vm1, %v4175_v39  ;;  %3380 = vmatmul.mubr.msk.bf16.gmra.mxu1 %vm124_vm1, %v4177_v40 }
  0x24   :  { %240 = vmatprep.mubr.bf16.mxu0 %v6069_v1  ;;  %453 = vmatprep.mubr.bf16.mxu1 %v6069_v1 }
  0x2b   :  { %3364 = vmatmul.mubr.msk.bf16.gmra.mxu0 %vm124_vm1, %v4191_v43  ;;  %3381 = vmatmul.mubr.msk.bf16.gmra.mxu1 %vm124_vm1, %v4193_v44 }
  0x2c   :  { %250 = vmatprep.mubr.bf16.mxu0 %v6069_v1  ;;  %463 = vmatprep.mubr.bf16.mxu1 %v6069_v1 }
  0x33   :  { %3365 = vmatmul.mubr.msk.bf16.gmra.mxu0 %vm124_vm1, %v4207_v47  ;;  %3382 = vmatmul.mubr.msk.bf16.gmra.mxu1 %vm124_vm1, %v4209_v48 }
  0x34   :  { %260 = vmatprep.mubr.bf16.mxu0 %v6069_v1  ;;  %473 = vmatprep.mubr.bf16.mxu1 %v6069_v1 }
  0x3b   :  { %3366 = vmatmul.mubr.msk.bf16.gmra.mxu0 %vm124_vm1, %v4223_v51  ;;  %3383 = vmatmul.mubr.msk.bf16.gmra.mxu1 %vm124_vm1, %v4225_v52 }
  0x3c   :  { %270 = vmatprep.mubr.bf16.mxu0 %v6069_v1  ;;  %483 = vmatprep.mubr.bf16.mxu1 %v6069_v1 }
  0x43   :  { %3367 = vmatmul.mubr.msk.bf16.gmra.mxu0 %vm124_vm1, %v4250_v58  ;;  %3384 = vmatmul.mubr.msk.bf16.gmra.mxu1 %vm124_vm1, %v4252_v59 }
  0x44   :  { %280 = vmatprep.mubr.bf16.mxu0 %v6069_v1  ;;  %493 = vmatprep.mubr.bf16.mxu1 %v6069_v1 }
  0x4b   :  { %3368 = vmatmul.mubr.msk.bf16.gmra.mxu0 %vm124_vm1, %v4278_v2  ;;  %3385 = vmatmul.mubr.msk.bf16.gmra.mxu1 %vm124_vm1, %v4280_v3 }
  0x4c   :  { %290 = vmatprep.mubr.bf16.mxu0 %v6069_v1  ;;  %503 = vmatprep.mubr.bf16.mxu1 %v6069_v1 }
  0x53   :  { %3369 = vmatmul.mubr.msk.bf16.gmra.mxu0 %vm124_vm1, %v98_v6  ;;  %3386 = vmatmul.mubr.msk.bf16.gmra.mxu1 %vm124_vm1, %v4294_v7 }
  0x54   :  { %300 = vmatprep.mubr.bf16.mxu0 %v6069_v1  ;;  %513 = vmatprep.mubr.bf16.mxu1 %v6069_v1 }
  0x5b   :  { %3370 = vmatmul.mubr.msk.bf16.gmra.mxu0 %vm124_vm1, %v99_v10  ;;  %3387 = vmatmul.mubr.msk.bf16.gmra.mxu1 %vm124_vm1, %v4307_v11 }
  0x5c   :  { %310 = vmatprep.mubr.bf16.mxu0 %v6069_v1  ;;  %523 = vmatprep.mubr.bf16.mxu1 %v6069_v1 }
  0x63   :  { %3371 = vmatmul.mubr.msk.bf16.gmra.mxu0 %vm124_vm1, %v100_v13  ;;  %3388 = vmatmul.mubr.msk.bf16.gmra.mxu1 %vm124_vm1, %v4317_v14 }
  0x64   :  { %599 = vmatprep.mubr.bf16.mxu0 %v6069_v1  ;;  %833 = vmatprep.mubr.bf16.mxu1 %v6069_v1 }
  0x6b   :  { %3398 = vmatmul.mubr.msk.bf16.vlgmr.msra.gmra.mxu0 %vm124_vm1, %v4121_v24  ;;  %3419 = vmatmul.mubr.msk.bf16.vlgmr.msra.gmra.mxu1 %vm124_vm1, %v4119_v23 }
  0x6c   :  { %1048 = vmatpush1.bf16.msra.mxu0 %v4157_v34  ;;  %609 = vmatprep.mubr.bf16.mxu0 %v6069_v1 }
  0x6d   :  { %843 = vmatprep.mubr.bf16.mxu1 %v6069_v1  ;;  %1049 = vmatprep.subr.bf16.mxu0 %v3839_v15  ;;  %v1328_v15 = vld [vmem:[%s6057_s3 + $0x40] sm:$0xff] }
  0x70   :  { %1050 = vmatpush1.bf16.msra.mxu0 %v3837_v16 }
  0x73   :  { %3399 = vmatmul.mubr.msk.bf16.gmra.mxu0 %vm124_vm1, %v4161_v36  ;;  %3420 = vmatmul.mubr.msk.bf16.gmra.mxu1 %vm124_vm1, %v4159_v35 }
  0x74   :  { %619 = vmatprep.mubr.bf16.mxu0 %v6069_v1  ;;  %853 = vmatprep.mubr.bf16.mxu1 %v6069_v1 }
  0x7b   :  { %3400 = vmatmul.mubr.msk.bf16.gmra.mxu0 %vm124_vm1, %v4177_v40  ;;  %3421 = vmatmul.mubr.msk.bf16.gmra.mxu1 %vm124_vm1, %v4175_v39 }
  0x7c   :  { %629 = vmatprep.mubr.bf16.mxu0 %v6069_v1  ;;  %863 = vmatprep.mubr.bf16.mxu1 %v6069_v1 }
  0x83   :  { %3401 = vmatmul.mubr.msk.bf16.gmra.mxu0 %vm124_vm1, %v4193_v44  ;;  %3422 = vmatmul.mubr.msk.bf16.gmra.mxu1 %vm124_vm1, %v4191_v43 }
  0x84   :  { %639 = vmatprep.mubr.bf16.mxu0 %v6069_v1  ;;  %873 = vmatprep.mubr.bf16.mxu1 %v6069_v1 }
  0x8b   :  { %3402 = vmatmul.mubr.msk.bf16.gmra.mxu0 %vm124_vm1, %v4209_v48  ;;  %3423 = vmatmul.mubr.msk.bf16.gmra.mxu1 %vm124_vm1, %v4207_v47 }
  0x8c   :  { %649 = vmatprep.mubr.bf16.mxu0 %v6069_v1  ;;  %883 = vmatprep.mubr.bf16.mxu1 %v6069_v1 }
  0x93   :  { %3403 = vmatmul.mubr.msk.bf16.gmra.mxu0 %vm124_vm1, %v4225_v52  ;;  %3424 = vmatmul.mubr.msk.bf16.gmra.mxu1 %vm124_vm1, %v4223_v51 }
  0x94   :  { %659 = vmatprep.mubr.bf16.mxu0 %v6069_v1  ;;  %893 = vmatprep.mubr.bf16.mxu1 %v6069_v1 }
  0x9b   :  { %3404 = vmatmul.mubr.msk.bf16.gmra.mxu0 %vm124_vm1, %v4252_v59  ;;  %3425 = vmatmul.mubr.msk.bf16.gmra.mxu1 %vm124_vm1, %v4250_v58 }
  0x9c   :  { %669 = vmatprep.mubr.bf16.mxu0 %v6069_v1  ;;  %903 = vmatprep.mubr.bf16.mxu1 %v6069_v1 }
  0xa3   :  { %3405 = vmatmul.mubr.msk.bf16.gmra.mxu0 %vm124_vm1, %v4280_v3  ;;  %3426 = vmatmul.mubr.msk.bf16.gmra.mxu1 %vm124_vm1, %v4278_v2 }
  0xa4   :  { %679 = vmatprep.mubr.bf16.mxu0 %v6069_v1  ;;  %913 = vmatprep.mubr.bf16.mxu1 %v6069_v1 }
  0xab   :  { %3406 = vmatmul.mubr.msk.bf16.gmra.mxu0 %vm124_vm1, %v4294_v7  ;;  %3427 = vmatmul.mubr.msk.bf16.gmra.mxu1 %vm124_vm1, %v98_v6 }
  0xac   :  { %689 = vmatprep.mubr.bf16.mxu0 %v6069_v1  ;;  %923 = vmatprep.mubr.bf16.mxu1 %v6069_v1 }
  0xb3   :  { %3407 = vmatmul.mubr.msk.bf16.gmra.mxu0 %vm124_vm1, %v4307_v11  ;;  %3428 = vmatmul.mubr.msk.bf16.gmra.mxu1 %vm124_vm1, %v99_v10  ;;  %v1329_v10 = vld [vmem:[%s6057_s3 + $0x48] sm:$0xff] }
  0xb4   :  { %699 = vmatprep.mubr.bf16.mxu0 %v6069_v1  ;;  %933 = vmatprep.mubr.bf16.mxu1 %v6069_v1 }
  0xbb   :  { %3408 = vmatmul.mubr.msk.bf16.gmra.mxu0 %vm124_vm1, %v4317_v14  ;;  %3429 = vmatmul.mubr.msk.bf16.gmra.mxu1 %vm124_vm1, %v100_v13 }
  0xbc   :  { %709 = vmatprep.mubr.bf16.mxu0 %v6069_v1  ;;  %943 = vmatprep.mubr.bf16.mxu1 %v6069_v1 }
  0xc3   :  { %3409 = vmatmul.mubr.msk.bf16.gmra.mxu0 %vm124_vm1, %v4248_v57  ;;  %3430 = vmatmul.mubr.msk.bf16.gmra.mxu1 %vm124_vm1, %v768_v17 }
  0xc4   :  { %1067 = vmatprep.mubr.bf16.mxu0 %v6069_v1 }
  0xcb   :  { %v202_v18 = vpop.f32.mrf.mxu0  ;;  %v415_v19 = vpop.f32.mrf.mxu1  ;;  %3440 = vmatmul.mubr.msk.bf16.vlgmr.msra.gmra.mxu0 %vm124_vm1, %v4161_v36 }
  0xcc   :  { %v4402_v20 = vadd.f32 %v415_v19, %v202_v18  ;;  %1077 = vmatprep.mubr.bf16.mxu0 %v6069_v1 }
  0xcd   :  { %v4405_v21 = vpop.f32.mrf.mxu0  ;;  %v4407_v22 = vpop.f32.mrf.mxu1 }
  0xcf   :  { %v206_v23 = vpop.f32.mrf.mxu0  ;;  %v419_v24 = vpop.f32.mrf.mxu1 }
  0xd0   :  { %v4409_v25 = vadd.f32 %v419_v24, %v206_v23  ;;  %v1326_v24 = vld [vmem:[%s6057_s3 + $0x30] sm:$0xff] }
  0xd1   :  { %v4411_v26 = vpop.f32.mrf.mxu0  ;;  %v4413_v27 = vpop.f32.mrf.mxu1 }
  0xd3   :  { %v212_v28 = vpop.f32.mrf.mxu0  ;;  %v425_v29 = vpop.f32.mrf.mxu1  ;;  %3441 = vmatmul.mubr.msk.bf16.gmra.mxu0 %vm124_vm1, %v4177_v40  ;;  %v6071_v40 = vmov 0.0  }
  0xd4   :  { %v4417_v30 = vadd.f32 %v425_v29, %v212_v28  ;;  %1087 = vmatprep.mubr.bf16.mxu0 %v6069_v1  ;;  %1387 = vmatprep.subr.mxu1 %v6071_v40 }
  0xd5   :  { %v4420_v31 = vpop.f32.mrf.mxu0  ;;  %v4422_v32 = vpop.f32.mrf.mxu1  ;;  %1388 = vmatpush1.msra.mxu1 %v1335_v45  ;;  %v1324_v45 = vld [vmem:[%s6057_s3 + $0x20] sm:$0xff] }
  0xd6   :  { %1389 = vmatprep.subr.mxu1 %v6071_v40 }
  0xd7   :  { %v216_v33 = vpop.f32.mrf.mxu0  ;;  %v429_v34 = vpop.f32.mrf.mxu1 }
  0xd8   :  { %v4424_v35 = vadd.f32 %v429_v34, %v216_v33  ;;  %v1325_v34 = vld [vmem:[%s6057_s3 + $0x28] sm:$0xff] }
  0xd9   :  { %v4426_v36 = vpop.f32.mrf.mxu0  ;;  %v4428_v37 = vpop.f32.mrf.mxu1 }
  0xdb   :  { %v222_v38 = vpop.f32.mrf.mxu0  ;;  %v435_v39 = vpop.f32.mrf.mxu1  ;;  %3442 = vmatmul.mubr.msk.bf16.gmra.mxu0 %vm124_vm1, %v4193_v44  ;;  %v1334_v44 = vld [vmem:[%s6057_s3 + $0x70] sm:$0xff] }
  0xdc   :  { %v4433_v41 = vadd.f32 %v435_v39, %v222_v38  ;;  %1097 = vmatprep.mubr.bf16.mxu0 %v6069_v1  ;;  %1390 = vmatpush1.msra.mxu1 %v1334_v44 }
  0xdd   :  { %v4436_v42 = vpop.f32.mrf.mxu0  ;;  %v4438_v43 = vpop.f32.mrf.mxu1  ;;  %1391 = vmatprep.subr.mxu1 %v6071_v40 }
  0xde   :  { %1392 = vmatpush1.msra.mxu1 %v1333_v53 }
  0xdf   :  { %v226_v46 = vpop.f32.mrf.mxu0  ;;  %v439_v47 = vpop.f32.mrf.mxu1  ;;  %1393 = vmatprep.subr.mxu1 %v6071_v40 }
  0xe0   :  { %v4447_v49 = vadd.f32 %v439_v47, %v226_v46  ;;  %1394 = vmatpush1.msra.mxu1 %v1332_v56 }
  0xe1   :  { %v4449_v50 = vpop.f32.mrf.mxu0  ;;  %v4451_v51 = vpop.f32.mrf.mxu1  ;;  %1395 = vmatprep.subr.mxu1 %v6071_v40 }
  0xe3   :  { %v232_v54 = vpop.f32.mrf.mxu0  ;;  %v445_v55 = vpop.f32.mrf.mxu1  ;;  %3443 = vmatmul.mubr.msk.bf16.gmra.mxu0 %vm124_vm1, %v4209_v48  ;;  %v1331_v48 = vld [vmem:[%s6057_s3 + $0x58] sm:$0xff] }
  0xe4   :  { %v4463_v58 = vadd.f32 %v445_v55, %v232_v54  ;;  %1107 = vmatprep.mubr.bf16.mxu0 %v6069_v1  ;;  %1396 = vmatpush1.msra.mxu1 %v1331_v48  ;;  %v1322_v55 = vld [vmem:[%s6057_s3 + $0x10] sm:$0xff] }
  0xe5   :  { %v4466_v62 = vpop.f32.mrf.mxu0  ;;  %v4468_v63 = vpop.f32.mrf.mxu1  ;;  %1397 = vmatprep.subr.mxu1 %v6071_v40 }
  0xe6   :  { %1398 = vmatpush1.msra.mxu1 %v1330_v5 }
  0xe7   :  { %v236_v2 = vpop.f32.mrf.mxu0  ;;  %v449_v4 = vpop.f32.mrf.mxu1  ;;  %1399 = vmatprep.subr.mxu1 %v6071_v40 }
  0xe8   :  { %v4478_v6 = vadd.f32 %v449_v4, %v236_v2  ;;  %1400 = vmatpush1.msra.mxu1 %v1329_v10  ;;  %v1321_v4 = vld [vmem:[%s6057_s3 + $0x8] sm:$0xff] }
  0xe9   :  { %v4480_v8 = vpop.f32.mrf.mxu0  ;;  %v4482_v9 = vpop.f32.mrf.mxu1  ;;  %1401 = vmatprep.subr.mxu1 %v6071_v40 }
  0xea   :  { %6075 = vst [vmem:[#allocation2_spill] sm:$0xff] %v4480_v8  ;;  %6076 = vst [vmem:[#allocation3_spill] sm:$0xff] %v4482_v9  ;;  %1402 = vmatpush1.msra.mxu1 %v1328_v15 }
  0xeb   :  { %v242_v12 = vpop.f32.mrf.mxu0  ;;  %v455_v13 = vpop.f32.mrf.mxu1  ;;  %3444 = vmatmul.mubr.msk.bf16.gmra.mxu0 %vm124_vm1, %v4225_v52  ;;  %1403 = vmatprep.subr.mxu1 %v6071_v40  ;;  %v1327_v52 = vld [vmem:[%s6057_s3 + $0x38] sm:$0xff] }
  0xec   :  { %v4494_v16 = vadd.f32 %v455_v13, %v242_v12  ;;  %1117 = vmatprep.mubr.bf16.mxu0 %v6069_v1  ;;  %1404 = vmatpush1.msra.mxu1 %v1327_v52  ;;  %v1320_v12 = vld [vmem:[%s6057_s3] sm:$0xff] }
  0xed   :  { %v4497_v17 = vpop.f32.mrf.mxu0  ;;  %v4499_v18 = vpop.f32.mrf.mxu1  ;;  %1405 = vmatprep.subr.mxu1 %v6071_v40 }
  0xee   :  { %1406 = vmatpush1.msra.mxu1 %v1326_v24  ;;  %v1348_v24 = vld [vmem:[%s6057_s3 + $0xe0] sm:$0xff] }
  0xef   :  { %v246_v19 = vpop.f32.mrf.mxu0  ;;  %v459_v23 = vpop.f32.mrf.mxu1  ;;  %1407 = vmatprep.subr.mxu1 %v6071_v40 }
  0xf0   :  { %v4509_v28 = vadd.f32 %v459_v23, %v246_v19  ;;  %1408 = vmatpush1.msra.mxu1 %v1325_v34 }
  0xf1   :  { %v4511_v29 = vpop.f32.mrf.mxu0  ;;  %v4513_v33 = vpop.f32.mrf.mxu1  ;;  %1409 = vmatprep.subr.mxu1 %v6071_v40 }
  0xf2   :  { %6077 = vst [vmem:[#allocation4_spill] sm:$0xff] %v4511_v29  ;;  %6078 = vst [vmem:[#allocation5_spill] sm:$0xff] %v4513_v33  ;;  %1410 = vmatpush1.msra.mxu1 %v1324_v45  ;;  %v1347_v45 = vld [vmem:[%s6057_s3 + $0xd8] sm:$0xff] }
  0xf3   :  { %v252_v38 = vpop.f32.mrf.mxu0  ;;  %v465_v39 = vpop.f32.mrf.mxu1  ;;  %3445 = vmatmul.mubr.msk.bf16.gmra.mxu0 %vm124_vm1, %v4252_v59  ;;  %1411 = vmatprep.subr.mxu1 %v6071_v40  ;;  %v1323_v59 = vld [vmem:[%s6057_s3 + $0x18] sm:$0xff] }
  0xf4   :  { %v4525_v46 = vadd.f32 %v465_v39, %v252_v38  ;;  %1127 = vmatprep.mubr.bf16.mxu0 %v6069_v1  ;;  %1412 = vmatpush1.msra.mxu1 %v1323_v59 }
  0xf5   :  { %v4528_v47 = vpop.f32.mrf.mxu0  ;;  %v4530_v44 = vpop.f32.mrf.mxu1  ;;  %1413 = vmatprep.subr.mxu1 %v6071_v40 }
  0xf6   :  { %1414 = vmatpush1.msra.mxu1 %v1322_v55 }
  0xf7   :  { %v256_v53 = vpop.f32.mrf.mxu0  ;;  %v469_v54 = vpop.f32.mrf.mxu1  ;;  %1415 = vmatprep.subr.mxu1 %v6071_v40 }
  0xf8   :  { %v4540_v56 = vadd.f32 %v469_v54, %v256_v53  ;;  %1416 = vmatpush1.msra.mxu1 %v1321_v4  ;;  %v1346_v54 = vld [vmem:[%s6057_s3 + $0xd0] sm:$0xff] }
  0xf9   :  { %v4542_v48 = vpop.f32.mrf.mxu0  ;;  %v4544_v2 = vpop.f32.mrf.mxu1  ;;  %1417 = vmatprep.subr.mxu1 %v6071_v40 }
  0xfa   :  { %6079 = vst [vmem:[#allocation6_spill] sm:$0xff] %v4542_v48  ;;  %6080 = vst [vmem:[#allocation7_spill] sm:$0xff] %v4544_v2  ;;  %1418 = vmatpush1.msra.mxu1 %v1320_v12 }
  0xfb   :  { %v262_v5 = vpop.f32.mrf.mxu0  ;;  %v475_v10 = vpop.f32.mrf.mxu1  ;;  %3446 = vmatmul.mubr.msk.bf16.gmra.mxu0 %vm124_vm1, %v4280_v3  ;;  %1423 = vmatprep.subr.mxu1 %v6071_v40  ;;  %v1349_v3 = vld [vmem:[%s6057_s3 + $0xe8] sm:$0xff] }
  0xfc   :  { %v4556_v13 = vadd.f32 %v475_v10, %v262_v5  ;;  %1137 = vmatprep.mubr.bf16.mxu0 %v6069_v1  ;;  %1424 = vmatpush2.msra.mxu1 %v1349_v3  ;;  %v1344_v3 = vld [vmem:[%s6057_s3 + $0xc0] sm:$0xff] }
  0xfd   :  { %v4559_v15 = vpop.f32.mrf.mxu0  ;;  %v4561_v52 = vpop.f32.mrf.mxu1  ;;  %1425 = vmatprep.subr.mxu1 %v6071_v40 }
  0xfe   :  { %1426 = vmatpush2.msra.mxu1 %v1348_v24 }
  0xff   :  { %v266_v19 = vpop.f32.mrf.mxu0  ;;  %v479_v23 = vpop.f32.mrf.mxu1  ;;  %1427 = vmatprep.subr.mxu1 %v6071_v40 }
 0x100   :  { %v4571_v34 = vadd.f32 %v479_v23, %v266_v19  ;;  %1428 = vmatpush2.msra.mxu1 %v1347_v45  ;;  %v1343_v45 = vld [vmem:[%s6057_s3 + $0xb8] sm:$0xff] }
 0x101   :  { %v4573_v38 = vpop.f32.mrf.mxu0  ;;  %v4575_v39 = vpop.f32.mrf.mxu1  ;;  %1429 = vmatprep.subr.mxu1 %v6071_v40 }
 0x102   :  { %6081 = vst [vmem:[#allocation8_spill] sm:$0xff] %v4573_v38  ;;  %6082 = vst [vmem:[#allocation9_spill] sm:$0xff] %v4575_v39  ;;  %1430 = vmatpush2.msra.mxu1 %v1346_v54  ;;  %v1342_v54 = vld [vmem:[%s6057_s3 + $0xb0] sm:$0xff] }
 0x103   :  { %v272_v59 = vpop.f32.mrf.mxu0  ;;  %v485_v53 = vpop.f32.mrf.mxu1  ;;  %3447 = vmatmul.mubr.msk.bf16.gmra.mxu0 %vm124_vm1, %v4294_v7  ;;  %1431 = vmatprep.subr.mxu1 %v6071_v40  ;;  %v1345_v7 = vld [vmem:[%s6057_s3 + $0xc8] sm:$0xff] }
 0x104   :  { %v4587_v55 = vadd.f32 %v485_v53, %v272_v59  ;;  %1147 = vmatprep.mubr.bf16.mxu0 %v6069_v1  ;;  %1432 = vmatpush2.msra.mxu1 %v1345_v7 }
 0x105   :  { %v4590_v4 = vpop.f32.mrf.mxu0  ;;  %v4592_v5 = vpop.f32.mrf.mxu1  ;;  %1433 = vmatprep.subr.mxu1 %v6071_v40 }
 0x106   :  { %1434 = vmatpush2.msra.mxu1 %v1344_v3  ;;  %v1341_v3 = vld [vmem:[%s6057_s3 + $0xa8] sm:$0xff] }
 0x107   :  { %v276_v10 = vpop.f32.mrf.mxu0  ;;  %v489_v12 = vpop.f32.mrf.mxu1  ;;  %1435 = vmatprep.subr.mxu1 %v6071_v40 }
 0x108   :  { %v4602_v19 = vadd.f32 %v489_v12, %v276_v10  ;;  %1436 = vmatpush2.msra.mxu1 %v1343_v45 }
 0x109   :  { %v4604_v23 = vpop.f32.mrf.mxu0  ;;  %v4606_v24 = vpop.f32.mrf.mxu1  ;;  %1437 = vmatprep.subr.mxu1 %v6071_v40 }
 0x10a   :  { %6083 = vst [vmem:[#allocation10_spill] sm:$0xff] %v4604_v23  ;;  %6084 = vst [vmem:[#allocation11_spill] sm:$0xff] %v4606_v24  ;;  %1438 = vmatpush2.msra.mxu1 %v1342_v54 }
 0x10b   :  { %v282_v59 = vpop.f32.mrf.mxu0  ;;  %v495_v53 = vpop.f32.mrf.mxu1  ;;  %3448 = vmatmul.mubr.msk.bf16.gmra.mxu0 %vm124_vm1, %v4307_v11  ;;  %1439 = vmatprep.subr.mxu1 %v6071_v40 }
 0x10c   :  { %v4618_v7 = vadd.f32 %v495_v53, %v282_v59  ;;  %1157 = vmatprep.mubr.bf16.mxu0 %v6069_v1  ;;  %1440 = vmatpush2.msra.mxu1 %v1341_v3  ;;  %v1340_v59 = vld [vmem:[%s6057_s3 + $0xa0] sm:$0xff] }
 0x10d   :  { %v284_v10 = vpop.f32.mrf.mxu0  ;;  %v497_v12 = vpop.f32.mrf.mxu1  ;;  %1441 = vmatprep.subr.mxu1 %v6071_v40 }
 0x10e   :  { %v4625_v11 = vadd.f32 %v497_v12, %v284_v10  ;;  %1442 = vmatpush2.msra.mxu1 %v1340_v59  ;;  %v1339_v10 = vld [vmem:[%s6057_s3 + $0x98] sm:$0xff]  ;;  %v6088_v59 = vmov 0  }
 0x10f   :  { %v286_v45 = vpop.f32.mrf.mxu0  ;;  %v499_v0 = vpop.f32.mrf.mxu1  ;;  %1443 = vmatprep.subr.mxu1 %v6071_v40 }
 0x110   :  { %6085 = vst [vmem:[#allocation12_spill] sm:$0xff] %v4625_v11  ;;  %v4631_v53 = vadd.f32 %v499_v0, %v286_v45  ;;  %1444 = vmatpush2.msra.mxu1 %v1339_v10  ;;  %v1338_v0 = vld [vmem:[%s6057_s3 + $0x90] sm:$0xff]  ;;  %v1337_v10 = vld [vmem:[%s6057_s3 + $0x88] sm:$0xff] }
 0x111   :  { %v4633_v54 = vpop.f32.mrf.mxu0  ;;  %v4635_v1 = vpop.f32.mrf.mxu1  ;;  %1445 = vmatprep.subr.mxu1 %v6071_v40 }
 0x112   :  { %6086 = vst [vmem:[#allocation13_spill] sm:$0xff] %v4633_v54  ;;  %6087 = vst [vmem:[#allocation14_spill] sm:$0xff] %v4635_v1  ;;  %1446 = vmatpush2.msra.mxu1 %v1338_v0 }
 0x113   :  { %v292_v12 = vpop.f32.mrf.mxu0  ;;  %v505_v3 = vpop.f32.mrf.mxu1  ;;  %3449 = vmatmul.mubr.msk.bf16.gmra.mxu0 %vm124_vm1, %v4317_v14  ;;  %1447 = vmatprep.subr.mxu1 %v6071_v40 }
 0x114   :  { %v4647_v45 = vadd.f32 %v505_v3, %v292_v12  ;;  %1167 = vmatprep.mubr.bf16.mxu0 %v6088_v59  ;;  %1448 = vmatpush2.msra.mxu1 %v1337_v10  ;;  %v1336_v12 = vld [vmem:[%s6057_s3 + $0x80] sm:$0xff] }
 0x115   :  { %v294_v11 = vpop.f32.mrf.mxu0  ;;  %v507_v1 = vpop.f32.mrf.mxu1  ;;  %1449 = vmatprep.subr.mxu1 %v6071_v40 }
 0x116   :  { %v4654_v14 = vadd.f32 %v507_v1, %v294_v11  ;;  %1450 = vmatpush2.msra.mxu1 %v1336_v12 }
 0x117   :  { %v296_v54 = vpop.f32.mrf.mxu0  ;;  %v509_v24 = vpop.f32.mrf.mxu1  ;;  %1542 = vmatprep.subr.mxu1 %v6071_v40 }
 0x118   :  { %6089 = vst [vmem:[#allocation15_spill] sm:$0xff] %v4654_v14  ;;  %v4660_v3 = vadd.f32 %v509_v24, %v296_v54 }
 0x119   :  { %v4662_v0 = vpop.f32.mrf.mxu0  ;;  %v4664_v23 = vpop.f32.mrf.mxu1 }
 0x11a   :  { %6090 = vst [vmem:[#allocation16_spill] sm:$0xff] %v4662_v0  ;;  %6091 = vst [vmem:[#allocation17_spill] sm:$0xff] %v4664_v23 }
 0x11b   :  { %v302_v1 = vpop.f32.mrf.mxu0  ;;  %v515_v11 = vpop.f32.mrf.mxu1  ;;  %3450 = vmatmul.mubr.msk.bf16.gmra.mxu0 %vm124_vm1, %v4248_v57  ;;  %v6094_v57 = vpack.c.bf16 %v4266_v61, %v4261_v60  ;;  %v418_v61 = vadd.f32 %v4407_v22, %v4405_v21  ;;  %v428_v21 = vadd.f32 %v4422_v32, %v4420_v31  ;;  %v438_v31 = vadd.f32 %v4438_v43, %v4436_v42 }
 0x11c   :  { %v4669_v10 = vadd.f32 %v515_v11, %v302_v1  ;;  %1177 = vmatprep.mubr.bf16.mxu0 %v6088_v59  ;;  %v448_v42 = vadd.f32 %v4468_v63, %v4466_v62  ;;  %v458_v62 = vadd.f32 %v4499_v18, %v4497_v17  ;;  %v468_v17 = vadd.f32 %v4530_v44, %v4528_v47 }
 0x11d   :  { %v304_v14 = vpop.f32.mrf.mxu0  ;;  %v517_v39 = vpop.f32.mrf.mxu1  ;;  %v478_v47 = vadd.f32 %v4561_v52, %v4559_v15  ;;  %v488_v15 = vadd.f32 %v4592_v5, %v4590_v4 }
 0x11e   :  { %v4672_v24 = vadd.f32 %v517_v39, %v304_v14 }
 0x11f   :  { %v306_v54 = vpop.f32.mrf.mxu0  ;;  %v519_v12 = vpop.f32.mrf.mxu1 }
 0x120   :  { %v4674_v0 = vadd.f32 %v519_v12, %v306_v54 }
 0x121   :  { %v4676_v23 = vpop.f32.mrf.mxu0  ;;  %v4678_v40 = vpop.f32.mrf.mxu1 }
 0x122   :  { %6092 = vst [vmem:[#allocation18_spill] sm:$0xff] %v4676_v23  ;;  %6093 = vst [vmem:[#allocation19_spill] sm:$0xff] %v4678_v40 }
 0x123   :  { %v312_v38 = vpop.f32.mrf.mxu0  ;;  %v525_v2 = vpop.f32.mrf.mxu1  ;;  %3451 = vmatmul.mubr.msk.bf16.gmra.mxu0 %vm124_vm1, %v6094_v57 }
 0x124   :  { %v4684_v1 = vadd.f32 %v525_v2, %v312_v38  ;;  %1857 = vmatprep.mubr.bf16.mxu0 %v6088_v59 }
 0x125   :  { %v314_v39 = vpop.f32.mrf.mxu0  ;;  %v527_v14 = vpop.f32.mrf.mxu1 }
 0x126   :  { %v4687_v11 = vadd.f32 %v527_v14, %v314_v39 }
 0x127   :  { %v316_v54 = vpop.f32.mrf.mxu0  ;;  %v529_v12 = vpop.f32.mrf.mxu1 }
 0x128   :  { %v4689_v23 = vadd.f32 %v529_v12, %v316_v54 }
 0x129   :  { %v4691_v40 = vpop.f32.mrf.mxu0  ;;  %v4693_v48 = vpop.f32.mrf.mxu1 }
 0x12a   :  { %6095 = vst [vmem:[#allocation20_spill] sm:$0xff] %v4691_v40  ;;  %6096 = vst [vmem:[#allocation21_spill] sm:$0xff] %v4693_v48 }
 0x12b   :  { %v601_v33 = vpop.f32.mrf.mxu0  ;;  %v4695_v60 = vpop.f32.mrf.mxu1 }
 0x12c   :  { %v4700_v2 = vadd.f32 %v601_v33, %v4402_v20 }
 0x12d   :  { %v603_v38 = vpop.f32.mrf.mxu0  ;;  %v4702_v57 = vpop.f32.mrf.mxu1 }
 0x12e   :  { %v4704_v39 = vadd.f32 %v603_v38, %v418_v61 }
 0x12f   :  { %v605_v14 = vpop.f32.mrf.mxu0  ;;  %v4711_v59 = vpop.f32.mrf.mxu1 }
 0x130   :  { %v4707_v54 = vadd.f32 %v605_v14, %v4409_v25 }
 0x131   :  { %v4709_v12 = vpop.f32.mrf.mxu0  ;;  %v4718_v22 = vpop.f32.mrf.mxu1 }
 0x133   :  { %v611_v48 = vpop.f32.mrf.mxu0  ;;  %v4725_v14 = vpop.f32.mrf.mxu1 }
 0x134   :  { %v4716_v20 = vadd.f32 %v611_v48, %v4417_v30 }
 0x135   :  { %v613_v33 = vpop.f32.mrf.mxu0  ;;  %v4734_v32 = vpop.f32.mrf.mxu1 }
 0x136   :  { %v4720_v61 = vadd.f32 %v613_v33, %v428_v21 }
 0x137   :  { %v615_v38 = vpop.f32.mrf.mxu0 }
 0x138   :  { %v4723_v25 = vadd.f32 %v615_v38, %v4424_v35  ;;  %v4741_v38 = vpop.f32.mrf.mxu1 }
 0x139   :  { %v4727_v40 = vpop.f32.mrf.mxu0 }
 0x13a   :  { %v4750_v43 = vpop.f32.mrf.mxu1 }
 0x13b   :  { %v621_v29 = vpop.f32.mrf.mxu0 }
 0x13c   :  { %v4732_v30 = vadd.f32 %v621_v29, %v4433_v41 }
 0x13d   :  { %v623_v48 = vpop.f32.mrf.mxu0 }
 0x13e   :  { %v4736_v21 = vadd.f32 %v623_v48, %v438_v31 }
 0x13f   :  { %v625_v33 = vpop.f32.mrf.mxu0 }
 0x140   :  { %6097 = vst [vmem:[#allocation22_spill] sm:$0xff] %v4736_v21  ;;  %v4739_v35 = vadd.f32 %v625_v33, %v4447_v49  ;;  %v4757_v33 = vpop.f32.mrf.mxu1 }
 0x141   :  { %v4743_v9 = vpop.f32.mrf.mxu0 }
 0x142   :  { %6098 = vst [vmem:[#allocation23_spill] sm:$0xff] %v4739_v35  ;;  %v4766_v63 = vpop.f32.mrf.mxu1 }
 0x143   :  { %v631_v8 = vpop.f32.mrf.mxu0 }
 0x144   :  { %v4748_v41 = vadd.f32 %v631_v8, %v4463_v58 }
 0x145   :  { %v633_v29 = vpop.f32.mrf.mxu0 }
 0x146   :  { %v4752_v31 = vadd.f32 %v633_v29, %v448_v42 }
 0x147   :  { %v635_v48 = vpop.f32.mrf.mxu0 }
 0x148   :  { %6099 = vst [vmem:[#allocation24_spill] sm:$0xff] %v4752_v31  ;;  %v4755_v49 = vadd.f32 %v635_v48, %v4478_v6  ;;  %v4773_v48 = vpop.f32.mrf.mxu1 }
 0x149   :  { %v4759_v35 = vpop.f32.mrf.mxu0 }
 0x14a   :  { %6100 = vst [vmem:[#allocation25_spill] sm:$0xff] %v4755_v49  ;;  %v4782_v18 = vpop.f32.mrf.mxu1 }
 0x14b   :  { %v641_v21 = vpop.f32.mrf.mxu0 }
 0x14c   :  { %v4764_v58 = vadd.f32 %v641_v21, %v4494_v16 }
 0x14d   :  { %v643_v8 = vpop.f32.mrf.mxu0 }
 0x14e   :  { %v4768_v42 = vadd.f32 %v643_v8, %v458_v62 }
 0x14f   :  { %v645_v29 = vpop.f32.mrf.mxu0 }
 0x150   :  { %6101 = vst [vmem:[#allocation26_spill] sm:$0xff] %v4768_v42  ;;  %v4771_v6 = vadd.f32 %v645_v29, %v4509_v28  ;;  %v4789_v29 = vpop.f32.mrf.mxu1 }
 0x151   :  { %v4775_v49 = vpop.f32.mrf.mxu0 }
 0x152   :  { %6102 = vst [vmem:[#allocation27_spill] sm:$0xff] %v4771_v6  ;;  %v4798_v44 = vpop.f32.mrf.mxu1 }
 0x153   :  { %v651_v31 = vpop.f32.mrf.mxu0 }
 0x154   :  { %v4780_v16 = vadd.f32 %v651_v31, %v4525_v46 }
 0x155   :  { %v653_v21 = vpop.f32.mrf.mxu0 }
 0x156   :  { %v4784_v62 = vadd.f32 %v653_v21, %v468_v17 }
 0x157   :  { %v655_v8 = vpop.f32.mrf.mxu0 }
 0x158   :  { %6103 = vst [vmem:[#allocation28_spill] sm:$0xff] %v4784_v62  ;;  %v4787_v28 = vadd.f32 %v655_v8, %v4540_v56  ;;  %v4805_v8 = vpop.f32.mrf.mxu1 }
 0x159   :  { %v4791_v6 = vpop.f32.mrf.mxu0 }
 0x15a   :  { %6104 = vst [vmem:[#allocation29_spill] sm:$0xff] %v4787_v28  ;;  %v4814_v52 = vpop.f32.mrf.mxu1 }
 0x15b   :  { %v661_v42 = vpop.f32.mrf.mxu0 }
 0x15c   :  { %v4796_v46 = vadd.f32 %v661_v42, %v4556_v13 }
 0x15d   :  { %v663_v31 = vpop.f32.mrf.mxu0 }
 0x15e   :  { %v4800_v17 = vadd.f32 %v663_v31, %v478_v47 }
 0x15f   :  { %v665_v21 = vpop.f32.mrf.mxu0 }
 0x160   :  { %6105 = vst [vmem:[#allocation30_spill] sm:$0xff] %v4800_v17  ;;  %v4803_v56 = vadd.f32 %v665_v21, %v4571_v34  ;;  %v4821_v21 = vpop.f32.mrf.mxu1 }
 0x161   :  { %v4807_v28 = vpop.f32.mrf.mxu0 }
 0x162   :  { %6106 = vst [vmem:[#allocation31_spill] sm:$0xff] %v4803_v56  ;;  %6107 = vst [vmem:[#allocation32_spill] sm:$0xff] %v4807_v28  ;;  %v4828_v4 = vpop.f32.mrf.mxu1 }
 0x163   :  { %v671_v62 = vpop.f32.mrf.mxu0 }
 0x164   :  { %v4812_v13 = vadd.f32 %v671_v62, %v4587_v55 }
 0x165   :  { %v673_v42 = vpop.f32.mrf.mxu0 }
 0x166   :  { %v4816_v47 = vadd.f32 %v673_v42, %v488_v15  ;;  %v4835_v15 = vpop.f32.mrf.mxu1 }
 0x167   :  { %v675_v31 = vpop.f32.mrf.mxu0 }
 0x168   :  { %6108 = vst [vmem:[#allocation33_spill] sm:$0xff] %v4816_v47  ;;  %v4819_v34 = vadd.f32 %v675_v31, %v4602_v19 }
 0x169   :  { %v4823_v56 = vpop.f32.mrf.mxu0 }
 0x16a   :  { %6109 = vst [vmem:[#allocation34_spill] sm:$0xff] %v4819_v34  ;;  %v4842_v34 = vpop.f32.mrf.mxu1 }
 0x16b   :  { %v681_v17 = vpop.f32.mrf.mxu0 }
 0x16c   :  { %v4826_v28 = vadd.f32 %v681_v17, %v4618_v7 }
 0x16d   :  { %v4830_v55 = vpop.f32.mrf.mxu0 }
 0x16e   :  { %6110 = vst [vmem:[#allocation35_spill] sm:$0xff] %v4826_v28  ;;  %6111 = vst [vmem:[#allocation36_spill] sm:$0xff] %v4830_v55  ;;  %v4849_v55 = vpop.f32.mrf.mxu1 }
 0x16f   :  { %v685_v5 = vpop.f32.mrf.mxu0 }
 0x170   :  { %v4833_v62 = vadd.f32 %v685_v5, %v4631_v53 }
 0x171   :  { %v4837_v19 = vpop.f32.mrf.mxu0 }
 0x172   :  { %6112 = vst [vmem:[#allocation37_spill] sm:$0xff] %v4833_v62  ;;  %6113 = vst [vmem:[#allocation38_spill] sm:$0xff] %v4837_v19  ;;  %v4856_v19 = vpop.f32.mrf.mxu1 }
 0x173   :  { %v691_v42 = vpop.f32.mrf.mxu0 }
 0x174   :  { %v4840_v31 = vadd.f32 %v691_v42, %v4647_v45 }
 0x175   :  { %v4844_v7 = vpop.f32.mrf.mxu0 }
 0x176   :  { %6114 = vst [vmem:[#allocation39_spill] sm:$0xff] %v4840_v31  ;;  %6115 = vst [vmem:[#allocation40_spill] sm:$0xff] %v4844_v7 }
 0x177   :  { %v695_v17 = vpop.f32.mrf.mxu0 }
 0x178   :  { %v4847_v28 = vadd.f32 %v695_v17, %v4660_v3  ;;  %v4864_v3 = vpop.f32.mrf.mxu1 }
 0x179   :  { %v4851_v53 = vpop.f32.mrf.mxu0 }
 0x17a   :  { %6116 = vst [vmem:[#allocation41_spill] sm:$0xff] %v4847_v28  ;;  %6117 = vst [vmem:[#allocation42_spill] sm:$0xff] %v4851_v53  ;;  %v1238_v28 = vlaneseq }
 0x17b   :  { %v701_v5 = vpop.f32.mrf.mxu0 }
 0x17c   :  { %v4854_v62 = vadd.f32 %v701_v5, %v4669_v10  ;;  %v4871_v10 = vpop.f32.mrf.mxu1 }
 0x17d   :  { %v703_v45 = vpop.f32.mrf.mxu0 }
 0x17e   :  { %6118 = vst [vmem:[#allocation43_spill] sm:$0xff] %v4854_v62  ;;  %v4859_v42 = vadd.f32 %v703_v45, %v4672_v24  ;;  %v4876_v24 = vshrl.u32 %v1238_v28, 7  ;;  %v954_v28 = vadd.f32 %v4695_v60, %v4700_v2 }
 0x17f   :  { %v705_v31 = vpop.f32.mrf.mxu0 }
 0x180   :  { %6119 = vst [vmem:[#allocation44_spill] sm:$0xff] %v4859_v42  ;;  %v4862_v7 = vadd.f32 %v705_v31, %v4674_v0  ;;  %v4881_v31 = vpop.f32.mrf.mxu1 }
 0x181   :  { %v4866_v17 = vpop.f32.mrf.mxu0 }
 0x182   :  { %6120 = vst [vmem:[#allocation45_spill] sm:$0xff] %v4862_v7  ;;  %6121 = vst [vmem:[#allocation46_spill] sm:$0xff] %v4866_v17 }
 0x183   :  { %v711_v53 = vpop.f32.mrf.mxu0 }
 0x184   :  { %v4869_v47 = vadd.f32 %v711_v53, %v4684_v1  ;;  %v422_v1 = vadd.f32 %v4413_v27, %v4411_v26  ;;  %v955_v26 = vadd.f32 %v4702_v57, %v4704_v39  ;;  %v956_v27 = vadd.f32 %v4711_v59, %v4707_v54 }
 0x185   :  { %v713_v5 = vpop.f32.mrf.mxu0  ;;  %v432_v59 = vadd.f32 %v4428_v37, %v4426_v36  ;;  %v959_v37 = vadd.f32 %v4734_v32, %v4720_v61  ;;  %v442_v32 = vadd.f32 %v4451_v51, %v4449_v50 }
 0x186   :  { %6122 = vst [vmem:[#allocation47_spill] sm:$0xff] %v4869_v47  ;;  %v4874_v62 = vadd.f32 %v713_v5, %v4687_v11  ;;  %v1236_v11 = vld [vmem:[%s6058_s2] sm:$0x3]  ;;  %v6074_v5 = vsub.s32 1, %v4876_v24 }
 0x187   :  { %v715_v45 = vpop.f32.mrf.mxu0 }
 0x188   :  { %6123 = vst [vmem:[#allocation48_spill] sm:$0xff] %v4874_v62  ;;  %v4879_v0 = vadd.f32 %v715_v45, %v4689_v23  ;;  %v723_v23 = vadd.f32 %v4709_v12, %v422_v1  ;;  %v4895_v45 = vpop.f32.mrf.mxu1  ;;  %v6126_v62 = vsub.s32 0, %v4876_v24  ;;  %v4908_v12 = vrot.slane %v1236_v11, %v6074_v5 }
 0x189   :  { %v4883_v7 = vpop.f32.mrf.mxu0 }
 0x18a   :  { %6124 = vst [vmem:[#allocation49_spill] sm:$0xff] %v4879_v0  ;;  %6125 = vst [vmem:[#allocation50_spill] sm:$0xff] %v4883_v7  ;;  %v4903_v7 = vrot.slane %v1236_v11, %v6126_v62  ;;  %v957_v60 = vadd.f32 %v4718_v22, %v723_v23  ;;  %v4910_v17 = vpop.f32.mrf.mxu1  ;;  %v958_v22 = vadd.f32 %v4725_v14, %v4716_v20 }
 0x18b   :  { %v1069_v47 = vpop.f32.mrf.mxu0 }
 0x18c   :  { %v1188_v53 = vadd.f32 %v1069_v47, %v954_v28  ;;  %v4923_v23 = vpop.f32.mrf.mxu1 }
 0x18d   :  { %v1071_v0 = vpop.f32.mrf.mxu0 }
 0x18e   :  { %v1189_v2 = vadd.f32 %v1071_v0, %v955_v26  ;;  %v1248_v39 = vadd.f32 %v4903_v7, %v1188_v53  ;;  %v727_v0 = vadd.f32 %v4727_v40, %v432_v59  ;;  %v960_v53 = vadd.f32 %v4741_v38, %v4723_v25  ;;  %v1527_v26 = vld [vmem:[%s6059_s4 + $0x78] sm:$0xff]  ;;  %v1526_v25 = vld [vmem:[%s6059_s4 + $0x70] sm:$0xff] }
 0x18f   :  { %v1073_v42 = vpop.f32.mrf.mxu0  ;;  %v962_v59 = vadd.f32 %v4757_v33, %v4732_v30  ;;  %v1524_v30 = vld [vmem:[%s6059_s4 + $0x60] sm:$0xff] }
 0x190   :  { %v1190_v1 = vadd.f32 %v1073_v42, %v956_v27  ;;  %v1249_v11 = vadd.f32 %v4908_v12, %v1189_v2  ;;  %v961_v27 = vadd.f32 %v4750_v43, %v727_v0  ;;  %v6128_v33 = vld [vmem:[#allocation22_spill] sm:$0xff] }
 0x191   :  { %v1075_v57 = vpop.f32.mrf.mxu0 }
 0x192   :  { %v1250_v54 = vadd.f32 %v4903_v7, %v1190_v1  ;;  %v1191_v47 = vadd.f32 %v1075_v57, %v957_v60  ;;  %v4937_v1 = vpop.f32.mrf.mxu1 }
 0x193   :  { %v1079_v62 = vpop.f32.mrf.mxu0 }
 0x194   :  { %v4920_v42 = vmax.f32 %v1248_v39, %v1250_v54  ;;  %v1251_v28 = vadd.f32 %v4908_v12, %v1191_v47  ;;  %v1192_v14 = vadd.f32 %v1079_v62, %v958_v22  ;;  %v6127_v54 = vmov 0.0   ;;  %v1525_v47 = vld [vmem:[%s6059_s4 + $0x68] sm:$0xff]  ;;  %v4958_v0 = vpop.f32.mrf.mxu1 }
 0x195   :  { %v1081_v36 = vpop.f32.mrf.mxu0  ;;  %v731_v22 = vadd.f32 %v4743_v9, %v442_v32  ;;  %v6129_v9 = vld [vmem:[#allocation23_spill] sm:$0xff] }
 0x196   :  { %v4929_v20 = vmax.f32 %v1249_v11, %v1251_v28  ;;  %v1193_v60 = vadd.f32 %v1081_v36, %v959_v37  ;;  %v1252_v38 = vadd.f32 %v4903_v7, %v1192_v14  ;;  %v963_v28 = vadd.f32 %v4766_v63, %v6128_v33  ;;  %v4977_v63 = vpop.f32.mrf.mxu1 }
 0x197   :  { %v1083_v40 = vpop.f32.mrf.mxu0  ;;  %v964_v36 = vadd.f32 %v4773_v48, %v6129_v9 }
 0x198   :  { %v1194_v2 = vadd.f32 %v1083_v40, %v960_v53  ;;  %3452 = vmatprep.mubr.msk.f32.mxu1 %vm1350_vm2, %v4929_v20  ;;  %v1253_v50 = vadd.f32 %v4908_v12, %v1193_v60  ;;  %v1523_v40 = vld [vmem:[%s6059_s4 + $0x58] sm:$0xff] }
 0x199   :  { %v1085_v61 = vpop.f32.mrf.mxu0  ;;  %1452 = vmatmul.mubr.f32.vlgmr.msra.gmra.mxu1 %v4920_v42 }
 0x19a   :  { %v1254_v43 = vadd.f32 %v4903_v7, %v1194_v2  ;;  %v1195_v57 = vadd.f32 %v1085_v61, %v961_v27  ;;  %1543 = vmatpush1.msra.mxu1 %v1527_v26  ;;  %v965_v26 = vadd.f32 %v4782_v18, %v731_v22  ;;  %v1522_v2 = vld [vmem:[%s6059_s4 + $0x50] sm:$0xff]  ;;  %v6130_v61 = vld [vmem:[#allocation2_spill] sm:$0xff] }
 0x19b   :  { %v1089_v39 = vpop.f32.mrf.mxu0  ;;  %1544 = vmatprep.subr.mxu1 %v6127_v54 }
 0x19c   :  { %v1255_v51 = vadd.f32 %v4908_v12, %v1195_v57  ;;  %v4956_v62 = vmax.f32 %v1252_v38, %v1254_v43  ;;  %1545 = vmatpush1.msra.mxu1 %v1526_v25  ;;  %v1196_v53 = vadd.f32 %v1089_v39, %v962_v59  ;;  %v6131_v25 = vld [vmem:[#allocation3_spill] sm:$0xff]  ;;  %v966_v57 = vadd.f32 %v4789_v29, %v4748_v41  ;;  %v1520_v41 = vld [vmem:[%s6059_s4 + $0x40] sm:$0xff]  ;;  %v6132_v29 = vld [vmem:[#allocation24_spill] sm:$0xff] }
 0x19d   :  { %v1091_v11 = vpop.f32.mrf.mxu0  ;;  %1546 = vmatprep.subr.mxu1 %v6127_v54  ;;  %v452_v18 = vadd.f32 %v6131_v25, %v6130_v61  ;;  %v1521_v39 = vld [vmem:[%s6059_s4 + $0x48] sm:$0xff]  ;;  %v967_v33 = vadd.f32 %v4798_v44, %v6132_v29 }
 0x19e   :  { %v4968_v37 = vmax.f32 %v1253_v50, %v1255_v51  ;;  %1547 = vmatpush1.msra.mxu1 %v1525_v47  ;;  %v1197_v27 = vadd.f32 %v1091_v11, %v963_v28  ;;  %v1256_v32 = vadd.f32 %v4903_v7, %v1196_v53  ;;  %v4999_v11 = vpop.f32.mrf.mxu1 }
 0x19f   :  { %v1093_v14 = vpop.f32.mrf.mxu0  ;;  %1548 = vmatprep.subr.mxu1 %v6127_v54  ;;  %v735_v47 = vadd.f32 %v4759_v35, %v452_v18  ;;  %v6133_v35 = vld [vmem:[#allocation25_spill] sm:$0xff] }
 0x1a0   :  { %v1198_v60 = vadd.f32 %v1093_v14, %v964_v36  ;;  %3453 = vmatprep.mubr.msk.f32.mxu1 %vm1350_vm2, %v4968_v37  ;;  %1549 = vmatpush1.msra.mxu1 %v1524_v30  ;;  %v1257_v22 = vadd.f32 %v4908_v12, %v1197_v27  ;;  %v968_v28 = vadd.f32 %v4805_v8, %v6133_v35  ;;  %v1519_v14 = vld [vmem:[%s6059_s4 + $0x38] sm:$0xff]  ;;  %v5018_v44 = vpop.f32.mrf.mxu1 }
 0x1a1   :  { %v1095_v48 = vpop.f32.mrf.mxu0  ;;  %1457 = vmatmul.mubr.f32.gmra.mxu1 %v4956_v62  ;;  %1550 = vmatprep.subr.mxu1 %v6127_v54 }
 0x1a2   :  { %v1258_v38 = vadd.f32 %v4903_v7, %v1198_v60  ;;  %v1199_v43 = vadd.f32 %v1095_v48, %v965_v26  ;;  %1551 = vmatpush1.msra.mxu1 %v1523_v40  ;;  %v969_v40 = vadd.f32 %v4814_v52, %v735_v47  ;;  %v1518_v60 = vld [vmem:[%s6059_s4 + $0x30] sm:$0xff] }
 0x1a3   :  { %v1099_v59 = vpop.f32.mrf.mxu0  ;;  %1552 = vmatprep.subr.mxu1 %v6127_v54  ;;  %v6134_v48 = vld [vmem:[#allocation4_spill] sm:$0xff] }
 0x1a4   :  { %v1259_v50 = vadd.f32 %v4908_v12, %v1199_v43  ;;  %v4997_v51 = vmax.f32 %v1256_v32, %v1258_v38  ;;  %1553 = vmatpush1.msra.mxu1 %v1522_v2  ;;  %v1200_v36 = vadd.f32 %v1099_v59, %v966_v57  ;;  %v6135_v2 = vld [vmem:[#allocation5_spill] sm:$0xff]  ;;  %v970_v32 = vadd.f32 %v4821_v21, %v4764_v58  ;;  %v1517_v43 = vld [vmem:[%s6059_s4 + $0x28] sm:$0xff]  ;;  %v1516_v58 = vld [vmem:[%s6059_s4 + $0x20] sm:$0xff] }
 0x1a5   :  { %v1101_v30 = vpop.f32.mrf.mxu0  ;;  %1554 = vmatprep.subr.mxu1 %v6127_v54  ;;  %v462_v52 = vadd.f32 %v6135_v2, %v6134_v48  ;;  %v6136_v21 = vld [vmem:[#allocation26_spill] sm:$0xff]  ;;  %v974_v2 = vadd.f32 %v4849_v55, %v4780_v16  ;;  %v6140_v55 = vld [vmem:[#allocation28_spill] sm:$0xff] }
 0x1a6   :  { %v5009_v9 = vmax.f32 %v1257_v22, %v1259_v50  ;;  %1555 = vmatpush1.msra.mxu1 %v1521_v39  ;;  %v1201_v26 = vadd.f32 %v1101_v30, %v967_v33  ;;  %v1260_v61 = vadd.f32 %v4903_v7, %v1200_v36  ;;  %v5040_v22 = vpop.f32.mrf.mxu1  ;;  %v971_v30 = vadd.f32 %v4828_v4, %v6136_v21  ;;  %v1512_v16 = vld [vmem:[%s6059_s4] sm:$0xff] }
 0x1a7   :  { %v1103_v53 = vpop.f32.mrf.mxu0  ;;  %1556 = vmatprep.subr.mxu1 %v6127_v54  ;;  %v739_v57 = vadd.f32 %v4775_v49, %v462_v52  ;;  %v6137_v49 = vld [vmem:[#allocation27_spill] sm:$0xff] }
 0x1a8   :  { %v1202_v27 = vadd.f32 %v1103_v53, %v968_v28  ;;  %3454 = vmatprep.mubr.msk.f32.mxu1 %vm1350_vm2, %v5009_v9  ;;  %1557 = vmatpush1.msra.mxu1 %v1520_v41  ;;  %v1261_v59 = vadd.f32 %v4908_v12, %v1201_v26  ;;  %v972_v41 = vadd.f32 %v4835_v15, %v6137_v49  ;;  %v1515_v28 = vld [vmem:[%s6059_s4 + $0x18] sm:$0xff]  ;;  %v5059_v4 = vpop.f32.mrf.mxu1  ;;  %v6138_v26 = vld [vmem:[#allocation6_spill] sm:$0xff] }
 0x1a9   :  { %v1105_v8 = vpop.f32.mrf.mxu0  ;;  %1462 = vmatmul.mubr.f32.gmra.mxu1 %v4997_v51  ;;  %1558 = vmatprep.subr.mxu1 %v6127_v54  ;;  %v973_v36 = vadd.f32 %v4842_v34, %v739_v57 }
 0x1aa   :  { %v1262_v25 = vadd.f32 %v4903_v7, %v1202_v27  ;;  %v1203_v18 = vadd.f32 %v1105_v8, %v969_v40  ;;  %1559 = vmatpush1.msra.mxu1 %v1519_v14  ;;  %v1514_v40 = vld [vmem:[%s6059_s4 + $0x10] sm:$0xff]  ;;  %v6139_v27 = vld [vmem:[#allocation7_spill] sm:$0xff] }
 0x1ab   :  { %v1109_v38 = vpop.f32.mrf.mxu0  ;;  %1560 = vmatprep.subr.mxu1 %v6127_v54  ;;  %v472_v34 = vadd.f32 %v6139_v27, %v6138_v26  ;;  %v1539_v27 = vld [vmem:[%s6059_s4 + $0xd8] sm:$0xff] }
 0x1ac   :  { %v1263_v39 = vadd.f32 %v4908_v12, %v1203_v18  ;;  %v5038_v47 = vmax.f32 %v1260_v61, %v1262_v25  ;;  %1561 = vmatpush1.msra.mxu1 %v1518_v60  ;;  %v1204_v33 = vadd.f32 %v1109_v38, %v970_v32  ;;  %v1513_v61 = vld [vmem:[%s6059_s4 + $0x8] sm:$0xff] }
 0x1ad   :  { %v1111_v50 = vpop.f32.mrf.mxu0  ;;  %1562 = vmatprep.subr.mxu1 %v6127_v54  ;;  %v743_v25 = vadd.f32 %v4791_v6, %v472_v34  ;;  %v6141_v6 = vld [vmem:[#allocation29_spill] sm:$0xff]  ;;  %v6144_v34 = vld [vmem:[#allocation32_spill] sm:$0xff] }
 0x1ae   :  { %v5050_v29 = vmax.f32 %v1261_v59, %v1263_v39  ;;  %1563 = vmatpush1.msra.mxu1 %v1517_v43  ;;  %v1205_v53 = vadd.f32 %v1111_v50, %v971_v30  ;;  %v1264_v8 = vadd.f32 %v4903_v7, %v1204_v33  ;;  %v5081_v43 = vpop.f32.mrf.mxu1  ;;  %v975_v59 = vadd.f32 %v4856_v19, %v6140_v55  ;;  %v1541_v30 = vld [vmem:[%s6059_s4 + $0xe8] sm:$0xff] }
 0x1af   :  { %v1113_v35 = vpop.f32.mrf.mxu0  ;;  %1564 = vmatprep.subr.mxu1 %v6127_v54  ;;  %v976_v39 = vadd.f32 %v4864_v3, %v6141_v6  ;;  %v977_v49 = vadd.f32 %v4871_v10, %v743_v25 }
 0x1b0   :  { %v1206_v14 = vadd.f32 %v1113_v35, %v972_v41  ;;  %3455 = vmatprep.mubr.msk.f32.mxu1 %vm1350_vm2, %v5050_v29  ;;  %1565 = vmatpush1.msra.mxu1 %v1516_v58  ;;  %v1265_v18 = vadd.f32 %v4908_v12, %v1205_v53  ;;  %v5100_v19 = vpop.f32.mrf.mxu1  ;;  %v1540_v35 = vld [vmem:[%s6059_s4 + $0xe0] sm:$0xff] }
 0x1b1   :  { %v1115_v15 = vpop.f32.mrf.mxu0  ;;  %1467 = vmatmul.mubr.f32.gmra.mxu1 %v5038_v47  ;;  %1566 = vmatprep.subr.mxu1 %v6127_v54 }
 0x1b2   :  { %v1266_v60 = vadd.f32 %v4903_v7, %v1206_v14  ;;  %v1207_v48 = vadd.f32 %v1115_v15, %v973_v36  ;;  %1567 = vmatpush1.msra.mxu1 %v1515_v28  ;;  %v6142_v28 = vld [vmem:[#allocation8_spill] sm:$0xff]  ;;  %v6143_v36 = vld [vmem:[#allocation9_spill] sm:$0xff] }
 0x1b3   :  { %v1119_v52 = vpop.f32.mrf.mxu0  ;;  %1568 = vmatprep.subr.mxu1 %v6127_v54  ;;  %v482_v10 = vadd.f32 %v6143_v36, %v6142_v28  ;;  %v1535_v36 = vld [vmem:[%s6059_s4 + $0xb8] sm:$0xff] }
 0x1b4   :  { %v1267_v32 = vadd.f32 %v4908_v12, %v1207_v48  ;;  %v5079_v38 = vmax.f32 %v1264_v8, %v1266_v60  ;;  %1569 = vmatpush1.msra.mxu1 %v1514_v40  ;;  %v1208_v58 = vadd.f32 %v1119_v52, %v974_v2  ;;  %v978_v40 = vadd.f32 %v4881_v31, %v4796_v46  ;;  %v5122_v52 = vpop.f32.mrf.mxu1  ;;  %v1538_v46 = vld [vmem:[%s6059_s4 + $0xd0] sm:$0xff]  ;;  %v6145_v31 = vld [vmem:[#allocation30_spill] sm:$0xff] }
 0x1b5   :  { %v1121_v57 = vpop.f32.mrf.mxu0  ;;  %1570 = vmatprep.subr.mxu1 %v6127_v54  ;;  %v747_v8 = vadd.f32 %v6144_v34, %v482_v10  ;;  %v979_v25 = vadd.f32 %v4895_v45, %v6145_v31 }
 0x1b6   :  { %v5091_v50 = vmax.f32 %v1265_v18, %v1267_v32  ;;  %1571 = vmatpush1.msra.mxu1 %v1513_v61  ;;  %v1209_v41 = vadd.f32 %v1121_v57, %v975_v59  ;;  %v1268_v53 = vadd.f32 %v4903_v7, %v1208_v58  ;;  %v6146_v18 = vld [vmem:[#allocation31_spill] sm:$0xff] }
 0x1b7   :  { %v1123_v21 = vpop.f32.mrf.mxu0  ;;  %1572 = vmatprep.subr.mxu1 %v6127_v54  ;;  %v980_v32 = vadd.f32 %v4910_v17, %v6146_v18  ;;  %v1537_v59 = vld [vmem:[%s6059_s4 + $0xc8] sm:$0xff]  ;;  %v981_v6 = vadd.f32 %v4923_v23, %v747_v8  ;;  %v5141_v17 = vpop.f32.mrf.mxu1 }
 0x1b8   :  { %v1210_v33 = vadd.f32 %v1123_v21, %v976_v39  ;;  %3456 = vmatprep.mubr.msk.f32.mxu1 %vm1350_vm2, %v5091_v50  ;;  %1573 = vmatpush1.msra.mxu1 %v1512_v16  ;;  %v1269_v60 = vadd.f32 %v4908_v12, %v1209_v41  ;;  %v1536_v21 = vld [vmem:[%s6059_s4 + $0xc0] sm:$0xff] }
 0x1b9   :  { %v1125_v3 = vpop.f32.mrf.mxu0  ;;  %1472 = vmatmul.mubr.f32.gmra.mxu1 %v5079_v38  ;;  %1578 = vmatprep.subr.mxu1 %v6127_v54 }
 0x1ba   :  { %v1270_v14 = vadd.f32 %v4903_v7, %v1210_v33  ;;  %v1211_v15 = vadd.f32 %v1125_v3, %v977_v49  ;;  %1579 = vmatpush2.msra.mxu1 %v1541_v30  ;;  %v6147_v30 = vld [vmem:[#allocation10_spill] sm:$0xff]  ;;  %v6148_v49 = vld [vmem:[#allocation11_spill] sm:$0xff] }
 0x1bb   :  { %v1129_v26 = vpop.f32.mrf.mxu0  ;;  %1580 = vmatprep.subr.mxu1 %v6127_v54  ;;  %v492_v23 = vadd.f32 %v6148_v49, %v6147_v30 }
 0x1bc   :  { %v1271_v48 = vadd.f32 %v4908_v12, %v1211_v15  ;;  %v5120_v2 = vmax.f32 %v1268_v53, %v1270_v14  ;;  %1581 = vmatpush2.msra.mxu1 %v1540_v35  ;;  %v1212_v16 = vadd.f32 %v1129_v26, %v978_v40  ;;  %v982_v35 = vadd.f32 %v4937_v1, %v4812_v13  ;;  %v5163_v40 = vpop.f32.mrf.mxu1  ;;  %v1534_v13 = vld [vmem:[%s6059_s4 + $0xb0] sm:$0xff]  ;;  %v6149_v1 = vld [vmem:[#allocation33_spill] sm:$0xff] }
 0x1bd   :  { %v1131_v61 = vpop.f32.mrf.mxu0  ;;  %1582 = vmatprep.subr.mxu1 %v6127_v54  ;;  %v751_v10 = vadd.f32 %v4823_v56, %v492_v23  ;;  %v6150_v56 = vld [vmem:[#allocation34_spill] sm:$0xff]  ;;  %v1531_v23 = vld [vmem:[%s6059_s4 + $0x98] sm:$0xff] }
 0x1be   :  { %v5132_v57 = vmax.f32 %v1269_v60, %v1271_v48  ;;  %1583 = vmatpush2.msra.mxu1 %v1539_v27  ;;  %v1213_v39 = vadd.f32 %v1131_v61, %v979_v25  ;;  %v1272_v41 = vadd.f32 %v4903_v7, %v1212_v16  ;;  %v983_v27 = vadd.f32 %v4958_v0, %v6149_v1  ;;  %v1533_v61 = vld [vmem:[%s6059_s4 + $0xa8] sm:$0xff]  ;;  %v6151_v0 = vld [vmem:[#allocation13_spill] sm:$0xff] }
 0x1bf   :  { %v1133_v55 = vpop.f32.mrf.mxu0  ;;  %1584 = vmatprep.subr.mxu1 %v6127_v54  ;;  %v984_v34 = vadd.f32 %v4977_v63, %v6150_v56  ;;  %v6152_v63 = vld [vmem:[#allocation14_spill] sm:$0xff]  ;;  %v1529_v56 = vld [vmem:[%s6059_s4 + $0x88] sm:$0xff] }
 0x1c0   :  { %v1214_v58 = vadd.f32 %v1133_v55, %v980_v32  ;;  %3457 = vmatprep.mubr.msk.f32.mxu1 %vm1350_vm2, %v5132_v57  ;;  %1585 = vmatpush2.msra.mxu1 %v1538_v46  ;;  %v1273_v53 = vadd.f32 %v4908_v12, %v1213_v39  ;;  %v985_v46 = vadd.f32 %v4999_v11, %v751_v10  ;;  %v5184_v32 = vpop.f32.mrf.mxu1  ;;  %v1532_v11 = vld [vmem:[%s6059_s4 + $0xa0] sm:$0xff]  ;;  %v6153_v55 = vld [vmem:[#allocation12_spill] sm:$0xff] }
 0x1c1   :  { %v1135_v45 = vpop.f32.mrf.mxu0  ;;  %1477 = vmatmul.mubr.f32.gmra.mxu1 %v5120_v2  ;;  %1586 = vmatprep.subr.mxu1 %v6127_v54  ;;  %v502_v18 = vadd.f32 %v6152_v63, %v6151_v0  ;;  %v6161_v0 = vld [vmem:[#allocation40_spill] sm:$0xff] }
 0x1c2   :  { %v1274_v33 = vadd.f32 %v4903_v7, %v1214_v58  ;;  %v1215_v3 = vadd.f32 %v1135_v45, %v981_v6  ;;  %1587 = vmatpush2.msra.mxu1 %v1537_v59  ;;  %v6154_v59 = vld [vmem:[#allocation36_spill] sm:$0xff] }
 0x1c3   :  { %v1139_v28 = vpop.f32.mrf.mxu0  ;;  %1588 = vmatprep.subr.mxu1 %v6127_v54  ;;  %v753_v6 = vadd.f32 %v6154_v59, %v6153_v55  ;;  %v6162_v55 = vld [vmem:[#allocation39_spill] sm:$0xff] }
 0x1c4   :  { %v1275_v14 = vadd.f32 %v4908_v12, %v1215_v3  ;;  %v5161_v15 = vmax.f32 %v1272_v41, %v1274_v33  ;;  %1589 = vmatpush2.msra.mxu1 %v1536_v21  ;;  %v1216_v60 = vadd.f32 %v1139_v28, %v982_v35  ;;  %v6155_v21 = vld [vmem:[#allocation35_spill] sm:$0xff]  ;;  %v6156_v41 = vld [vmem:[#allocation38_spill] sm:$0xff]  ;;  %v990_v59 = vadd.f32 %v5100_v19, %v6162_v55 }
 0x1c5   :  { %v1141_v26 = vpop.f32.mrf.mxu0  ;;  %1590 = vmatprep.subr.mxu1 %v6127_v54  ;;  %v986_v30 = vadd.f32 %v5018_v44, %v6155_v21  ;;  %v755_v33 = vadd.f32 %v6156_v41, %v502_v18  ;;  %v1530_v44 = vld [vmem:[%s6059_s4 + $0x90] sm:$0xff] }
 0x1c6   :  { %v5173_v8 = vmax.f32 %v1273_v53, %v1275_v14  ;;  %1591 = vmatpush2.msra.mxu1 %v1535_v36  ;;  %v1217_v31 = vadd.f32 %v1141_v26, %v983_v27  ;;  %v1276_v39 = vadd.f32 %v4903_v7, %v1216_v60  ;;  %v937_v36 = vpop.f32.mrf.mxu1  ;;  %v987_v53 = vadd.f32 %v5040_v22, %v753_v6  ;;  %v6157_v14 = vld [vmem:[#allocation37_spill] sm:$0xff]  ;;  %v6158_v22 = vld [vmem:[#allocation16_spill] sm:$0xff] }
 0x1c7   :  { %v1143_v48 = vpop.f32.mrf.mxu0  ;;  %1592 = vmatprep.subr.mxu1 %v6127_v54  ;;  %v988_v26 = vadd.f32 %v5059_v4, %v6157_v14  ;;  %v6159_v4 = vld [vmem:[#allocation17_spill] sm:$0xff] }
 0x1c8   :  { %v1218_v25 = vadd.f32 %v1143_v48, %v984_v34  ;;  %3458 = vmatprep.mubr.msk.f32.mxu1 %vm1350_vm2, %v5173_v8  ;;  %1593 = vmatpush2.msra.mxu1 %v1534_v13  ;;  %v1277_v3 = vadd.f32 %v4908_v12, %v1217_v31  ;;  %v989_v34 = vadd.f32 %v5081_v43, %v755_v33  ;;  %v6160_v43 = vld [vmem:[#allocation15_spill] sm:$0xff]  ;;  %v6164_v33 = vld [vmem:[#allocation41_spill] sm:$0xff] }
 0x1c9   :  { %v1145_v16 = vpop.f32.mrf.mxu0  ;;  %1482 = vmatmul.mubr.f32.gmra.mxu1 %v5161_v15  ;;  %1594 = vmatprep.subr.mxu1 %v6127_v54  ;;  %v757_v63 = vadd.f32 %v6161_v0, %v6160_v43 }
 0x1ca   :  { %v1278_v58 = vadd.f32 %v4903_v7, %v1218_v25  ;;  %v1219_v45 = vadd.f32 %v1145_v16, %v985_v46  ;;  %1595 = vmatpush2.msra.mxu1 %v1533_v61  ;;  %v512_v61 = vadd.f32 %v6159_v4, %v6158_v22  ;;  %v939_v46 = vpop.f32.mrf.mxu1  ;;  %v1528_v25 = vld [vmem:[%s6059_s4 + $0x80] sm:$0xff] }
 0x1cb   :  { %v1149_v49 = vpop.f32.mrf.mxu0  ;;  %1596 = vmatprep.subr.mxu1 %v6127_v54  ;;  %v991_v41 = vadd.f32 %v5122_v52, %v757_v63  ;;  %v6166_v52 = vld [vmem:[#allocation19_spill] sm:$0xff]  ;;  %v6168_v4 = vld [vmem:[#allocation46_spill] sm:$0xff] }
 0x1cc   :  { %v1279_v35 = vadd.f32 %v4908_v12, %v1219_v45  ;;  %v5204_v28 = vmax.f32 %v1276_v39, %v1278_v58  ;;  %1597 = vmatpush2.msra.mxu1 %v1532_v11  ;;  %v1220_v1 = vadd.f32 %v1149_v49, %v986_v30  ;;  %v6163_v39 = vld [vmem:[#allocation42_spill] sm:$0xff]  ;;  %v941_v49 = vpop.f32.mrf.mxu1 }
 0x1cd   :  { %v1151_v10 = vpop.f32.mrf.mxu0  ;;  %1598 = vmatprep.subr.mxu1 %v6127_v54  ;;  %v759_v58 = vadd.f32 %v6163_v39, %v512_v61 }
 0x1ce   :  { %v5213_v13 = vmax.f32 %v1277_v3, %v1279_v35  ;;  %1599 = vmatpush2.msra.mxu1 %v1531_v23  ;;  %v1221_v60 = vadd.f32 %v1151_v10, %v987_v53  ;;  %v1280_v18 = vadd.f32 %v4903_v7, %v1220_v1  ;;  %v992_v3 = vadd.f32 %v5141_v17, %v6164_v33  ;;  %v6172_v33 = vld [vmem:[#allocation21_spill] sm:$0xff] }
 0x1cf   :  { %v1153_v27 = vpop.f32.mrf.mxu0  ;;  %1600 = vmatprep.subr.mxu1 %v6127_v54 }
 0x1d0   :  { %v1222_v48 = vadd.f32 %v1153_v27, %v988_v26  ;;  %3459 = vmatprep.mubr.msk.f32.mxu1 %vm1350_vm2, %v5213_v13  ;;  %1601 = vmatpush2.msra.mxu1 %v1530_v44  ;;  %v1281_v45 = vadd.f32 %v4908_v12, %v1221_v60  ;;  %v993_v44 = vadd.f32 %v5163_v40, %v759_v58  ;;  %v945_v26 = vpop.f32.mrf.mxu1  ;;  %v6165_v27 = vld [vmem:[#allocation18_spill] sm:$0xff] }
 0x1d1   :  { %v1155_v31 = vpop.f32.mrf.mxu0  ;;  %1487 = vmatmul.mubr.f32.gmra.mxu1 %v5204_v28  ;;  %1602 = vmatprep.subr.mxu1 %v6127_v54 }
 0x1d2   :  { %v1282_v16 = vadd.f32 %v4903_v7, %v1222_v48  ;;  %v1223_v11 = vadd.f32 %v1155_v31, %v989_v34  ;;  %1603 = vmatpush2.msra.mxu1 %v1529_v56  ;;  %v522_v56 = vadd.f32 %v6166_v52, %v6165_v27  ;;  %v6167_v48 = vld [vmem:[#allocation43_spill] sm:$0xff]  ;;  %v947_v0 = vpop.f32.mrf.mxu1 }
 0x1d3   :  { %v1159_v6 = vpop.f32.mrf.mxu0  ;;  %1604 = vmatprep.subr.mxu1 %v6127_v54  ;;  %v994_v40 = vadd.f32 %v5184_v32, %v6167_v48 }
 0x1d4   :  { %v5238_v21 = vmax.f32 %v1280_v18, %v1282_v16  ;;  %v1283_v30 = vadd.f32 %v4908_v12, %v1223_v11  ;;  %1605 = vmatpush2.msra.mxu1 %v1528_v25  ;;  %v1224_v35 = vadd.f32 %v1159_v6, %v990_v59  ;;  %v763_v61 = vadd.f32 %v6168_v4, %v522_v56  ;;  %v6169_v18 = vld [vmem:[#allocation44_spill] sm:$0xff]  ;;  %v6170_v11 = vld [vmem:[#allocation45_spill] sm:$0xff]  ;;  %v3490_v56 = vld [vmem:[%s6060_s5 + $0xe8] sm:$0xff] }
 0x1d5   :  { %v1161_v23 = vpop.f32.mrf.mxu0  ;;  %v995_v16 = vadd.f32 %v937_v36, %v6169_v18  ;;  %v996_v55 = vadd.f32 %v939_v46, %v6170_v11 }
 0x1d6   :  { %v5244_v19 = vmax.f32 %v1281_v45, %v1283_v30  ;;  %v1225_v53 = vadd.f32 %v1161_v23, %v991_v41  ;;  %v1284_v17 = vadd.f32 %v4903_v7, %v1224_v35  ;;  %v997_v32 = vadd.f32 %v941_v49, %v763_v61  ;;  %v949_v30 = vpop.f32.mrf.mxu1  ;;  %v6171_v41 = vld [vmem:[#allocation20_spill] sm:$0xff] }
 0x1d7   :  { %v1163_v10 = vpop.f32.mrf.mxu0 }
 0x1d8   :  { %v1226_v14 = vadd.f32 %v1163_v10, %v992_v3  ;;  %3460 = vmatprep.mubr.msk.f32.mxu1 %vm1350_vm2, %v5244_v19  ;;  %v1285_v31 = vadd.f32 %v4908_v12, %v1225_v53  ;;  %v532_v3 = vadd.f32 %v6172_v33, %v6171_v41  ;;  %v6173_v10 = vld [vmem:[#allocation47_spill] sm:$0xff]  ;;  %v6174_v53 = vld [vmem:[#allocation50_spill] sm:$0xff]  ;;  %v3871_v33 = vld [vmem:[%s6060_s5 + $0x30] ss:$8 sps:$4 sm:$0xff]  }
 0x1d9   :  { %v1165_v1 = vpop.f32.mrf.mxu0  ;;  %1492 = vmatmul.mubr.f32.gmra.mxu1 %v5238_v21 }
 0x1da   :  { %v1286_v34 = vadd.f32 %v4903_v7, %v1226_v14  ;;  %v1227_v60 = vadd.f32 %v1165_v1, %v993_v44  ;;  %v998_v44 = vadd.f32 %v945_v26, %v6173_v10  ;;  %v767_v14 = vadd.f32 %v6174_v53, %v532_v3  ;;  %v6176_v26 = vld [vmem:[#allocation49_spill] sm:$0xff]  ;;  %v3876_v3 = vld [vmem:[%s6060_s5 + $0x24] ss:$8 sps:$4 sm:$0xff]   ;;  %v3883_v53 = vld [vmem:[%s6060_s5] ss:$8 sps:$4 sm:$0xff]  }
 0x1db   :  { %v1169_v22 = vpop.f32.mrf.mxu0  ;;  %v1000_v4 = vadd.f32 %v949_v30, %v6176_v26  ;;  %v3877_v10 = vld [vmem:[%s6060_s5 + $0x78] ss:$8 sps:$4 sm:$0xff]  }
 0x1dc   :  { %v5258_v25 = vmax.f32 %v1284_v17, %v1286_v34  ;;  %v1287_v43 = vadd.f32 %v4908_v12, %v1227_v60  ;;  %v1228_v6 = vadd.f32 %v1169_v22, %v994_v40  ;;  %v6175_v17 = vld [vmem:[#allocation48_spill] sm:$0xff]  ;;  %v951_v60 = vpop.f32.mrf.mxu1  ;;  %v3506_v40 = vcombine.high %v3490_v56, %v3490_v56 }
 0x1dd   :  { %v1171_v63 = vpop.f32.mrf.mxu0  ;;  %v999_v34 = vadd.f32 %v947_v0, %v6175_v17  ;;  %v3505_v22 = vcombine.low %v3490_v56, %v3490_v56  ;;  %v1001_v18 = vadd.f32 %v951_v60, %v767_v14  ;;  %v3583_v14 = vld [vmem:[%s6060_s5 + $0x1d8] sm:$0xff] }
 0x1de   :  { %v5263_v59 = vmax.f32 %v1285_v31, %v1287_v43  ;;  %v1229_v58 = vadd.f32 %v1171_v63, %v995_v16  ;;  %v1288_v36 = vadd.f32 %v4903_v7, %v1228_v6  ;;  %3507 = vmatprep.subr.msk.bf16.mxu0 %vm1818_vm3, %v3506_v40 }
 0x1df   :  { %v1173_v39 = vpop.f32.mrf.mxu0  ;;  %v1820_v63 = vsel %vm1818_vm3, %v3505_v22, 0 }
 0x1e0   :  { %v1230_v45 = vadd.f32 %v1173_v39, %v996_v55  ;;  %3461 = vmatprep.mubr.msk.f32.mxu1 %vm1350_vm2, %v5263_v59  ;;  %v1289_v1 = vadd.f32 %v4908_v12, %v1229_v58  ;;  %1826 = vmatpush1.bf16.msra.mxu0 %v1820_v63  ;;  %v3844_v58 = vld [vmem:[%s6060_s5 + $0xdc] ss:$8 sps:$4 sm:$0xff]  }
 0x1e1   :  { %v1175_v23 = vpop.f32.mrf.mxu0  ;;  %1497 = vmatmul.mubr.f32.gmra.mxu1 %v5258_v25  ;;  %1827 = vmatprep.subr.bf16.mxu0 %v3844_v58 }
 0x1e2   :  { %v1290_v46 = vadd.f32 %v4903_v7, %v1230_v45  ;;  %v1231_v35 = vadd.f32 %v1175_v23, %v997_v32  ;;  %v3842_v32 = vld [vmem:[%s6060_s5 + $0xd8] ss:$8 sps:$4 sm:$0xff]  }
 0x1e3   :  { %v1179_v49 = vpop.f32.mrf.mxu0 }
 0x1e4   :  { %v5275_v27 = vmax.f32 %v1288_v36, %v1290_v46  ;;  %v1291_v52 = vadd.f32 %v4908_v12, %v1231_v35  ;;  %v1232_v31 = vadd.f32 %v1179_v49, %v998_v44  ;;  %1828 = vmatpush1.bf16.msra.mxu0 %v3842_v32  ;;  %v3874_v36 = vld [vmem:[%s6060_s5 + $0x20] ss:$8 sps:$4 sm:$0xff]   ;;  %v3882_v46 = vld [vmem:[%s6060_s5 + $0x14] ss:$8 sps:$4 sm:$0xff]   ;;  %v3880_v35 = vld [vmem:[%s6060_s5 + $0x10] ss:$8 sps:$4 sm:$0xff]  }
 0x1e5   :  { %v1181_v48 = vpop.f32.mrf.mxu0  ;;  %v3879_v44 = vld [vmem:[%s6060_s5 + $0x7c] ss:$8 sps:$4 sm:$0xff]  }
 0x1e6   :  { %v1317_v61 = vmax.f32 %v1289_v1, %v1291_v52  ;;  %v1233_v16 = vadd.f32 %v1181_v48, %v999_v34  ;;  %v1292_v55 = vadd.f32 %v4903_v7, %v1232_v31  ;;  %v3885_v49 = vld [vmem:[%s6060_s5 + $0x4] ss:$8 sps:$4 sm:$0xff]   ;;  %v3599_v1 = vcombine.high %v3583_v14, %v3583_v14 }
 0x1e7   :  { %v1183_v43 = vpop.f32.mrf.mxu0 }
 0x1e8   :  { %v1234_v11 = vadd.f32 %v1183_v43, %v1000_v4  ;;  %3462 = vmatprep.mubr.msk.f32.mxu1 %vm1350_vm2, %v1317_v61  ;;  %v1293_v45 = vadd.f32 %v4908_v12, %v1233_v16 }
 0x1e9   :  { %v1185_v0 = vpop.f32.mrf.mxu0  ;;  %1502 = vmatmul.mubr.f32.gmra.mxu1 %v5275_v27 }
 0x1ea   :  { %v1294_v6 = vadd.f32 %v4903_v7, %v1234_v11  ;;  %v1235_v39 = vadd.f32 %v1185_v0, %v1001_v18  ;;  %v3845_v7 = vld [vmem:[%s6060_s5 + $0xc8] ss:$8 sps:$4 sm:$0xff]  }
 0x1ec   :  { %v1318_v30 = vmax.f32 %v1292_v55, %v1294_v6  ;;  %v1295_v23 = vadd.f32 %v4908_v12, %v1235_v39  ;;  %v3847_v12 = vld [vmem:[%s6060_s5 + $0xcc] ss:$8 sps:$4 sm:$0xff]  }
 0x1ed   :  { %1829 = vmatprep.subr.bf16.mxu0 %v3847_v12 }
 0x1ee   :  { %v1319_v41 = vmax.f32 %v1293_v45, %v1295_v23  ;;  %1830 = vmatpush1.bf16.msra.mxu0 %v3845_v7 }
 0x1f0   :  { %3463 = vmatprep.mubr.msk.f32.mxu1 %vm1350_vm2, %v1319_v41 }
 0x1f1   :  { %1507 = vmatmul.mubr.f32.gmra.mxu1 %v1318_v30 }
 0x1f2   :  { %3464 = vmatprep.mubr.msk.f32.mxu1 %vm1350_vm2, %v4929_v20  ;;  %v3850_v20 = vld [vmem:[%s6060_s5 + $0xbc] ss:$8 sps:$4 sm:$0xff]  }
 0x1f3   :  { %1831 = vmatprep.subr.bf16.mxu0 %v3850_v20  ;;  %v3598_v20 = vcombine.low %v3583_v14, %v3583_v14  ;;  %v3904_v14 = vld [vmem:[%s6060_s5 + $0x1ac] ss:$8 sps:$4 sm:$0xff]  }
 0x1f5   :  { %1607 = vmatmul.mubr.f32.vlgmr.msra.gmra.mxu1 %v4920_v42  ;;  %v3848_v42 = vld [vmem:[%s6060_s5 + $0xb8] ss:$8 sps:$4 sm:$0xff]  }
 0x1f6   :  { %3465 = vmatprep.mubr.msk.f32.mxu1 %vm1350_vm2, %v4968_v37  ;;  %1832 = vmatpush1.bf16.msra.mxu0 %v3848_v42  ;;  %v3853_v37 = vld [vmem:[%s6060_s5 + $0xac] ss:$8 sps:$4 sm:$0xff]  }
 0x1f7   :  { %1833 = vmatprep.subr.bf16.mxu0 %v3853_v37 }
 0x1f9   :  { %1612 = vmatmul.mubr.f32.gmra.mxu1 %v4956_v62  ;;  %v3851_v62 = vld [vmem:[%s6060_s5 + $0xa8] ss:$8 sps:$4 sm:$0xff]  }
 0x1fa   :  { %3466 = vmatprep.mubr.msk.f32.mxu1 %vm1350_vm2, %v5009_v9  ;;  %1834 = vmatpush1.bf16.msra.mxu0 %v3851_v62  ;;  %v3856_v9 = vld [vmem:[%s6060_s5 + $0x9c] ss:$8 sps:$4 sm:$0xff]  }
 0x1fb   :  { %1835 = vmatprep.subr.bf16.mxu0 %v3856_v9 }
 0x1fd   :  { %1617 = vmatmul.mubr.f32.gmra.mxu1 %v4997_v51  ;;  %v3854_v51 = vld [vmem:[%s6060_s5 + $0x98] ss:$8 sps:$4 sm:$0xff]  }
 0x1fe   :  { %3467 = vmatprep.mubr.msk.f32.mxu1 %vm1350_vm2, %v5050_v29  ;;  %1836 = vmatpush1.bf16.msra.mxu0 %v3854_v51 }
 0x201   :  { %1622 = vmatmul.mubr.f32.gmra.mxu1 %v5038_v47  ;;  %v1709_v47 = vld [vmem:[%s6060_s5 + $0x70] sm:$0xff] }
 0x202   :  { %3468 = vmatprep.mubr.msk.f32.mxu1 %vm1350_vm2, %v5091_v50  ;;  %v3527_v29 = vcombine.high %v1709_v47, %v1709_v47 }
 0x204   :  { %3528 = vmatprep.subr.msk.bf16.mxu1 %vm1818_vm3, %v3527_v29 }
 0x205   :  { %1627 = vmatmul.mubr.f32.gmra.mxu1 %v5079_v38  ;;  %v3526_v38 = vcombine.low %v1709_v47, %v1709_v47 }
 0x206   :  { %3469 = vmatprep.mubr.msk.f32.mxu1 %vm1350_vm2, %v5132_v57  ;;  %v6177_v57 = vmov 0  }
 0x207   :  { %v1986_v50 = vsel %vm1818_vm3, %v3526_v38, 0  ;;  %v2350_v38 = vsel %vm1818_vm3, %v3598_v20, 0 }
 0x208   :  { %1992 = vmatpush1.bf16.msra.mxu1 %v1986_v50  ;;  %v3891_v50 = vld [vmem:[%s6060_s5 + $0x1cc] ss:$8 sps:$4 sm:$0xff]  }
 0x209   :  { %1632 = vmatmul.mubr.f32.gmra.mxu1 %v5120_v2  ;;  %v3861_v2 = vld [vmem:[%s6060_s5 + $0x64] ss:$8 sps:$4 sm:$0xff]  }
 0x20a   :  { %3470 = vmatprep.mubr.msk.f32.mxu1 %vm1350_vm2, %v5173_v8  ;;  %v3864_v8 = vld [vmem:[%s6060_s5 + $0x54] ss:$8 sps:$4 sm:$0xff]   ;;  %1993 = vmatprep.subr.bf16.mxu1 %v3861_v2 }
 0x20d   :  { %1637 = vmatmul.mubr.f32.gmra.mxu1 %v5161_v15  ;;  %v3859_v15 = vld [vmem:[%s6060_s5 + $0x60] ss:$8 sps:$4 sm:$0xff]  }
 0x20e   :  { %3471 = vmatprep.mubr.msk.f32.mxu1 %vm1350_vm2, %v5213_v13  ;;  %1994 = vmatpush1.bf16.msra.mxu1 %v3859_v15  ;;  %v3870_v13 = vld [vmem:[%s6060_s5 + $0x44] ss:$8 sps:$4 sm:$0xff]  }
 0x20f   :  { %1995 = vmatprep.subr.bf16.mxu1 %v3864_v8 }
 0x211   :  { %1642 = vmatmul.mubr.f32.gmra.mxu1 %v5204_v28  ;;  %v3862_v28 = vld [vmem:[%s6060_s5 + $0x50] ss:$8 sps:$4 sm:$0xff]  }
 0x212   :  { %3472 = vmatprep.mubr.msk.f32.mxu1 %vm1350_vm2, %v5244_v19  ;;  %1996 = vmatpush1.bf16.msra.mxu1 %v3862_v28  ;;  %v3867_v19 = vld [vmem:[%s6060_s5 + $0x8c] ss:$8 sps:$4 sm:$0xff]  }
 0x213   :  { %1997 = vmatprep.subr.bf16.mxu1 %v3870_v13  ;;  %1837 = vmatprep.subr.bf16.mxu0 %v3867_v19  ;;  %v3889_v13 = vld [vmem:[%s6060_s5 + $0x1c8] ss:$8 sps:$4 sm:$0xff]  }
 0x215   :  { %1647 = vmatmul.mubr.f32.gmra.mxu1 %v5238_v21  ;;  %v3865_v21 = vld [vmem:[%s6060_s5 + $0x88] ss:$8 sps:$4 sm:$0xff]  }
 0x216   :  { %3473 = vmatprep.mubr.msk.f32.mxu1 %vm1350_vm2, %v5263_v59  ;;  %v3873_v59 = vld [vmem:[%s6060_s5 + $0x34] ss:$8 sps:$4 sm:$0xff]   ;;  %1838 = vmatpush1.bf16.msra.mxu0 %v3865_v21 }
 0x217   :  { %1839 = vmatprep.subr.bf16.mxu0 %v3879_v44 }
 0x219   :  { %1652 = vmatmul.mubr.f32.gmra.mxu1 %v5258_v25  ;;  %v3868_v25 = vld [vmem:[%s6060_s5 + $0x40] ss:$8 sps:$4 sm:$0xff]  }
 0x21a   :  { %3474 = vmatprep.mubr.msk.f32.mxu1 %vm1350_vm2, %v1317_v61  ;;  %1998 = vmatpush1.bf16.msra.mxu1 %v3868_v25 }
 0x21b   :  { %1999 = vmatprep.subr.bf16.mxu1 %v3873_v59  ;;  %1840 = vmatpush1.bf16.msra.mxu0 %v3877_v10  ;;  %v3895_v59 = vld [vmem:[%s6060_s5 + $0x154] ss:$8 sps:$4 sm:$0xff]   ;;  %v3896_v10 = vld [vmem:[%s6060_s5 + $0x1b8] ss:$8 sps:$4 sm:$0xff]  }
 0x21d   :  { %1657 = vmatmul.mubr.f32.gmra.mxu1 %v5275_v27  ;;  %v3547_v27 = vld [vmem:[%s6060_s5 + $0x160] sm:$0xff] }
 0x21e   :  { %3475 = vmatprep.mubr.msk.f32.mxu1 %vm1350_vm2, %v1319_v41  ;;  %2000 = vmatpush1.bf16.msra.mxu1 %v3871_v33  ;;  %v3563_v52 = vcombine.high %v3547_v27, %v3547_v27  ;;  %v3562_v2 = vcombine.low %v3547_v27, %v3547_v27  ;;  %v3898_v33 = vld [vmem:[%s6060_s5 + $0x1bc] ss:$8 sps:$4 sm:$0xff]  }
 0x21f   :  { %2001 = vmatprep.subr.bf16.mxu1 %v3876_v3 }
 0x220   :  { %3564 = vmatprep.subr.msk.bf16.mxu0 %vm1818_vm3, %v3563_v52  ;;  %v2160_v25 = vsel %vm1818_vm3, %v3562_v2, 0 }
 0x221   :  { %1662 = vmatmul.mubr.f32.gmra.mxu1 %v1318_v30 }
 0x222   :  { %2023 = vmatprep.mubr.bf16.mxu1 %v6177_v57  ;;  %2002 = vmatpush1.bf16.msra.mxu1 %v3874_v36 }
 0x223   :  { %2003 = vmatprep.subr.bf16.mxu1 %v3882_v46 }
 0x226   :  { %2004 = vmatpush1.bf16.msra.mxu1 %v3880_v35  ;;  %v3893_v35 = vld [vmem:[%s6060_s5 + $0x150] ss:$8 sps:$4 sm:$0xff]  }
 0x227   :  { %2005 = vmatprep.subr.bf16.mxu1 %v3885_v49 }
 0x22a   :  { %2006 = vmatpush1.bf16.msra.mxu1 %v3883_v53  ;;  %v3901_v53 = vld [vmem:[%s6060_s5 + $0x144] ss:$8 sps:$4 sm:$0xff]  }
 0x22b   :  { %3600 = vmatprep.subr.msk.bf16.mxu1 %vm1818_vm3, %v3599_v1 }
 0x259   :  { %v1453_v56 = vpop.f32.mrf.mxu1 }
 0x25b   :  { %v1455_v17 = vpop.f32.mrf.mxu1 }
 0x25c   :  { %v3902_v17 = vld [vmem:[%s6060_s5 + $0x1a8] ss:$8 sps:$4 sm:$0xff]  }
 0x261   :  { %v1458_v34 = vpop.f32.mrf.mxu1 }
 0x263   :  { %v1460_v60 = vpop.f32.mrf.mxu1 }
 0x269   :  { %v1463_v48 = vpop.f32.mrf.mxu1 }
 0x26b   :  { %v1465_v40 = vpop.f32.mrf.mxu1 }
 0x26c   :  { %v3910_v40 = vld [vmem:[%s6060_s5 + $0x19c] ss:$8 sps:$4 sm:$0xff]  }
 0x271   :  { %v1468_v22 = vpop.f32.mrf.mxu1 }
 0x273   :  { %v1470_v26 = vpop.f32.mrf.mxu1 }
 0x279   :  { %v1473_v4 = vpop.f32.mrf.mxu1 }
 0x27b   :  { %v1475_v61 = vpop.f32.mrf.mxu1 }
 0x27c   :  { %v3905_v61 = vld [vmem:[%s6060_s5 + $0x130] ss:$8 sps:$4 sm:$0xff]  }
 0x281   :  { %v5423_v31 = vpop.f32.mrf.mxu1 }
 0x283   :  { %v1480_v43 = vpop.f32.mrf.mxu1 }
 0x289   :  { %v5425_v63 = vpop.f32.mrf.mxu1 }
 0x28b   :  { %v1485_v18 = vpop.f32.mrf.mxu1 }
 0x291   :  { %v5427_v16 = vpop.f32.mrf.mxu1 }
 0x293   :  { %v1490_v11 = vpop.f32.mrf.mxu1 }
 0x294   :  { %v3913_v11 = vld [vmem:[%s6060_s5 + $0x124] ss:$8 sps:$4 sm:$0xff]  }
 0x299   :  { %v5429_v0 = vpop.f32.mrf.mxu1 }
 0x29b   :  { %v1495_v55 = vpop.f32.mrf.mxu1 }
 0x29c   :  { %v3916_v55 = vld [vmem:[%s6060_s5 + $0x18c] ss:$8 sps:$4 sm:$0xff]  }
 0x2a1   :  { %v5431_v6 = vpop.f32.mrf.mxu1 }
 0x2a3   :  { %v1500_v39 = vpop.f32.mrf.mxu1 }
 0x2a9   :  { %v5433_v32 = vpop.f32.mrf.mxu1 }
 0x2ab   :  { %v1505_v58 = vpop.f32.mrf.mxu1 }
 0x2b1   :  { %v5435_v45 = vpop.f32.mrf.mxu1 }
 0x2b3   :  { %v1510_v30 = vpop.f32.mrf.mxu1 }
 0x2b5   :  { %v1608_v23 = vpop.f32.mrf.mxu1 }
 0x2b6   :  { %v1667_v7 = vmax.f32 %v1453_v56, %v1608_v23  ;;  %v3899_v56 = vld [vmem:[%s6060_s5 + $0x140] ss:$8 sps:$4 sm:$0xff]  }
 0x2b7   :  { %v1610_v41 = vpop.f32.mrf.mxu1  ;;  %v3914_v23 = vld [vmem:[%s6060_s5 + $0x188] ss:$8 sps:$4 sm:$0xff]  }
 0x2b8   :  { %v1679_v37 = vmax.f32 %v1667_v7, 0.0 }
 0x2b9   :  { %v1613_v12 = vpop.f32.mrf.mxu1 }
 0x2ba   :  { %v1668_v42 = vmax.f32 %v1458_v34, %v1613_v12  ;;  %v3919_v12 = vld [vmem:[%s6060_s5 + $0x114] ss:$8 sps:$4 sm:$0xff]  }
 0x2bb   :  { %v1615_v62 = vpop.f32.mrf.mxu1 }
 0x2bc   :  { %v1680_v51 = vmax.f32 %v1668_v42, 0.0  ;;  %v3922_v42 = vld [vmem:[%s6060_s5 + $0x17c] ss:$8 sps:$4 sm:$0xff]  }
 0x2bd   :  { %v1618_v9 = vpop.f32.mrf.mxu1 }
 0x2be   :  { %v1691_v47 = vpack.c.bf16 %v1680_v51, %v1679_v37  ;;  %v1669_v29 = vmax.f32 %v1463_v48, %v1618_v9  ;;  %v3907_v48 = vld [vmem:[%s6060_s5 + $0x134] ss:$8 sps:$4 sm:$0xff]  }
 0x2bf   :  { %v1620_v15 = vpop.f32.mrf.mxu1 }
 0x2c0   :  { %v1681_v8 = vmax.f32 %v1669_v29, 0.0  ;;  %3529 = vmatmul.mubr.msk.bf16.vlgmr.msra.gmra.mxu1 %vm1805_vm4, %v1691_v47  ;;  %v3925_v29 = vld [vmem:[%s6060_s5 + $0x104] ss:$8 sps:$4 sm:$0xff]  }
 0x2c1   :  { %v1623_v28 = vpop.f32.mrf.mxu1  ;;  %2356 = vmatpush1.bf16.msra.mxu1 %v2350_v38  ;;  %2033 = vmatprep.mubr.bf16.mxu1 %v6177_v57  ;;  %v3928_v38 = vld [vmem:[%s6060_s5 + $0x16c] ss:$8 sps:$4 sm:$0xff]  }
 0x2c2   :  { %v1710_v21 = vpack.c.bf16 %v1681_v8, %v1680_v51  ;;  %v1670_v19 = vmax.f32 %v1468_v22, %v1623_v28  ;;  %2357 = vmatprep.subr.bf16.mxu1 %v3891_v50  ;;  %v3920_v51 = vld [vmem:[%s6060_s5 + $0x178] ss:$8 sps:$4 sm:$0xff]  }
 0x2c3   :  { %v1625_v3 = vpop.f32.mrf.mxu1 }
 0x2c4   :  { %v1682_v36 = vmax.f32 %v1670_v19, 0.0  ;;  %3508 = vmatmul.mubr.msk.bf16.vlgmr.msra.gmra.mxu0 %vm1805_vm4, %v1710_v21  ;;  %v3619_v19 = vld [vmem:[%s6060_s5 + $0x250] sm:$0xff] }
 0x2c5   :  { %v1628_v46 = vpop.f32.mrf.mxu1  ;;  %2166 = vmatpush1.bf16.msra.mxu0 %v2160_v25  ;;  %2358 = vmatpush1.bf16.msra.mxu1 %v3889_v13  ;;  %v3931_v13 = vld [vmem:[%s6060_s5 + $0xf4] ss:$8 sps:$4 sm:$0xff]  }
 0x2c6   :  { %v5460_v44 = vpack.c.bf16 %v1682_v36, %v1681_v8  ;;  %v1671_v49 = vmax.f32 %v1473_v4, %v1628_v46  ;;  %2167 = vmatprep.subr.bf16.mxu0 %v3895_v59  ;;  %2359 = vmatprep.subr.bf16.mxu1 %v3898_v33  ;;  %v3926_v8 = vld [vmem:[%s6060_s5 + $0x168] ss:$8 sps:$4 sm:$0xff]   ;;  %v3634_v46 = vcombine.low %v3619_v19, %v3619_v19 }
 0x2c7   :  { %v1630_v1 = vpop.f32.mrf.mxu1  ;;  %1867 = vmatprep.mubr.bf16.mxu0 %v6177_v57  ;;  %v3929_v33 = vld [vmem:[%s6060_s5 + $0xf0] ss:$8 sps:$4 sm:$0xff]  }
 0x2c8   :  { %v1683_v27 = vmax.f32 %v1671_v49, 0.0  ;;  %3530 = vmatmul.mubr.msk.bf16.gmra.mxu1 %vm1805_vm4, %v5460_v44  ;;  %v3936_v1 = vld [vmem:[%s6060_s5 + $0x244] ss:$8 sps:$4 sm:$0xff]  }
 0x2c9   :  { %v1633_v52 = vpop.f32.mrf.mxu1  ;;  %2168 = vmatpush1.bf16.msra.mxu0 %v3893_v35  ;;  %2360 = vmatpush1.bf16.msra.mxu1 %v3896_v10 }
 0x2ca   :  { %v5477_v34 = vpack.c.bf16 %v1683_v27, %v1682_v36  ;;  %v1672_v60 = vmax.f32 %v5423_v31, %v1633_v52  ;;  %2169 = vmatprep.subr.bf16.mxu0 %v3901_v53  ;;  %2361 = vmatprep.subr.bf16.mxu1 %v3904_v14  ;;  %v3908_v31 = vld [vmem:[%s6060_s5 + $0x198] ss:$8 sps:$4 sm:$0xff]   ;;  %v3635_v36 = vcombine.high %v3619_v19, %v3619_v19  ;;  %v2540_v14 = vsel %vm1818_vm3, %v3634_v46, 0  ;;  %v2789_v19 = vld [vmem:[%s6062_s8 + $0x8] sm:$0xff]  ;;  %v2806_v46 = vld [vmem:[%s6062_s8 + $0x90] sm:$0xff] }
 0x2cb   :  { %v1635_v22 = vpop.f32.mrf.mxu1  ;;  %2043 = vmatprep.mubr.bf16.mxu1 %v6177_v57 }
 0x2cc   :  { %v1684_v26 = vmax.f32 %v1672_v60, 0.0  ;;  %3509 = vmatmul.mubr.msk.bf16.gmra.mxu0 %vm1805_vm4, %v5477_v34  ;;  %v3940_v60 = vld [vmem:[%s6060_s5 + $0x220] ss:$8 sps:$4 sm:$0xff]   ;;  %v3948_v22 = vld [vmem:[%s6060_s5 + $0x204] ss:$8 sps:$4 sm:$0xff]  }
 0x2cd   :  { %v1638_v4 = vpop.f32.mrf.mxu1  ;;  %2170 = vmatpush1.bf16.msra.mxu0 %v3899_v56  ;;  %2362 = vmatpush1.bf16.msra.mxu1 %v3902_v17  ;;  %v3934_v56 = vld [vmem:[%s6060_s5 + $0x240] ss:$8 sps:$4 sm:$0xff]   ;;  %v3939_v17 = vld [vmem:[%s6060_s5 + $0x234] ss:$8 sps:$4 sm:$0xff]  }
 0x2ce   :  { %v5495_v43 = vpack.c.bf16 %v1684_v26, %v1683_v27  ;;  %v1673_v18 = vmax.f32 %v5425_v63, %v1638_v4  ;;  %2171 = vmatprep.subr.bf16.mxu0 %v3907_v48  ;;  %2363 = vmatprep.subr.bf16.mxu1 %v3910_v40  ;;  %v3911_v63 = vld [vmem:[%s6060_s5 + $0x120] ss:$8 sps:$4 sm:$0xff]   ;;  %v3945_v48 = vld [vmem:[%s6060_s5 + $0x214] ss:$8 sps:$4 sm:$0xff]   ;;  %v3943_v40 = vld [vmem:[%s6060_s5 + $0x210] ss:$8 sps:$4 sm:$0xff]  }
 0x2cf   :  { %v1640_v39 = vpop.f32.mrf.mxu1  ;;  %1877 = vmatprep.mubr.bf16.mxu0 %v6177_v57  ;;  %v3951_v4 = vld [vmem:[%s6060_s5 + $0x1f4] ss:$8 sps:$4 sm:$0xff]  }
 0x2d0   :  { %v1685_v58 = vmax.f32 %v1673_v18, 0.0  ;;  %3531 = vmatmul.mubr.msk.bf16.gmra.mxu1 %vm1805_vm4, %v5495_v43  ;;  %v3954_v18 = vld [vmem:[%s6060_s5 + $0x1e4] ss:$8 sps:$4 sm:$0xff]   ;;  %v2802_v39 = vld [vmem:[%s6062_s8 + $0x70] sm:$0xff] }
 0x2d1   :  { %v1643_v30 = vpop.f32.mrf.mxu1  ;;  %2172 = vmatpush1.bf16.msra.mxu0 %v3905_v61  ;;  %2364 = vmatpush1.bf16.msra.mxu1 %v3908_v31  ;;  %v3949_v61 = vld [vmem:[%s6060_s5 + $0x1f0] ss:$8 sps:$4 sm:$0xff]  }
 0x2d2   :  { %v5513_v41 = vpack.c.bf16 %v1685_v58, %v1684_v26  ;;  %v1674_v7 = vmax.f32 %v5427_v16, %v1643_v30  ;;  %2173 = vmatprep.subr.bf16.mxu0 %v3913_v11  ;;  %2365 = vmatprep.subr.bf16.mxu1 %v3916_v55  ;;  %v3917_v16 = vld [vmem:[%s6060_s5 + $0x110] ss:$8 sps:$4 sm:$0xff]   ;;  %v3946_v26 = vld [vmem:[%s6060_s5 + $0x200] ss:$8 sps:$4 sm:$0xff]  }
 0x2d3   :  { %v1645_v20 = vpop.f32.mrf.mxu1  ;;  %2053 = vmatprep.mubr.bf16.mxu1 %v6177_v57  ;;  %v3952_v11 = vld [vmem:[%s6060_s5 + $0x1e0] ss:$8 sps:$4 sm:$0xff]   ;;  %v2685_v55 = vld [vmem:[%s6061_s7 + $0x78] sm:$0xff] }
 0x2d4   :  { %v1686_v62 = vmax.f32 %v1674_v7, 0.0  ;;  %3510 = vmatmul.mubr.msk.bf16.gmra.mxu0 %vm1805_vm4, %v5513_v41  ;;  %v2801_v30 = vld [vmem:[%s6062_s8 + $0x68] sm:$0xff]  ;;  %v2799_v7 = vld [vmem:[%s6062_s8 + $0x58] sm:$0xff] }
 0x2d5   :  { %v1648_v37 = vpop.f32.mrf.mxu1  ;;  %2174 = vmatpush1.bf16.msra.mxu0 %v3911_v63  ;;  %2366 = vmatpush1.bf16.msra.mxu1 %v3914_v23  ;;  %v2682_v63 = vld [vmem:[%s6061_s7 + $0x60] sm:$0xff]  ;;  %v2679_v20 = vld [vmem:[%s6061_s7 + $0x48] sm:$0xff] }
 0x2d6   :  { %v5531_v9 = vpack.c.bf16 %v1686_v62, %v1685_v58  ;;  %v1675_v47 = vmax.f32 %v5429_v0, %v1648_v37  ;;  %2175 = vmatprep.subr.bf16.mxu0 %v3919_v12  ;;  %2367 = vmatprep.subr.bf16.mxu1 %v3922_v42  ;;  %v3923_v0 = vld [vmem:[%s6060_s5 + $0x100] ss:$8 sps:$4 sm:$0xff]   ;;  %v2680_v12 = vld [vmem:[%s6061_s7 + $0x50] sm:$0xff] }
 0x2d7   :  { %v1650_v50 = vpop.f32.mrf.mxu1  ;;  %1887 = vmatprep.mubr.bf16.mxu0 %v6177_v57  ;;  %v2683_v58 = vld [vmem:[%s6061_s7 + $0x68] sm:$0xff]  ;;  %v2800_v23 = vld [vmem:[%s6062_s8 + $0x60] sm:$0xff]  ;;  %v2798_v42 = vld [vmem:[%s6062_s8 + $0x50] sm:$0xff] }
 0x2d8   :  { %v5541_v2 = vmax.f32 %v1675_v47, 0.0  ;;  %3532 = vmatmul.mubr.msk.bf16.gmra.mxu1 %vm1805_vm4, %v5531_v9  ;;  %v2678_v37 = vld [vmem:[%s6061_s7 + $0x40] sm:$0xff]  ;;  %v2676_v47 = vld [vmem:[%s6061_s7 + $0x30] sm:$0xff]  ;;  %v2793_v50 = vld [vmem:[%s6062_s8 + $0x28] sm:$0xff] }
 0x2d9   :  { %v1653_v15 = vpop.f32.mrf.mxu1  ;;  %2176 = vmatpush1.bf16.msra.mxu0 %v3917_v16  ;;  %2368 = vmatpush1.bf16.msra.mxu1 %v3920_v51  ;;  %v2796_v16 = vld [vmem:[%s6062_s8 + $0x40] sm:$0xff]  ;;  %v2677_v51 = vld [vmem:[%s6061_s7 + $0x38] sm:$0xff] }
 0x2da   :  { %v1713_v28 = vpack.c.bf16 %v5541_v2, %v1686_v62  ;;  %2177 = vmatprep.subr.bf16.mxu0 %v3925_v29  ;;  %2369 = vmatprep.subr.bf16.mxu1 %v3928_v38  ;;  %v1676_v25 = vmax.f32 %v5431_v6, %v1653_v15  ;;  %v2797_v62 = vld [vmem:[%s6062_s8 + $0x48] sm:$0xff]  ;;  %v2794_v29 = vld [vmem:[%s6062_s8 + $0x30] sm:$0xff]  ;;  %v2792_v15 = vld [vmem:[%s6062_s8 + $0x20] sm:$0xff] }
 0x2db   :  { %v1655_v21 = vpop.f32.mrf.mxu1  ;;  %2387 = vmatprep.mubr.bf16.mxu1 %v6177_v57  ;;  %v2675_v38 = vld [vmem:[%s6061_s7 + $0x28] sm:$0xff] }
 0x2dc   :  { %3511 = vmatmul.mubr.msk.bf16.gmra.mxu0 %vm1805_vm4, %v1713_v28  ;;  %v1688_v6 = vmax.f32 %v1676_v25, 0.0  ;;  %v2671_v21 = vld [vmem:[%s6061_s7 + $0x8] sm:$0xff]  ;;  %v2670_v25 = vld [vmem:[%s6061_s7] sm:$0xff] }
 0x2dd   :  { %v1658_v59 = vpop.f32.mrf.mxu1  ;;  %2178 = vmatpush1.bf16.msra.mxu0 %v3923_v0  ;;  %2370 = vmatpush1.bf16.msra.mxu1 %v3926_v8  ;;  %v2673_v0 = vld [vmem:[%s6061_s7 + $0x18] sm:$0xff] }
 0x2de   :  { %v1677_v3 = vmax.f32 %v5433_v32, %v1658_v59  ;;  %2179 = vmatprep.subr.bf16.mxu0 %v3931_v13  ;;  %2197 = vmatprep.mubr.bf16.mxu0 %v6177_v57  ;;  %v2064_v31 = vpack.c.bf16 %v1688_v6, %v5541_v2  ;;  %v2674_v2 = vld [vmem:[%s6061_s7 + $0x20] sm:$0xff]  ;;  %v2791_v8 = vld [vmem:[%s6062_s8 + $0x18] sm:$0xff]  ;;  %v2790_v13 = vld [vmem:[%s6062_s8 + $0x10] sm:$0xff] }
 0x2df   :  { %v1660_v35 = vpop.f32.mrf.mxu1  ;;  %2703 = vmatprep.subr.mxu1 %v6127_v54  ;;  %v2788_v59 = vld [vmem:[%s6062_s8] sm:$0xff] }
 0x2e0   :  { %v5567_v10 = vmax.f32 %v1677_v3, 0.0  ;;  %3601 = vmatmul.mubr.msk.bf16.vlgmr.msra.gmra.mxu1 %vm1805_vm4, %v5477_v34  ;;  %v3942_v34 = vld [vmem:[%s6060_s5 + $0x224] ss:$8 sps:$4 sm:$0xff]   ;;  %v2807_v3 = vld [vmem:[%s6062_s8 + $0x98] sm:$0xff] }
 0x2e1   :  { %v1663_v49 = vpop.f32.mrf.mxu1  ;;  %2180 = vmatpush1.bf16.msra.mxu0 %v3929_v33  ;;  %2397 = vmatprep.mubr.bf16.mxu1 %v6177_v57  ;;  %v2689_v33 = vld [vmem:[%s6061_s7 + $0x98] sm:$0xff]  ;;  %v2687_v35 = vld [vmem:[%s6061_s7 + $0x88] sm:$0xff] }
 0x2e2   :  { %v2254_v32 = vpack.c.bf16 %v5567_v10, %v1688_v6  ;;  %v1678_v53 = vmax.f32 %v5435_v45, %v1663_v49  ;;  %3636 = vmatprep.subr.msk.bf16.mxu0 %vm1818_vm3, %v3635_v36  ;;  %2704 = vmatpush1.msra.mxu1 %v2685_v55  ;;  %v2688_v36 = vld [vmem:[%s6061_s7 + $0x90] sm:$0xff]  ;;  %v2805_v6 = vld [vmem:[%s6062_s8 + $0x88] sm:$0xff]  ;;  %v2804_v49 = vld [vmem:[%s6062_s8 + $0x80] sm:$0xff] }
 0x2e3   :  { %v1665_v27 = vpop.f32.mrf.mxu1  ;;  %2705 = vmatprep.subr.mxu1 %v6127_v54 }
 0x2e4   :  { %v1690_v52 = vmax.f32 %v1678_v53, 0.0  ;;  %3565 = vmatmul.mubr.msk.bf16.vlgmr.msra.gmra.mxu0 %vm1805_vm4, %v5460_v44  ;;  %v3937_v44 = vld [vmem:[%s6060_s5 + $0x230] ss:$8 sps:$4 sm:$0xff]  }
 0x2e5   :  { %2546 = vmatpush1.bf16.msra.mxu0 %v2540_v14  ;;  %2207 = vmatprep.mubr.bf16.mxu0 %v6177_v57 }
 0x2e6   :  { %v2444_v45 = vpack.c.bf16 %v1690_v52, %v5567_v10  ;;  %2547 = vmatprep.subr.bf16.mxu0 %v3936_v1  ;;  %v2686_v10 = vld [vmem:[%s6061_s7 + $0x80] sm:$0xff] }
 0x2e8   :  { %3602 = vmatmul.mubr.msk.bf16.gmra.mxu1 %vm1805_vm4, %v5513_v41  ;;  %v2681_v41 = vld [vmem:[%s6061_s7 + $0x58] sm:$0xff] }
 0x2e9   :  { %2548 = vmatpush1.bf16.msra.mxu0 %v3934_v56  ;;  %2407 = vmatprep.mubr.bf16.mxu1 %v6177_v57 }
 0x2ea   :  { %2549 = vmatprep.subr.bf16.mxu0 %v3939_v17 }
 0x2ec   :  { %3566 = vmatmul.mubr.msk.bf16.gmra.mxu0 %vm1805_vm4, %v5495_v43 }
 0x2ed   :  { %2550 = vmatpush1.bf16.msra.mxu0 %v3937_v44  ;;  %2217 = vmatprep.mubr.bf16.mxu0 %v6177_v57 }
 0x2ee   :  { %2551 = vmatprep.subr.bf16.mxu0 %v3942_v34 }
 0x2f0   :  { %3603 = vmatmul.mubr.msk.bf16.gmra.mxu1 %vm1805_vm4, %v1713_v28  ;;  %v2672_v28 = vld [vmem:[%s6061_s7 + $0x10] sm:$0xff] }
 0x2f1   :  { %2552 = vmatpush1.bf16.msra.mxu0 %v3940_v60  ;;  %2417 = vmatprep.mubr.bf16.mxu1 %v6177_v57 }
 0x2f2   :  { %2553 = vmatprep.subr.bf16.mxu0 %v3945_v48 }
 0x2f4   :  { %3567 = vmatmul.mubr.msk.bf16.gmra.mxu0 %vm1805_vm4, %v5531_v9 }
 0x2f5   :  { %2554 = vmatpush1.bf16.msra.mxu0 %v3943_v40  ;;  %2227 = vmatprep.mubr.bf16.mxu0 %v6177_v57 }
 0x2f6   :  { %2555 = vmatprep.subr.bf16.mxu0 %v3948_v22 }
 0x2f8   :  { %3604 = vmatmul.mubr.msk.bf16.gmra.mxu1 %vm1805_vm4, %v2254_v32 }
 0x2f9   :  { %2556 = vmatpush1.bf16.msra.mxu0 %v3946_v26 }
 0x2fa   :  { %2557 = vmatprep.subr.bf16.mxu0 %v3951_v4 }
 0x2fc   :  { %3568 = vmatmul.mubr.msk.bf16.gmra.mxu0 %vm1805_vm4, %v2064_v31 }
 0x2fd   :  { %2558 = vmatpush1.bf16.msra.mxu0 %v3949_v61  ;;  %2577 = vmatprep.mubr.bf16.mxu0 %v6177_v57 }
 0x2fe   :  { %2559 = vmatprep.subr.bf16.mxu0 %v3954_v18 }
 0x301   :  { %2560 = vmatpush1.bf16.msra.mxu0 %v3952_v11 }
 0x302   :  { %2808 = vmatprep.subr.mxu0 %v6127_v54 }
 0x304   :  { %3637 = vmatmul.mubr.msk.bf16.vlgmr.msra.gmra.mxu0 %vm1805_vm4, %v5495_v43  ;;  %v2803_v43 = vld [vmem:[%s6062_s8 + $0x78] sm:$0xff] }
 0x305   :  { %2587 = vmatprep.mubr.bf16.mxu0 %v6177_v57  ;;  %2809 = vmatpush1.msra.mxu0 %v2803_v43 }
 0x306   :  { %2810 = vmatprep.subr.mxu0 %v6127_v54 }
 0x307   :  { %2811 = vmatpush1.msra.mxu0 %v2802_v39 }
 0x308   :  { %2812 = vmatprep.subr.mxu0 %v6127_v54 }
 0x309   :  { %2813 = vmatpush1.msra.mxu0 %v2801_v30 }
 0x30a   :  { %2814 = vmatprep.subr.mxu0 %v6127_v54 }
 0x30b   :  { %2815 = vmatpush1.msra.mxu0 %v2800_v23 }
 0x30c   :  { %3638 = vmatmul.mubr.msk.bf16.gmra.mxu0 %vm1805_vm4, %v5531_v9  ;;  %2816 = vmatprep.subr.mxu0 %v6127_v54  ;;  %v2795_v9 = vld [vmem:[%s6062_s8 + $0x38] sm:$0xff] }
 0x30d   :  { %2597 = vmatprep.mubr.bf16.mxu0 %v6177_v57  ;;  %2817 = vmatpush1.msra.mxu0 %v2799_v7 }
 0x30e   :  { %2818 = vmatprep.subr.mxu0 %v6127_v54 }
 0x30f   :  { %2819 = vmatpush1.msra.mxu0 %v2798_v42 }
 0x310   :  { %2820 = vmatprep.subr.mxu0 %v6127_v54 }
 0x311   :  { %2821 = vmatpush1.msra.mxu0 %v2797_v62 }
 0x312   :  { %2822 = vmatprep.subr.mxu0 %v6127_v54 }
 0x313   :  { %2823 = vmatpush1.msra.mxu0 %v2796_v16 }
 0x314   :  { %3639 = vmatmul.mubr.msk.bf16.gmra.mxu0 %vm1805_vm4, %v2064_v31  ;;  %2824 = vmatprep.subr.mxu0 %v6127_v54 }
 0x315   :  { %2607 = vmatprep.mubr.bf16.mxu0 %v6177_v57  ;;  %v2684_v57 = vld [vmem:[%s6061_s7 + $0x70] sm:$0xff]  ;;  %2825 = vmatpush1.msra.mxu0 %v2795_v9 }
 0x316   :  { %2706 = vmatpush1.msra.mxu1 %v2684_v57  ;;  %2826 = vmatprep.subr.mxu0 %v6127_v54 }
 0x317   :  { %2707 = vmatprep.subr.mxu1 %v6127_v54  ;;  %2827 = vmatpush1.msra.mxu0 %v2794_v29 }
 0x318   :  { %2708 = vmatpush1.msra.mxu1 %v2683_v58  ;;  %2828 = vmatprep.subr.mxu0 %v6127_v54 }
 0x319   :  { %2709 = vmatprep.subr.mxu1 %v6127_v54  ;;  %2829 = vmatpush1.msra.mxu0 %v2793_v50 }
 0x31a   :  { %2710 = vmatpush1.msra.mxu1 %v2682_v63  ;;  %2830 = vmatprep.subr.mxu0 %v6127_v54 }
 0x31b   :  { %2711 = vmatprep.subr.mxu1 %v6127_v54  ;;  %2831 = vmatpush1.msra.mxu0 %v2792_v15 }
 0x31c   :  { %3640 = vmatmul.mubr.msk.bf16.gmra.mxu0 %vm1805_vm4, %v2444_v45  ;;  %2712 = vmatpush1.msra.mxu1 %v2681_v41 }
 0x31d   :  { %2713 = vmatprep.subr.mxu1 %v6127_v54  ;;  %2832 = vmatprep.subr.mxu0 %v6127_v54 }
 0x31e   :  { %2714 = vmatpush1.msra.mxu1 %v2680_v12  ;;  %2833 = vmatpush1.msra.mxu0 %v2791_v8 }
 0x31f   :  { %2715 = vmatprep.subr.mxu1 %v6127_v54  ;;  %2834 = vmatprep.subr.mxu0 %v6127_v54 }
 0x320   :  { %2716 = vmatpush1.msra.mxu1 %v2679_v20  ;;  %2835 = vmatpush1.msra.mxu0 %v2790_v13 }
 0x321   :  { %2717 = vmatprep.subr.mxu1 %v6127_v54  ;;  %2836 = vmatprep.subr.mxu0 %v6127_v54 }
 0x322   :  { %2718 = vmatpush1.msra.mxu1 %v2678_v37  ;;  %2837 = vmatpush1.msra.mxu0 %v2789_v19 }
 0x323   :  { %2719 = vmatprep.subr.mxu1 %v6127_v54  ;;  %2838 = vmatprep.subr.mxu0 %v6127_v54 }
 0x324   :  { %2720 = vmatpush1.msra.mxu1 %v2677_v51  ;;  %2839 = vmatpush1.msra.mxu0 %v2788_v59 }
 0x325   :  { %2721 = vmatprep.subr.mxu1 %v6127_v54  ;;  %2864 = vmatprep.subr.mxu0 %v6127_v54 }
 0x326   :  { %2722 = vmatpush1.msra.mxu1 %v2676_v47  ;;  %2865 = vmatpush2.msra.mxu0 %v2807_v3 }
 0x327   :  { %2723 = vmatprep.subr.mxu1 %v6127_v54  ;;  %2866 = vmatprep.subr.mxu0 %v6127_v54 }
 0x328   :  { %2724 = vmatpush1.msra.mxu1 %v2675_v38  ;;  %2867 = vmatpush2.msra.mxu0 %v2806_v46 }
 0x329   :  { %2725 = vmatprep.subr.mxu1 %v6127_v54  ;;  %2868 = vmatprep.subr.mxu0 %v6127_v54 }
 0x32a   :  { %2726 = vmatpush1.msra.mxu1 %v2674_v2  ;;  %2869 = vmatpush2.msra.mxu0 %v2805_v6 }
 0x32b   :  { %2727 = vmatprep.subr.mxu1 %v6127_v54  ;;  %2870 = vmatprep.subr.mxu0 %v6127_v54 }
 0x32c   :  { %2728 = vmatpush1.msra.mxu1 %v2673_v0  ;;  %2871 = vmatpush2.msra.mxu0 %v2804_v49 }
 0x32d   :  { %2729 = vmatprep.subr.mxu1 %v6127_v54  ;;  %3753 = vmatprep.subr.bf16.mxu0 %v6127_v54 }
 0x32e   :  { %2730 = vmatpush1.msra.mxu1 %v2672_v28 }
 0x32f   :  { %2731 = vmatprep.subr.mxu1 %v6127_v54 }
 0x330   :  { %2732 = vmatpush1.msra.mxu1 %v2671_v21 }
 0x331   :  { %2733 = vmatprep.subr.mxu1 %v6127_v54 }
 0x332   :  { %2734 = vmatpush1.msra.mxu1 %v2670_v25 }
 0x333   :  { %2759 = vmatprep.subr.mxu1 %v6127_v54 }
 0x334   :  { %2760 = vmatpush2.msra.mxu1 %v2689_v33 }
 0x335   :  { %2761 = vmatprep.subr.mxu1 %v6127_v54 }
 0x336   :  { %2762 = vmatpush2.msra.mxu1 %v2688_v36 }
 0x337   :  { %2763 = vmatprep.subr.mxu1 %v6127_v54 }
 0x338   :  { %2764 = vmatpush2.msra.mxu1 %v2687_v35 }
 0x339   :  { %2765 = vmatprep.subr.mxu1 %v6127_v54 }
 0x33a   :  { %2766 = vmatpush2.msra.mxu1 %v2686_v10 }
 0x33b   :  { %3739 = vmatprep.subr.bf16.mxu1 %v6127_v54 }
 0x380   :  { %v2025_v32 = vpop.f32.mrf.mxu1 }
 0x382   :  { %v2027_v53 = vpop.f32.mrf.mxu1 }
 0x384   :  { %v1859_v14 = vpop.f32.mrf.mxu0  ;;  %v2029_v1 = vpop.f32.mrf.mxu1 }
 0x385   :  { %v2026_v35 = vadd.f32 %v2025_v32, %v1859_v14  ;;  %v6186_v14 = vsub.s32 1, %v4876_v24 }
 0x386   :  { %v1861_v27 = vpop.f32.mrf.mxu0  ;;  %v2031_v52 = vpop.f32.mrf.mxu1 }
 0x387   :  { %v2028_v36 = vadd.f32 %v2027_v53, %v1861_v27 }
 0x388   :  { %v1863_v56 = vpop.f32.mrf.mxu0  ;;  %v5807_v45 = vpop.f32.mrf.mxu1 }
 0x389   :  { %v2030_v46 = vadd.f32 %v2029_v1, %v1863_v56 }
 0x38a   :  { %v1865_v17 = vpop.f32.mrf.mxu0  ;;  %v2037_v44 = vpop.f32.mrf.mxu1 }
 0x38b   :  { %v2032_v10 = vadd.f32 %v2031_v52, %v1865_v17 }
 0x38c   :  { %v5809_v34 = vpop.f32.mrf.mxu0  ;;  %v5811_v60 = vpop.f32.mrf.mxu1 }
 0x38e   :  { %v1871_v48 = vpop.f32.mrf.mxu0  ;;  %v5813_v40 = vpop.f32.mrf.mxu1 }
 0x38f   :  { %v2038_v53 = vadd.f32 %v2037_v44, %v1871_v48 }
 0x390   :  { %v1873_v22 = vpop.f32.mrf.mxu0  ;;  %v5815_v26 = vpop.f32.mrf.mxu1 }
 0x391   :  { %v2040_v56 = vadd.f32 %v5811_v60, %v1873_v22 }
 0x392   :  { %v5817_v4 = vpop.f32.mrf.mxu0  ;;  %v5819_v61 = vpop.f32.mrf.mxu1 }
 0x394   :  { %v5821_v31 = vpop.f32.mrf.mxu0  ;;  %v5823_v18 = vpop.f32.mrf.mxu1 }
 0x396   :  { %v5825_v11 = vpop.f32.mrf.mxu0  ;;  %v5827_v55 = vpop.f32.mrf.mxu1 }
 0x398   :  { %v5829_v43 = vpop.f32.mrf.mxu0  ;;  %v5831_v57 = vpop.f32.mrf.mxu1 }
 0x399   :  { %6178 = vst [vmem:[#allocation22_spill] sm:$0xff] %v5831_v57 }
 0x39a   :  { %v5833_v39 = vpop.f32.mrf.mxu0  ;;  %v5835_v58 = vpop.f32.mrf.mxu1 }
 0x39c   :  { %v5837_v30 = vpop.f32.mrf.mxu0  ;;  %v5839_v63 = vpop.f32.mrf.mxu1 }
 0x39d   :  { %6179 = vst [vmem:[#allocation23_spill] sm:$0xff] %v5837_v30  ;;  %6180 = vst [vmem:[#allocation2_spill] sm:$0xff] %v5839_v63 }
 0x39e   :  { %v5841_v23 = vpop.f32.mrf.mxu0  ;;  %v5843_v41 = vpop.f32.mrf.mxu1 }
 0x39f   :  { %6181 = vst [vmem:[#allocation3_spill] sm:$0xff] %v5843_v41 }
 0x3a0   :  { %v5845_v7 = vpop.f32.mrf.mxu0  ;;  %v2389_v42 = vpop.f32.mrf.mxu1 }
 0x3a2   :  { %v5847_v12 = vpop.f32.mrf.mxu0  ;;  %v2391_v37 = vpop.f32.mrf.mxu1 }
 0x3a3   :  { %6182 = vst [vmem:[#allocation24_spill] sm:$0xff] %v5847_v12 }
 0x3a4   :  { %v2199_v20 = vpop.f32.mrf.mxu0  ;;  %v2393_v9 = vpop.f32.mrf.mxu1 }
 0x3a5   :  { %v2238_v41 = vadd.f32 %v2199_v20, %v2026_v35 }
 0x3a6   :  { %v2201_v62 = vpop.f32.mrf.mxu0  ;;  %v2395_v38 = vpop.f32.mrf.mxu1 }
 0x3a7   :  { %v2239_v49 = vadd.f32 %v2201_v62, %v2028_v36  ;;  %v2428_v32 = vadd.f32 %v2389_v42, %v2238_v41  ;;  %v2042_v41 = vadd.f32 %v5813_v40, %v5817_v4  ;;  %v3955_v4 = vld [vmem:[%s6063_s9 + $0x20] sm:$0xff]  }
 0x3a8   :  { %v2203_v16 = vpop.f32.mrf.mxu0  ;;  %v5849_v15 = vpop.f32.mrf.mxu1 }
 0x3a9   :  { %v2240_v5 = vadd.f32 %v2203_v16, %v2030_v46  ;;  %v2036_v16 = vadd.f32 %v5807_v45, %v5809_v34 }
 0x3aa   :  { %v2205_v51 = vpop.f32.mrf.mxu0  ;;  %v2401_v28 = vpop.f32.mrf.mxu1 }
 0x3ab   :  { %v2241_v30 = vadd.f32 %v2205_v51, %v2032_v10  ;;  %v2046_v10 = vadd.f32 %v5815_v26, %v5821_v31  ;;  %v3959_v26 = vld [vmem:[%s6063_s9 + $0x40] sm:$0xff]  }
 0x3ac   :  { %v2209_v47 = vpop.f32.mrf.mxu0  ;;  %v2403_v19 = vpop.f32.mrf.mxu1 }
 0x3ad   :  { %v2431_v62 = vadd.f32 %v2395_v38, %v2241_v30  ;;  %v2242_v36 = vadd.f32 %v2209_v47, %v2036_v16  ;;  %v3957_v47 = vld [vmem:[%s6063_s9 + $0x48] sm:$0xff]  }
 0x3ae   :  { %v2211_v29 = vpop.f32.mrf.mxu0  ;;  %v2405_v33 = vpop.f32.mrf.mxu1 }
 0x3af   :  { %v2243_v42 = vadd.f32 %v2211_v29, %v2038_v53  ;;  %v2048_v29 = vadd.f32 %v5819_v61, %v5825_v11  ;;  %v2052_v61 = vadd.f32 %v5827_v55, %v5833_v39 }
 0x3b0   :  { %v2213_v50 = vpop.f32.mrf.mxu0  ;;  %v5867_v12 = vpop.f32.mrf.mxu1 }
 0x3b2   :  { %v2215_v2 = vpop.f32.mrf.mxu0  ;;  %v5872_v1 = vpop.f32.mrf.mxu1 }
 0x3b4   :  { %v5851_v0 = vpop.f32.mrf.mxu0  ;;  %v2413_v60 = vpop.f32.mrf.mxu1 }
 0x3b5   :  { %v2246_v31 = vadd.f32 %v5851_v0, %v2046_v10 }
 0x3b6   :  { %v5853_v8 = vpop.f32.mrf.mxu0 }
 0x3b8   :  { %v5855_v13 = vpop.f32.mrf.mxu0 }
 0x3ba   :  { %v5857_v21 = vpop.f32.mrf.mxu0 }
 0x3bc   :  { %v5859_v25 = vpop.f32.mrf.mxu0 }
 0x3bd   :  { %6183 = vst [vmem:[#allocation25_spill] sm:$0xff] %v5859_v25  ;;  %v2634_v25 = vld [vmem:[%s6064_s6] sm:$0x3] }
 0x3be   :  { %v5861_v59 = vpop.f32.mrf.mxu0  ;;  %v5876_v27 = vrot.slane %v2634_v25, %v6186_v14  ;;  %v2058_v14 = vadd.f32 %v5835_v58, %v5841_v23  ;;  %v2436_v58 = vadd.f32 %v5867_v12, %v2246_v31  ;;  %v6191_v12 = vld [vmem:[#allocation24_spill] sm:$0xff] }
 0x3bf   :  { %6184 = vst [vmem:[#allocation4_spill] sm:$0xff] %v5861_v59  ;;  %v2429_v59 = vadd.f32 %v2391_v37, %v2239_v49  ;;  %v2244_v37 = vadd.f32 %v2213_v50, %v2040_v56  ;;  %v2050_v50 = vadd.f32 %v5823_v18, %v5829_v43  ;;  %v2247_v43 = vadd.f32 %v5853_v8, %v2048_v29 }
 0x3c0   :  { %v5863_v3 = vpop.f32.mrf.mxu0  ;;  %v2249_v8 = vadd.f32 %v5857_v21, %v2052_v61  ;;  %v6188_v21 = vld [vmem:[#allocation2_spill] sm:$0xff] }
 0x3c1   :  { %6185 = vst [vmem:[#allocation5_spill] sm:$0xff] %v5863_v3  ;;  %v2430_v3 = vadd.f32 %v2393_v9, %v2240_v5  ;;  %v6187_v5 = vsub.s32 0, %v4876_v24  ;;  %v2434_v40 = vadd.f32 %v2403_v19, %v2244_v37  ;;  %v2060_v16 = vadd.f32 %v6188_v21, %v5845_v7  ;;  %v6190_v37 = vld [vmem:[#allocation22_spill] sm:$0xff] }
 0x3c2   :  { %v5865_v6 = vpop.f32.mrf.mxu0 }
 0x3c3   :  { %v5883_v44 = vrot.slane %v2634_v25, %v6187_v5  ;;  %v2433_v25 = vadd.f32 %v2401_v28, %v2243_v42  ;;  %v6189_v42 = vld [vmem:[#allocation23_spill] sm:$0xff] }
 0x3c4   :  { %v2579_v57 = vpop.f32.mrf.mxu0 }
 0x3c5   :  { %v2618_v51 = vadd.f32 %v2579_v57, %v2428_v32 }
 0x3c6   :  { %v2581_v63 = vpop.f32.mrf.mxu0 }
 0x3c7   :  { %v2619_v17 = vadd.f32 %v2581_v63, %v2429_v59  ;;  %v2245_v63 = vadd.f32 %v2215_v2, %v2042_v41  ;;  %v2646_v24 = vadd.f32 %v5883_v44, %v2618_v51  ;;  %v2415_v2 = vpop.f32.mrf.mxu1 }
 0x3c8   :  { %v2583_v52 = vpop.f32.mrf.mxu0  ;;  %v2439_v41 = vadd.f32 %v2415_v2, %v2249_v8  ;;  %v3960_v8 = vld [vmem:[%s6063_s9 + $0x8] sm:$0xff]  }
 0x3c9   :  { %v2620_v20 = vadd.f32 %v2583_v52, %v2430_v3  ;;  %v2647_v45 = vadd.f32 %v5876_v27, %v2619_v17  ;;  %v2432_v3 = vadd.f32 %v5849_v15, %v2242_v36  ;;  %v2435_v35 = vadd.f32 %v2405_v33, %v2245_v63  ;;  %v3956_v33 = vld [vmem:[%s6063_s9 + $0x18] sm:$0xff]   ;;  %v2419_v55 = vpop.f32.mrf.mxu1 }
 0x3ca   :  { %v2585_v48 = vpop.f32.mrf.mxu0  ;;  %v2248_v15 = vadd.f32 %v5855_v13, %v2050_v50  ;;  %v2437_v17 = vadd.f32 %v5872_v1, %v2247_v43 }
 0x3cb   :  { %v2621_v9 = vadd.f32 %v2585_v48, %v2431_v62  ;;  %v2648_v22 = vadd.f32 %v5883_v44, %v2620_v20  ;;  %v3958_v62 = vld [vmem:[%s6063_s9 + $0x10] sm:$0xff]   ;;  %v2421_v51 = vpop.f32.mrf.mxu1 }
 0x3cc   :  { %v2589_v30 = vpop.f32.mrf.mxu0  ;;  %v2438_v20 = vadd.f32 %v2413_v60, %v2248_v15  ;;  %v6192_v60 = vld [vmem:[#allocation3_spill] sm:$0xff] }
 0x3cd   :  { %v2649_v34 = vadd.f32 %v5876_v27, %v2621_v9  ;;  %v2662_v59 = vmax.f32 %v2646_v24, %v2648_v22  ;;  %v2622_v11 = vadd.f32 %v2589_v30, %v2432_v3  ;;  %v2056_v9 = vadd.f32 %v6190_v37, %v6189_v42  ;;  %v6193_v30 = vld [vmem:[#allocation4_spill] sm:$0xff]  ;;  %v3969_v42 = vld [vmem:[%s6063_s9 + $0x88] sm:$0xff]  }
 0x3ce   :  { %v2591_v57 = vpop.f32.mrf.mxu0  ;;  %v2062_v22 = vadd.f32 %v6192_v60, %v6191_v12  ;;  %v2251_v63 = vadd.f32 %v6193_v30, %v2058_v14  ;;  %v3971_v12 = vld [vmem:[%s6063_s9 + $0x80] sm:$0xff]  }
 0x3cf   :  { %v2663_v38 = vmax.f32 %v2647_v45, %v2649_v34  ;;  %v2623_v19 = vadd.f32 %v2591_v57, %v2433_v25  ;;  %v2650_v52 = vadd.f32 %v5883_v44, %v2622_v11  ;;  %v6194_v45 = vld [vmem:[#allocation5_spill] sm:$0xff]  ;;  %v2423_v25 = vpop.f32.mrf.mxu1  ;;  %v3970_v30 = vld [vmem:[%s6063_s9 + $0x60] sm:$0xff]  }
 0x3d0   :  { %v2593_v28 = vpop.f32.mrf.mxu0  ;;  %v2252_v34 = vadd.f32 %v6194_v45, %v2060_v16  ;;  %v6195_v57 = vld [vmem:[#allocation25_spill] sm:$0xff] }
 0x3d1   :  { %v2624_v46 = vadd.f32 %v2593_v28, %v2434_v40  ;;  %3641 = vmatprep.mubr.msk.f32.mxu1 %vm2690_vm5, %v2663_v38  ;;  %3645 = vmatprep.mubr.msk.f32.mxu0 %vm2690_vm5, %v2663_v38  ;;  %v2651_v13 = vadd.f32 %v5876_v27, %v2623_v19  ;;  %v2250_v38 = vadd.f32 %v6195_v57, %v2056_v9 }
 0x3d2   :  { %v2595_v18 = vpop.f32.mrf.mxu0  ;;  %2768 = vmatmul.mubr.f32.vlgmr.msra.gmra.mxu1 %v2662_v59  ;;  %2873 = vmatmul.mubr.f32.vlgmr.msra.gmra.mxu0 %v2662_v59  ;;  %v2441_v28 = vadd.f32 %v2421_v51, %v2251_v63  ;;  %v2442_v19 = vadd.f32 %v2423_v25, %v2252_v34  ;;  %v3973_v63 = vld [vmem:[%s6063_s9 + $0x78] sm:$0xff]  }
 0x3d3   :  { %v2625_v49 = vadd.f32 %v2595_v18, %v2435_v35  ;;  %3754 = vmatpush3.bf16.msra.mxu0 %v3955_v4  ;;  %3740 = vmatpush3.bf16.msra.mxu1 %v3957_v47  ;;  %v2652_v39 = vadd.f32 %v5883_v44, %v2624_v46  ;;  %v2253_v47 = vadd.f32 %v5865_v6, %v2062_v22  ;;  %v2425_v46 = vpop.f32.mrf.mxu1 }
 0x3d4   :  { %v2599_v53 = vpop.f32.mrf.mxu0  ;;  %3755 = vmatprep.subr.bf16.mxu0 %v6127_v54  ;;  %3741 = vmatprep.subr.bf16.mxu1 %v6127_v54  ;;  %v2440_v10 = vadd.f32 %v2419_v55, %v2250_v38 }
 0x3d5   :  { %v2653_v32 = vadd.f32 %v5876_v27, %v2625_v49  ;;  %v2664_v5 = vmax.f32 %v2650_v52, %v2652_v39  ;;  %v2626_v7 = vadd.f32 %v2599_v53, %v2436_v58  ;;  %v2443_v6 = vadd.f32 %v2425_v46, %v2253_v47  ;;  %v3974_v47 = vld [vmem:[%s6063_s9 + $0x50] sm:$0xff]   ;;  %v3978_v46 = vld [vmem:[%s6065_s11] sm:$0xff]  }
 0x3d6   :  { %v2601_v0 = vpop.f32.mrf.mxu0 }
 0x3d7   :  { %v2665_v56 = vmax.f32 %v2651_v13, %v2653_v32  ;;  %3756 = vmatpush3.bf16.msra.mxu0 %v3956_v33  ;;  %3742 = vmatpush3.bf16.msra.mxu1 %v3959_v26  ;;  %v2627_v1 = vadd.f32 %v2601_v0, %v2437_v17  ;;  %v2654_v2 = vadd.f32 %v5883_v44, %v2626_v7  ;;  %v3961_v13 = vld [vmem:[%s6063_s9 + $0x38] sm:$0xff]   ;;  %v3964_v32 = vld [vmem:[%s6063_s9 + $0x28] sm:$0xff]  }
 0x3d8   :  { %v2603_v23 = vpop.f32.mrf.mxu0  ;;  %3757 = vmatprep.subr.bf16.mxu0 %v6127_v54  ;;  %3743 = vmatprep.subr.bf16.mxu1 %v6127_v54 }
 0x3d9   :  { %v2628_v48 = vadd.f32 %v2603_v23, %v2438_v20  ;;  %3642 = vmatprep.mubr.msk.f32.mxu1 %vm2690_vm5, %v2665_v56  ;;  %3646 = vmatprep.mubr.msk.f32.mxu0 %vm2690_vm5, %v2665_v56  ;;  %v2655_v29 = vadd.f32 %v5876_v27, %v2627_v1 }
 0x3da   :  { %v2605_v36 = vpop.f32.mrf.mxu0  ;;  %2773 = vmatmul.mubr.f32.gmra.mxu1 %v2664_v5  ;;  %2878 = vmatmul.mubr.f32.gmra.mxu0 %v2664_v5  ;;  %v3967_v5 = vld [vmem:[%s6063_s9 + $0x90] sm:$0xff]  }
 0x3db   :  { %v2629_v24 = vadd.f32 %v2605_v36, %v2439_v41  ;;  %3758 = vmatpush3.bf16.msra.mxu0 %v3958_v62  ;;  %v2656_v40 = vadd.f32 %v5883_v44, %v2628_v48  ;;  %3744 = vmatpush3.bf16.msra.mxu1 %v3961_v13  ;;  %v3965_v62 = vld [vmem:[%s6063_s9 + $0x98] sm:$0xff]   ;;  %v3966_v41 = vld [vmem:[%s6063_s9 + $0x70] sm:$0xff]   ;;  %v3968_v36 = vld [vmem:[%s6063_s9 + $0x68] sm:$0xff]  }
 0x3dc   :  { %v2609_v4 = vpop.f32.mrf.mxu0  ;;  %3759 = vmatprep.subr.bf16.mxu0 %v6127_v54  ;;  %3745 = vmatprep.subr.bf16.mxu1 %v6127_v54 }
 0x3dd   :  { %v2657_v50 = vadd.f32 %v5876_v27, %v2629_v24  ;;  %v2666_v35 = vmax.f32 %v2654_v2, %v2656_v40  ;;  %v2630_v43 = vadd.f32 %v2609_v4, %v2440_v10  ;;  %v3972_v24 = vld [vmem:[%s6063_s9 + $0x58] sm:$0xff]  }
 0x3de   :  { %v2611_v59 = vpop.f32.mrf.mxu0 }
 0x3df   :  { %v2667_v3 = vmax.f32 %v2655_v29, %v2657_v50  ;;  %v2631_v11 = vadd.f32 %v2611_v59, %v2441_v28  ;;  %v2658_v55 = vadd.f32 %v5883_v44, %v2630_v43  ;;  %3760 = vmatpush3.bf16.msra.mxu0 %v3960_v8  ;;  %v3975_v59 = vld [vmem:[%s6065_s11 + $0x18] ss:$0 sps:$4 sm:$0x11]   ;;  %v3976_v28 = vld [vmem:[%s6065_s11 + $0x10] sm:$0xff]  }
 0x3e0   :  { %v2613_v61 = vpop.f32.mrf.mxu0  ;;  %3761 = vmatprep.subr.bf16.mxu0 %v6127_v54 }
 0x3e1   :  { %v2632_v18 = vadd.f32 %v2613_v61, %v2442_v19  ;;  %3643 = vmatprep.mubr.msk.f32.mxu1 %vm2690_vm5, %v2667_v3  ;;  %3647 = vmatprep.mubr.msk.f32.mxu0 %vm2690_vm5, %v2667_v3  ;;  %v2659_v26 = vadd.f32 %v5876_v27, %v2631_v11  ;;  %v3294_v3 = vsel %vm3292_vm8, %v3975_v59, 0  ;;  %v3977_v19 = vld [vmem:[%s6065_s11 + $0x8] sm:$0xff]  }
 0x3e2   :  { %v2615_v15 = vpop.f32.mrf.mxu0  ;;  %2778 = vmatmul.mubr.f32.gmra.mxu1 %v2666_v35  ;;  %2883 = vmatmul.mubr.f32.gmra.mxu0 %v2666_v35 }
 0x3e3   :  { %v2633_v49 = vadd.f32 %v2615_v15, %v2443_v6  ;;  %v2660_v33 = vadd.f32 %v5883_v44, %v2632_v18  ;;  %v3963_v44 = vld [vmem:[%s6063_s9 + $0x30] sm:$0xff]  }
 0x3e4   :  { %3746 = vmatpush3.bf16.msra.mxu1 %v3963_v44 }
 0x3e5   :  { %v2661_v31 = vadd.f32 %v5876_v27, %v2633_v49  ;;  %v2668_v53 = vmax.f32 %v2658_v55, %v2660_v33  ;;  %v3962_v27 = vld [vmem:[%s6063_s9] sm:$0xff]   ;;  %3747 = vmatprep.subr.bf16.mxu1 %v6127_v54 }
 0x3e6   :  { %3762 = vmatpush3.bf16.msra.mxu0 %v3962_v27 }
 0x3e7   :  { %v2669_v39 = vmax.f32 %v2659_v26, %v2661_v31  ;;  %3781 = vmatprep.subr.bf16.mxu0 %v6127_v54 }
 0x3e8   :  { %3748 = vmatpush3.bf16.msra.mxu1 %v3964_v32 }
 0x3e9   :  { %3644 = vmatprep.mubr.msk.f32.mxu1 %vm2690_vm5, %v2669_v39  ;;  %3648 = vmatprep.mubr.msk.f32.mxu0 %vm2690_vm5, %v2669_v39 }
 0x3ea   :  { %2783 = vmatmul.mubr.f32.gmra.mxu1 %v2668_v53  ;;  %2888 = vmatmul.mubr.f32.gmra.mxu0 %v2668_v53 }
 0x3eb   :  { %3763 = vmatprep.mubr.msk.bf16.mxu0 %vm3985_vm6, %v6127_v54  ;;  %3749 = vmatprep.mubr.msk.bf16.mxu1 %vm3985_vm6, %v6127_v54 }
 0x3ec   :  { %3767 = vmatprep.subr.bf16.mxu1 %v6127_v54 }
 0x492   :  { %v2769_v14 = vpop.f32.mrf.mxu1  ;;  %v2874_v52 = vpop.f32.mrf.mxu0 }
 0x493   :  { %v2893_v0 = vmax.f32 %v2769_v14, %v2874_v52 }
 0x494   :  { %v2771_v56 = vpop.f32.mrf.mxu1  ;;  %v2876_v17 = vpop.f32.mrf.mxu0 }
 0x495   :  { %v2897_v20 = vmax.f32 %v2893_v0, 0.0  ;;  %v3704_v0 = vld [vmem:[%s6067_s12] ss:$0 sm:$0xff] }
 0x497   :  { %v2901_v21 = vpack.c.bf16 %v2897_v20, %v2897_v20 }
 0x499   :  { %3764 = vmatmul.mubr.msk.bf16.vlgmr.msra.gmra.mxu0 %vm2954_vm7, %v2901_v21 }
 0x49a   :  { %v2774_v16 = vpop.f32.mrf.mxu1  ;;  %v2879_v51 = vpop.f32.mrf.mxu0  ;;  %3782 = vmatpush3.bf16.msra.mxu0 %v3965_v62  ;;  %3791 = vmatprep.mubr.msk.bf16.mxu0 %vm3985_vm6, %v6127_v54 }
 0x49b   :  { %v2894_v58 = vmax.f32 %v2774_v16, %v2879_v51  ;;  %3783 = vmatprep.subr.bf16.mxu0 %v6127_v54 }
 0x49c   :  { %v2776_v23 = vpop.f32.mrf.mxu1  ;;  %v2881_v1 = vpop.f32.mrf.mxu0 }
 0x49d   :  { %v2898_v48 = vmax.f32 %v2894_v58, 0.0 }
 0x49e   :  { %3784 = vmatpush3.bf16.msra.mxu0 %v3967_v5 }
 0x49f   :  { %v2912_v37 = vpack.c.bf16 %v2898_v48, %v2898_v48  ;;  %3785 = vmatprep.subr.bf16.mxu0 %v6127_v54 }
 0x4a1   :  { %3750 = vmatmul.mubr.msk.bf16.vlgmr.msra.gmra.mxu1 %vm2954_vm7, %v2912_v37 }
 0x4a2   :  { %3768 = vmatpush3.bf16.msra.mxu1 %v3966_v41  ;;  %v2779_v9 = vpop.f32.mrf.mxu1  ;;  %v2884_v7 = vpop.f32.mrf.mxu0  ;;  %3786 = vmatpush3.bf16.msra.mxu0 %v3969_v42 }
 0x4a3   :  { %3769 = vmatprep.subr.bf16.mxu1 %v6127_v54  ;;  %3787 = vmatprep.subr.bf16.mxu0 %v6127_v54  ;;  %v2895_v57 = vmax.f32 %v2779_v9, %v2884_v7 }
 0x4a4   :  { %v2781_v60 = vpop.f32.mrf.mxu1  ;;  %v2886_v22 = vpop.f32.mrf.mxu0  ;;  %3777 = vmatprep.mubr.msk.bf16.mxu1 %vm3985_vm6, %v6127_v54 }
 0x4a5   :  { %v2899_v29 = vmax.f32 %v2895_v57, 0.0 }
 0x4a6   :  { %3770 = vmatpush3.bf16.msra.mxu1 %v3968_v36  ;;  %3788 = vmatpush3.bf16.msra.mxu0 %v3971_v12 }
 0x4a7   :  { %3771 = vmatprep.subr.bf16.mxu1 %v6127_v54  ;;  %3789 = vmatprep.subr.bf16.mxu0 %v6127_v54  ;;  %v3071_v2 = vpack.c.bf16 %v2899_v29, %v2899_v29 }
 0x4aa   :  { %3772 = vmatpush3.bf16.msra.mxu1 %v3970_v30  ;;  %v2784_v45 = vpop.f32.mrf.mxu1  ;;  %v2889_v34 = vpop.f32.mrf.mxu0  ;;  %3790 = vmatpush3.bf16.msra.mxu0 %v3973_v63 }
 0x4ab   :  { %v2896_v38 = vmax.f32 %v2784_v45, %v2889_v34  ;;  %3773 = vmatprep.subr.bf16.mxu1 %v6127_v54 }
 0x4ac   :  { %v2786_v25 = vpop.f32.mrf.mxu1  ;;  %v2891_v40 = vpop.f32.mrf.mxu0 }
 0x4ad   :  { %v2900_v4 = vmax.f32 %v2896_v38, 0.0 }
 0x4ae   :  { %3774 = vmatpush3.bf16.msra.mxu1 %v3972_v24 }
 0x4af   :  { %v3157_v50 = vpack.c.bf16 %v2900_v4, %v2900_v4  ;;  %3775 = vmatprep.subr.bf16.mxu1 %v6127_v54 }
 0x4b1   :  { %3792 = vmatmul.mubr.msk.bf16.vlgmr.msra.gmra.mxu0 %vm2954_vm7, %v3157_v50 }
 0x4b2   :  { %3776 = vmatpush3.bf16.msra.mxu1 %v3974_v47 }
 0x4b3   :  { %3795 = vmatprep.subr.bf16.mxu1 %v6127_v54 }
 0x4b5   :  { %3778 = vmatmul.mubr.msk.bf16.vlgmr.msra.gmra.mxu1 %vm2954_vm7, %v3071_v2 }
 0x4b6   :  { %3803 = vmatprep.mubr.msk.bf16.mxu1 %vm3985_vm6, %v6127_v54  ;;  %3796 = vmatpush3.bf16.msra.mxu1 %v3294_v3 }
 0x4b7   :  { %3797 = vmatprep.subr.bf16.mxu1 %v6127_v54 }
 0x4ba   :  { %3798 = vmatpush3.bf16.msra.mxu1 %v3976_v28 }
 0x4bb   :  { %3799 = vmatprep.subr.bf16.mxu1 %v6127_v54 }
 0x4be   :  { %3800 = vmatpush3.bf16.msra.mxu1 %v3977_v19 }
 0x4bf   :  { %3801 = vmatprep.subr.bf16.mxu1 %v6127_v54  ;;  %v3703_v54 = vld [vmem:[%s6066_s10] ss:$0 sm:$0xff] }
 0x4c2   :  { %3802 = vmatpush3.bf16.msra.mxu1 %v3978_v46 }
 0x559   :  { %v3065_v35 = vpop.f32.mrf.mxu0 }
 0x55b   :  { %v3765_v10 = vpop.f32.mrf.mxu0 }
 0x55d   :  { %v3068_v61 = vpop.f32.mrf.mxu0 }
 0x55f   :  { %v3766_v11 = vpop.f32.mrf.mxu0 }
 0x561   :  { %v2992_v18 = vpop.f32.mrf.mxu1 }
 0x562   :  { %v3066_v26 = vadd.f32 %v3065_v35, %v2992_v18 }
 0x563   :  { %v3751_v6 = vpop.f32.mrf.mxu1 }
 0x565   :  { %v2995_v43 = vpop.f32.mrf.mxu1 }
 0x567   :  { %v3752_v15 = vpop.f32.mrf.mxu1 }
 0x571   :  { %v3236_v49 = vpop.f32.mrf.mxu0 }
 0x573   :  { %v3793_v33 = vpop.f32.mrf.mxu0 }
 0x575   :  { %v3150_v31 = vpop.f32.mrf.mxu1  ;;  %v3239_v55 = vpop.f32.mrf.mxu0 }
 0x576   :  { %v3156_v39 = vadd.f32 %v3150_v31, %v3066_v26 }
 0x577   :  { %v3779_v53 = vpop.f32.mrf.mxu1  ;;  %v3794_v8 = vpop.f32.mrf.mxu0 }
 0x578   :  { %v3242_v13 = vadd.f32 %v3236_v49, %v3156_v39 }
 0x579   :  { %v3153_v27 = vpop.f32.mrf.mxu1 }
 0x57a   :  { %v3250_v44 = vadd.f32 %v3703_v54, %v3242_v13 }
 0x57b   :  { %v3780_v32 = vpop.f32.mrf.mxu1 }
 0x57c   :  { %v3251_v14 = vmax.f32 %v3250_v44, 0.0 }
 0x57e   :  { %v3252_v52 = vpack.c.bf16 %v3251_v14, %v3251_v14 }
 0x580   :  { %3804 = vmatmul.mubr.msk.bf16.vlgmr.msra.gmra.mxu1 %vm3288_vm9, %v3252_v52 }
 0x640   :  { %v3330_v56 = vpop.f32.mrf.mxu1 }
 0x641   :  { %v3331_v17 = vadd.f32 %v3704_v0, %v3330_v56 }
 0x642   :  { %v3805_v20 = vpop.f32.mrf.mxu1 }
 0x643   :  { %3336 = vmax.xlane.f32.xlu0 %v3331_v17 }
 0x644   :  { %v3333_v62 = vpop.f32.mrf.mxu1 }
 0x646   :  { %v3806_v21 = vpop.f32.mrf.mxu1 }
 0x6cc   :  { %v3337_v16 = vpop.xlane.xlu0 %3336 }
 0x6cd   :  { %v3338_v51 = vsub.f32 %v3331_v17, %v3337_v16 }
 0x6cf   :  { %v3339_v5 = vmul.f32 1.442695, %v3338_v51 }
 0x6d1   :  { %3979 = vpow2.f32 %v3339_v5 }
 0x6de   :  { %v3980_v58 = vpop.eup %3979 }
 0x6df   :  { %3341 = vadd.xlane.f32.xlu0 %v3980_v58 }
 0x768   :  { %v3342_v23 = vpop.xlane.xlu0 %3341 }
 0x769   :  { %3981 = vlog2.f32 %v3342_v23 }
 0x776   :  { %v3982_v1 = vpop.eup %3981 }
 0x777   :  { %v3344_v48 = vmul.f32 0.6931472, %v3982_v1 }
 0x779   :  { %v3345_v41 = vsub.f32 %v3338_v51, %v3344_v48 }
 0x77b   :  { %3346 = vst [vmem:[%s6068_s13] sm:$0xff] %v3345_v41 }

</bundles_post_ra>
